<compile_context>
chip_gen: v7x
topology: tpu7x:2x2x1
jax: 0.10.0
libtpu: 0.0.40
codegen_flags: <defaults>
</compile_context>

<pallas_src>
import jax
import jax.numpy as jnp
from jax import lax
from jax.experimental import pallas as pl
from jax.experimental.pallas import tpu as pltpu


# --------------------------------------------------------------------------
# Helpers shared by kernel / reference
# --------------------------------------------------------------------------
def _prelu(v, alpha):
    return jnp.where(v > 0, v, alpha * v)


# --------------------------------------------------------------------------
# The fused Pallas kernel (one grid step == one image pair)
# --------------------------------------------------------------------------
def _headblock_kernel(cols0_ref, w0_ref, b0_ref, a0_ref,
                      wg1_ref, wp1_ref, bp1_ref, ap1_ref,
                      wg2_ref, keep_ref, wfin_ref, bfin_ref, aout_ref,
                      out_ref,
                      ypad_ref, tpad_ref, acc_ref):
    f32, bf16 = jnp.float32, jnp.bfloat16
    _, Bh, Bw, C2 = ypad_ref.shape            # (4, Hh+1, Wh+1, 2C)
    Hh, Wh = Bh - 1, Bw - 1
    P = Hh * Wh                               # half-res pixels per image

    # ---- conv0: 3x3 s1 p1 (Cin=1) + folded BN + PReLU, both images in one dot
    cols = cols0_ref[...].reshape(4 * P, cols0_ref.shape[-1])     # (4P, 18) bf16
    y = jnp.dot(cols, w0_ref[...], preferred_element_type=f32)    # (4P, 2C)
    y = _prelu(y + b0_ref[...], a0_ref[...])

    # ---- scatter per-parity planes into the padded bf16 scratch --------------
    # ypad[p, bh, bw, :] == y at padded full-res coordinate (2*bh+ph, 2*bw+pw).
    # Only the 1-element halo row/col is zeroed (every iteration: parallel-safe).
    for p in range(4):
        ph, pw = p // 2, p % 2
        chunk = y[p * P:(p + 1) * P, :].reshape(Hh, Wh, C2).astype(bf16)
        ypad_ref[p, 1 - ph:1 - ph + Hh, 1 - pw:1 - pw + Wh, :] = chunk
        rh, cw = ph * Hh, pw * Wh
        ypad_ref[p, rh:rh + 1, :, :] = jnp.zeros((1, Bw, C2), bf16)
        ypad_ref[p, :, cw:cw + 1, :] = jnp.zeros((Bh, 1, C2), bf16)

    # ---- phase 1: merged b1g1 + b2g1 stride-2 grouped conv -> acc (P, 4C) ----
    # tap (kh,kw) -> parity plane (kh%2, kw%2), contiguous block shift (kh//2, kw//2)
    for kh in range(3):
        for kw in range(3):
            q = (kh % 2) * 2 + (kw % 2)
            sh, sw = kh // 2, kw // 2
            tap = ypad_ref[q, sh:sh + Hh, sw:sw + Wh, :].reshape(P, C2)
            contrib = jnp.dot(tap, wg1_ref[kh * 3 + kw],
                              preferred_element_type=f32)
            if kh == 0 and kw == 0:
                acc_ref[...] = contrib              # skip zero-init add
            else:
                acc_ref[...] += contrib

    # ---- bran1: 1x1 + folded BN + PReLU (wp1 row-padded: no lane slicing) ----
    t = jnp.dot(acc_ref[...].astype(bf16), wp1_ref[...],
                preferred_element_type=f32)
    t = _prelu(t + bp1_ref[...], ap1_ref[...])                    # (P, 2C)

    tpad_ref[1:Hh + 1, 1:Wh + 1, :] = t.reshape(Hh, Wh, C2).astype(bf16)
    tpad_ref[0:1, :, :] = jnp.zeros((1, Wh + 2, C2), bf16)
    tpad_ref[Hh + 1:Hh + 2, :, :] = jnp.zeros((1, Wh + 2, C2), bf16)
    tpad_ref[:, 0:1, :] = jnp.zeros((Hh + 2, 1, C2), bf16)
    tpad_ref[:, Wh + 1:Wh + 2, :] = jnp.zeros((Hh + 2, 1, C2), bf16)

    # ---- phase 2: keep bran2 lanes, clear bran1 lanes, accumulate b1g2 -------
    acc_ref[...] = acc_ref[...] * keep_ref[...]
    for kh in range(3):
        for kw in range(3):
            tap = tpad_ref[kh:kh + Hh, kw:kw + Wh, :].reshape(P, C2)
            acc_ref[...] += jnp.dot(tap, wg2_ref[kh * 3 + kw],
                                    preferred_element_type=f32)

    # ---- fused final 1x1s of BOTH branches + add + PReLU (one K=4C dot) ------
    out = jnp.dot(acc_ref[...].astype(bf16), wfin_ref[...],
                  preferred_element_type=f32)
    out_ref[...] = _prelu(out + bfin_ref[...], aout_ref[...])


# --------------------------------------------------------------------------
# Host-side glue: weight densification / folding, pallas_call setup
# --------------------------------------------------------------------------
def _dense_weight(w_oihw, groups):
    """PyTorch grouped (Cout, Cin/g, KH, KW) -> dense block-diag (KH, KW, Cin, Cout)."""
    Cout, Cing, KH, KW = w_oihw.shape
    Cin, Coutg = Cing * groups, Cout // groups
    wd = jnp.zeros((KH, KW, Cin, Cout), w_oihw.dtype)
    wg = w_oihw.reshape(groups, Coutg, Cing, KH, KW)
    for gi in range(groups):
        blk = jnp.transpose(wg[gi], (2, 3, 1, 0))            # (KH, KW, Cing, Coutg)
        wd = wd.at[:, :, gi * Cing:(gi + 1) * Cing,
                   gi * Coutg:(gi + 1) * Coutg].set(blk)
    return wd


def _fold_1x1(w_oihw, scale):
    """(Cout, Cin, 1, 1) + per-out-channel BN scale -> f32 (Cin, Cout)."""
    return jnp.transpose(w_oihw[:, :, 0, 0], (1, 0)) * scale[None, :]


def _pair_dup(w):
    """Per-image weight (K, M) -> image-pair block-diagonal weight (2K, 2M)."""
    K, M = w.shape
    z = jnp.zeros((K, M), w.dtype)
    top = jnp.concatenate([w, z], axis=1)
    bot = jnp.concatenate([z, w], axis=1)
    return jnp.concatenate([top, bot], axis=0)


def head_block_forward(x_nchw, p, groups):
    """Fused HeadBlock forward.  x_nchw: (N, 1, H, W) f32, N even, H/W even."""
    N, Cin, H, W = x_nchw.shape
    assert Cin == 1 and H % 2 == 0 and W % 2 == 0 and N % 2 == 0
    C = p['conv0_w'].shape[0]
    C2, C4 = 2 * C, 4 * C
    Hh, Wh = H // 2, W // 2
    P = Hh * Wh
    N2 = N // 2
    f32, bf16 = jnp.float32, jnp.bfloat16

    # -- conv0 im2col, parity-major, two images of each pair packed along taps --
    x = x_nchw[:, 0, :, :].astype(f32)                       # (N, H, W)
    xp = jnp.pad(x, ((0, 0), (1, 1), (1, 1)))
    taps = [xp[:, kh:kh + H, kw:kw + W] for kh in range(3) for kw in range(3)]
    cols = jnp.stack(taps, axis=-1)                          # (N, H, W, 9)
    parts = [cols[:, 1 - ph::2, 1 - pw::2, :]
             for ph in (0, 1) for pw in (0, 1)]              # 4 x (N, Hh, Wh, 9)
    colsP = jnp.stack(parts, axis=1).reshape(N, 4, P, 9)
    cols0 = (colsP.reshape(N2, 2, 4, P, 9)
             .transpose(0, 2, 3, 1, 4)
             .reshape(N2, 4, P, 18).astype(bf16))

    # -- weights: BN folded, grouped convs densified, branches merged,
    #    everything duplicated block-diagonally for the image pair -------------
    w0 = (jnp.transpose(p['conv0_w'][:, 0], (1, 2, 0)).reshape(9, C)
          * p['conv0_scale'][None, :])
    w0p = _pair_dup(w0).astype(bf16)                          # (18, 2C)

    d1 = _dense_weight(p['b1g1_w'], groups).reshape(9, C, C)
    d2 = _dense_weight(p['b2g1_w'], groups).reshape(9, C, C)
    wg1_img = jnp.concatenate([d1, d2], axis=-1)              # (9, C, 2C)
    wg1 = jnp.stack([_pair_dup(wg1_img[k]) for k in range(9)], 0).astype(bf16)

    wp1_img = jnp.concatenate(
        [_fold_1x1(p['b1p1_w'], p['b1p1_scale']), jnp.zeros((C, C), f32)], axis=0)
    wp1 = _pair_dup(wp1_img).astype(bf16)                     # (4C, 2C)

    dg2 = _dense_weight(p['b1g2_w'], groups).reshape(9, C, C)
    wg2_img = jnp.concatenate([dg2, jnp.zeros((9, C, C), f32)], axis=-1)
    wg2 = jnp.stack([_pair_dup(wg2_img[k]) for k in range(9)], 0).astype(bf16)

    wfin_img = jnp.concatenate(
        [_fold_1x1(p['b1p2_w'], p['b1p2_scale']),
         _fold_1x1(p['b2p1_w'], p['b2p1_scale'])], axis=0)    # (2C, C)
    wfin = _pair_dup(wfin_img).astype(bf16)                   # (4C, 2C)

    keep = jnp.tile(jnp.concatenate([jnp.zeros((C,), f32),
                                     jnp.ones((C,), f32)]), 2).reshape(1, C4)

    def row2(v):          # per-image (C,) row -> (1, 2C) image-pair row
        return jnp.tile(jnp.asarray(v, f32).reshape(1, C), (1, 2))

    b0 = row2(p['conv0_bias'])
    bp1 = row2(p['b1p1_bias'])
    bfin = row2(p['b1p2_bias'] + p['b2p1_bias'])
    a0 = jnp.full((1, C2), p['conv0_alpha'], f32)
    ap1 = jnp.full((1, C2), p['b1p1_alpha'], f32)
    aout = jnp.full((1, C2), p['out_alpha'], f32)

    operands = (cols0, w0p, b0, a0, wg1, wp1, bp1, ap1,
                wg2, keep, wfin, bfin, aout)

    def const_spec(shape):
        nd = len(shape)
        return pl.BlockSpec(shape, lambda i, nd=nd: (0,) * nd)

    in_specs = [pl.BlockSpec((None, 4, P, 18), lambda i: (i, 0, 0, 0))]
    in_specs += [const_spec(op.shape) for op in operands[1:]]

    out = pl.pallas_call(
        _headblock_kernel,
        out_shape=jax.ShapeDtypeStruct((N2, P, C2), f32),
        grid=(N2,),
        in_specs=in_specs,
        out_specs=pl.BlockSpec((None, P, C2), lambda i: (i, 0, 0)),
        scratch_shapes=[
            pltpu.VMEM((4, Hh + 1, Wh + 1, C2), bf16),   # parity-split padded y
            pltpu.VMEM((Hh + 2, Wh + 2, C2), bf16),      # padded bran1 1x1 output
            pltpu.VMEM((P, C4), f32),                    # grouped-conv accumulator
        ],
        compiler_params=pltpu.CompilerParams(
            dimension_semantics=("parallel",),
            vmem_limit_bytes=32 * 1024 * 1024),
    )(*operands)

    # (N2, P, 2C): lanes = [img0 channels | img1 channels]  ->  NCHW
    out = out.reshape(N2, Hh, Wh, 2, C)
    out = jnp.transpose(out, (0, 3, 4, 1, 2)).reshape(N, C, Hh, Wh)
    return out


# --------------------------------------------------------------------------
# HeadBlock parameters (deterministic, synthetic)
# --------------------------------------------------------------------------
def init_params(key, chan, group_size):
    groups = chan // group_size
    keys = jax.random.split(key, 16)

    def conv_w(k, cout, cin, kh, kw):
        return jax.random.normal(k, (cout, cin, kh, kw), jnp.float32) * 0.1

    def bn(k):
        k1, k2, k3, k4 = jax.random.split(k, 4)
        gamma = jax.random.uniform(k1, (chan,), jnp.float32, 0.5, 1.5)
        beta = jax.random.normal(k2, (chan,), jnp.float32) * 0.1
        mean = jax.random.normal(k3, (chan,), jnp.float32) * 0.1
        var = jax.random.uniform(k4, (chan,), jnp.float32, 0.5, 1.5)
        scale = gamma / jnp.sqrt(var + 1e-5)
        return scale, beta - mean * scale

    p = {}
    p['conv0_w'] = conv_w(keys[0], chan, 1, 3, 3)
    p['conv0_scale'], p['conv0_bias'] = bn(keys[1])
    p['conv0_alpha'] = jnp.float32(0.25)          # nn.PReLU() default init
    p['b1g1_w'] = conv_w(keys[2], chan, chan // groups, 3, 3)
    p['b1p1_w'] = conv_w(keys[3], chan, chan, 1, 1)
    p['b1p1_scale'], p['b1p1_bias'] = bn(keys[4])
    p['b1p1_alpha'] = jnp.float32(0.25)
    p['b1g2_w'] = conv_w(keys[5], chan, chan // groups, 3, 3)
    p['b1p2_w'] = conv_w(keys[6], chan, chan, 1, 1)
    p['b1p2_scale'], p['b1p2_bias'] = bn(keys[7])
    p['b2g1_w'] = conv_w(keys[8], chan, chan // groups, 3, 3)
    p['b2p1_w'] = conv_w(keys[9], chan, chan, 1, 1)
    p['b2p1_scale'], p['b2p1_bias'] = bn(keys[10])
    p['out_alpha'] = jnp.float32(0.25)
    return p, groups


# --------------------------------------------------------------------------
# Pure-JAX reference (lax.conv) with the same bf16-matmul / f32-accumulate
# numerics as the kernel, for correctness checking.
# --------------------------------------------------------------------------
def _conv_ref_bf16(x, w_oihw, scale, stride, padding, groups):
    w = jnp.transpose(w_oihw, (2, 3, 1, 0))                  # OIHW -> HWIO
    if scale is not None:
        w = w * scale                                        # fold BN scale (f32)
    return lax.conv_general_dilated(
        x.astype(jnp.bfloat16), w.astype(jnp.bfloat16),
        (stride, stride), [(padding, padding)] * 2,
        dimension_numbers=('NHWC', 'HWIO', 'NHWC'),
        feature_group_count=groups,
        preferred_element_type=jnp.float32)


def head_block_ref(x_nchw, p, groups):
    x = jnp.transpose(x_nchw, (0, 2, 3, 1)).astype(jnp.float32)
    y = _prelu(_conv_ref_bf16(x, p['conv0_w'], p['conv0_scale'], 1, 1, 1)
               + p['conv0_bias'], p['conv0_alpha'])
    g1a = _conv_ref_bf16(y, p['b1g1_w'], None, 2, 1, groups)
    g1b = _conv_ref_bf16(y, p['b2g1_w'], None, 2, 1, groups)
    t = _prelu(_conv_ref_bf16(g1a, p['b1p1_w'], p['b1p1_scale'], 1, 0, 1)
               + p['b1p1_bias'], p['b1p1_alpha'])
    g2 = _conv_ref_bf16(t, p['b1g2_w'], None, 1, 1, groups)
    out1 = _conv_ref_bf16(g2, p['b1p2_w'], p['b1p2_scale'], 1, 0, 1) + p['b1p2_bias']
    out2 = _conv_ref_bf16(g1b, p['b2p1_w'], p['b2p1_scale'], 1, 0, 1) + p['b2p1_bias']
    out = _prelu(out1 + out2, p['out_alpha'])
    return jnp.transpose(out, (0, 3, 1, 2))


# --------------------------------------------------------------------------
if __name__ == "__main__":
    key = jax.random.PRNGKey(0)
    kx, kp = jax.random.split(key)

    chan, group_size = 64, 32          # -> grouped convs with groups = 2
    N, H, W = 4, 16, 16                # N even: 2 image-pairs -> 2 parallel grid steps
    x = jax.random.normal(kx, (N, 1, H, W), jnp.float32)   # NCHW, 1 input chan

    params, groups = init_params(kp, chan, group_size)

    fwd = jax.jit(lambda xx, pp: head_block_forward(xx, pp, groups))
    out = jax.block_until_ready(fwd(x, params))

    assert out.shape == (N, chan, H // 2, W // 2), out.shape
    ref = head_block_ref(x, params, groups)
    max_err = float(jnp.max(jnp.abs(out - ref)))
    assert max_err < 2e-2, f"mismatch vs reference: max_err={max_err}"

    print("KERNEL_OK")
</pallas_src>

<mosaic_0001>
module attributes {stable_mosaic.version = 11 : i64} {
  func.func @_headblock_kernel(%arg0: i32, %arg1: memref<1x4x64x18xbf16, #tpu.memory_space<vmem>>, %arg2: memref<18x128xbf16, #tpu.memory_space<vmem>>, %arg3: memref<1x128xf32, #tpu.memory_space<vmem>>, %arg4: memref<1x128xf32, #tpu.memory_space<vmem>>, %arg5: memref<9x128x256xbf16, #tpu.memory_space<vmem>>, %arg6: memref<256x128xbf16, #tpu.memory_space<vmem>>, %arg7: memref<1x128xf32, #tpu.memory_space<vmem>>, %arg8: memref<1x128xf32, #tpu.memory_space<vmem>>, %arg9: memref<9x128x256xbf16, #tpu.memory_space<vmem>>, %arg10: memref<1x256xf32, #tpu.memory_space<vmem>>, %arg11: memref<256x128xbf16, #tpu.memory_space<vmem>>, %arg12: memref<1x128xf32, #tpu.memory_space<vmem>>, %arg13: memref<1x128xf32, #tpu.memory_space<vmem>>, %arg14: memref<1x64x128xf32, #tpu.memory_space<vmem>>, %arg15: memref<4x9x9x128xbf16, #tpu.memory_space<vmem>>, %arg16: memref<10x10x128xbf16, #tpu.memory_space<vmem>>, %arg17: memref<64x256xf32, #tpu.memory_space<vmem>>) attributes {dimension_semantics = [#tpu.dimension_semantics<parallel>], iteration_bounds = array<i64: 2>, scalar_prefetch = 0 : i64, scratch_operands = 3 : i64, tpu.core_type = #tpu.core_type<tc>, window_params = [{transform_indices = @transform_0, window_bounds = array<i64: 1, 4, 64, 18>}, {pipeline_mode = #tpu.pipeline_mode<synchronous>, transform_indices = @transform_1, window_bounds = array<i64: 18, 128>}, {pipeline_mode = #tpu.pipeline_mode<synchronous>, transform_indices = @transform_2, window_bounds = array<i64: 1, 128>}, {pipeline_mode = #tpu.pipeline_mode<synchronous>, transform_indices = @transform_3, window_bounds = array<i64: 1, 128>}, {pipeline_mode = #tpu.pipeline_mode<synchronous>, transform_indices = @transform_4, window_bounds = array<i64: 9, 128, 256>}, {pipeline_mode = #tpu.pipeline_mode<synchronous>, transform_indices = @transform_5, window_bounds = array<i64: 256, 128>}, {pipeline_mode = #tpu.pipeline_mode<synchronous>, transform_indices = @transform_6, window_bounds = array<i64: 1, 128>}, {pipeline_mode = #tpu.pipeline_mode<synchronous>, transform_indices = @transform_7, window_bounds = array<i64: 1, 128>}, {pipeline_mode = #tpu.pipeline_mode<synchronous>, transform_indices = @transform_8, window_bounds = array<i64: 9, 128, 256>}, {pipeline_mode = #tpu.pipeline_mode<synchronous>, transform_indices = @transform_9, window_bounds = array<i64: 1, 256>}, {pipeline_mode = #tpu.pipeline_mode<synchronous>, transform_indices = @transform_10, window_bounds = array<i64: 256, 128>}, {pipeline_mode = #tpu.pipeline_mode<synchronous>, transform_indices = @transform_11, window_bounds = array<i64: 1, 128>}, {pipeline_mode = #tpu.pipeline_mode<synchronous>, transform_indices = @transform_12, window_bounds = array<i64: 1, 128>}, {transform_indices = @transform_13, window_bounds = array<i64: 1, 64, 128>}]} {
    %c0 = arith.constant 0 : index
    %c0_0 = arith.constant 0 : index
    %c0_1 = arith.constant 0 : index
    %c0_2 = arith.constant 0 : index
    %0 = vector.load %arg1[%c0, %c0_0, %c0_1, %c0_2] : memref<1x4x64x18xbf16, #tpu.memory_space<vmem>>, vector<1x4x64x18xbf16>
    %1 = vector.shape_cast %0 : vector<1x4x64x18xbf16> to vector<4x64x18xbf16>
    %2 = vector.shape_cast %1 : vector<4x64x18xbf16> to vector<256x18xbf16>
    %c0_3 = arith.constant 0 : index
    %c0_4 = arith.constant 0 : index
    %3 = vector.load %arg2[%c0_3, %c0_4] : memref<18x128xbf16, #tpu.memory_space<vmem>>, vector<18x128xbf16>
    %cst = arith.constant dense<0.000000e+00> : vector<256x128xf32>
    %4 = tpu.matmul %2, %3, %cst {dimension_numbers = #tpu.dot_dimension_numbers<[1], [0], [0], [1], [0, 0, 1, 1], [], []>} : vector<256x18xbf16>, vector<18x128xbf16>, vector<256x128xf32> -> vector<256x128xf32>
    %c0_5 = arith.constant 0 : index
    %c0_6 = arith.constant 0 : index
    %5 = vector.load %arg3[%c0_5, %c0_6] : memref<1x128xf32, #tpu.memory_space<vmem>>, vector<1x128xf32>
    %6 = vector.broadcast %5 : vector<1x128xf32> to vector<256x128xf32>
    %7 = arith.addf %4, %6 : vector<256x128xf32>
    %c0_7 = arith.constant 0 : index
    %c0_8 = arith.constant 0 : index
    %8 = vector.load %arg4[%c0_7, %c0_8] : memref<1x128xf32, #tpu.memory_space<vmem>>, vector<1x128xf32>
    %cst_9 = arith.constant 0.000000e+00 : f32
    %9 = vector.broadcast %cst_9 : f32 to vector<256x128xf32>
    %10 = arith.cmpf ogt, %7, %9 : vector<256x128xf32>
    %11 = vector.broadcast %8 : vector<1x128xf32> to vector<256x128xf32>
    %12 = arith.mulf %11, %7 : vector<256x128xf32>
    %13 = arith.select %10, %7, %12 : vector<256x128xi1>, vector<256x128xf32>
    %14 = vector.extract_strided_slice %13 {offsets = [0, 0], sizes = [64, 128], strides = [1, 1]} : vector<256x128xf32> to vector<64x128xf32>
    %15 = vector.shape_cast %14 : vector<64x128xf32> to vector<8x8x128xf32>
    %16 = arith.truncf %15 : vector<8x8x128xf32> to vector<8x8x128xbf16>
    %c0_10 = arith.constant 0 : index
    %c1 = arith.constant 1 : index
    %c1_11 = arith.constant 1 : index
    %c0_12 = arith.constant 0 : index
    %17 = vector.load %arg15[%c0_10, %c1, %c1_11, %c0_12] : memref<4x9x9x128xbf16, #tpu.memory_space<vmem>>, vector<1x8x8x128xbf16>
    %18 = vector.shape_cast %17 : vector<1x8x8x128xbf16> to vector<8x8x128xbf16>
    %19 = vector.shape_cast %16 : vector<8x8x128xbf16> to vector<1x8x8x128xbf16>
    tpu.vector_store %arg15[%c0_10, %c1, %c1_11, %c0_12], %19 {strides = array<i32>} : memref<4x9x9x128xbf16, #tpu.memory_space<vmem>>, vector<1x8x8x128xbf16>,
    %cst_13 = arith.constant 0.000000e+00 : bf16
    %20 = vector.broadcast %cst_13 : bf16 to vector<1x9x128xbf16>
    %c0_14 = arith.constant 0 : index
    %c0_15 = arith.constant 0 : index
    %c0_16 = arith.constant 0 : index
    %c0_17 = arith.constant 0 : index
    %21 = vector.load %arg15[%c0_14, %c0_15, %c0_16, %c0_17] : memref<4x9x9x128xbf16, #tpu.memory_space<vmem>>, vector<1x1x9x128xbf16>
    %22 = vector.shape_cast %21 : vector<1x1x9x128xbf16> to vector<1x9x128xbf16>
    %23 = vector.shape_cast %20 : vector<1x9x128xbf16> to vector<1x1x9x128xbf16>
    tpu.vector_store %arg15[%c0_14, %c0_15, %c0_16, %c0_17], %23 {strides = array<i32>} : memref<4x9x9x128xbf16, #tpu.memory_space<vmem>>, vector<1x1x9x128xbf16>,
    %cst_18 = arith.constant 0.000000e+00 : bf16
    %24 = vector.broadcast %cst_18 : bf16 to vector<9x1x128xbf16>
    %c0_19 = arith.constant 0 : index
    %c0_20 = arith.constant 0 : index
    %c0_21 = arith.constant 0 : index
    %c0_22 = arith.constant 0 : index
    %25 = vector.load %arg15[%c0_19, %c0_20, %c0_21, %c0_22] : memref<4x9x9x128xbf16, #tpu.memory_space<vmem>>, vector<1x9x1x128xbf16>
    %26 = vector.shape_cast %25 : vector<1x9x1x128xbf16> to vector<9x1x128xbf16>
    %27 = vector.shape_cast %24 : vector<9x1x128xbf16> to vector<1x9x1x128xbf16>
    tpu.vector_store %arg15[%c0_19, %c0_20, %c0_21, %c0_22], %27 {strides = array<i32>} : memref<4x9x9x128xbf16, #tpu.memory_space<vmem>>, vector<1x9x1x128xbf16>,
    %28 = vector.extract_strided_slice %13 {offsets = [64, 0], sizes = [64, 128], strides = [1, 1]} : vector<256x128xf32> to vector<64x128xf32>
    %29 = vector.shape_cast %28 : vector<64x128xf32> to vector<8x8x128xf32>
    %30 = arith.truncf %29 : vector<8x8x128xf32> to vector<8x8x128xbf16>
    %c1_23 = arith.constant 1 : index
    %c1_24 = arith.constant 1 : index
    %c0_25 = arith.constant 0 : index
    %c0_26 = arith.constant 0 : index
    %31 = vector.load %arg15[%c1_23, %c1_24, %c0_25, %c0_26] : memref<4x9x9x128xbf16, #tpu.memory_space<vmem>>, vector<1x8x8x128xbf16>
    %32 = vector.shape_cast %31 : vector<1x8x8x128xbf16> to vector<8x8x128xbf16>
    %33 = vector.shape_cast %30 : vector<8x8x128xbf16> to vector<1x8x8x128xbf16>
    tpu.vector_store %arg15[%c1_23, %c1_24, %c0_25, %c0_26], %33 {strides = array<i32>} : memref<4x9x9x128xbf16, #tpu.memory_space<vmem>>, vector<1x8x8x128xbf16>,
    %cst_27 = arith.constant 0.000000e+00 : bf16
    %34 = vector.broadcast %cst_27 : bf16 to vector<1x9x128xbf16>
    %c1_28 = arith.constant 1 : index
    %c0_29 = arith.constant 0 : index
    %c0_30 = arith.constant 0 : index
    %c0_31 = arith.constant 0 : index
    %35 = vector.load %arg15[%c1_28, %c0_29, %c0_30, %c0_31] : memref<4x9x9x128xbf16, #tpu.memory_space<vmem>>, vector<1x1x9x128xbf16>
    %36 = vector.shape_cast %35 : vector<1x1x9x128xbf16> to vector<1x9x128xbf16>
    %37 = vector.shape_cast %34 : vector<1x9x128xbf16> to vector<1x1x9x128xbf16>
    tpu.vector_store %arg15[%c1_28, %c0_29, %c0_30, %c0_31], %37 {strides = array<i32>} : memref<4x9x9x128xbf16, #tpu.memory_space<vmem>>, vector<1x1x9x128xbf16>,
    %cst_32 = arith.constant 0.000000e+00 : bf16
    %38 = vector.broadcast %cst_32 : bf16 to vector<9x1x128xbf16>
    %c1_33 = arith.constant 1 : index
    %c0_34 = arith.constant 0 : index
    %c8 = arith.constant 8 : index
    %c0_35 = arith.constant 0 : index
    %39 = vector.load %arg15[%c1_33, %c0_34, %c8, %c0_35] : memref<4x9x9x128xbf16, #tpu.memory_space<vmem>>, vector<1x9x1x128xbf16>
    %40 = vector.shape_cast %39 : vector<1x9x1x128xbf16> to vector<9x1x128xbf16>
    %41 = vector.shape_cast %38 : vector<9x1x128xbf16> to vector<1x9x1x128xbf16>
    tpu.vector_store %arg15[%c1_33, %c0_34, %c8, %c0_35], %41 {strides = array<i32>} : memref<4x9x9x128xbf16, #tpu.memory_space<vmem>>, vector<1x9x1x128xbf16>,
    %42 = vector.extract_strided_slice %13 {offsets = [128, 0], sizes = [64, 128], strides = [1, 1]} : vector<256x128xf32> to vector<64x128xf32>
    %43 = vector.shape_cast %42 : vector<64x128xf32> to vector<8x8x128xf32>
    %44 = arith.truncf %43 : vector<8x8x128xf32> to vector<8x8x128xbf16>
    %c2 = arith.constant 2 : index
    %c0_36 = arith.constant 0 : index
    %c1_37 = arith.constant 1 : index
    %c0_38 = arith.constant 0 : index
    %45 = vector.load %arg15[%c2, %c0_36, %c1_37, %c0_38] : memref<4x9x9x128xbf16, #tpu.memory_space<vmem>>, vector<1x8x8x128xbf16>
    %46 = vector.shape_cast %45 : vector<1x8x8x128xbf16> to vector<8x8x128xbf16>
    %47 = vector.shape_cast %44 : vector<8x8x128xbf16> to vector<1x8x8x128xbf16>
    tpu.vector_store %arg15[%c2, %c0_36, %c1_37, %c0_38], %47 {strides = array<i32>} : memref<4x9x9x128xbf16, #tpu.memory_space<vmem>>, vector<1x8x8x128xbf16>,
    %cst_39 = arith.constant 0.000000e+00 : bf16
    %48 = vector.broadcast %cst_39 : bf16 to vector<1x9x128xbf16>
    %c2_40 = arith.constant 2 : index
    %c8_41 = arith.constant 8 : index
    %c0_42 = arith.constant 0 : index
    %c0_43 = arith.constant 0 : index
    %49 = vector.load %arg15[%c2_40, %c8_41, %c0_42, %c0_43] : memref<4x9x9x128xbf16, #tpu.memory_space<vmem>>, vector<1x1x9x128xbf16>
    %50 = vector.shape_cast %49 : vector<1x1x9x128xbf16> to vector<1x9x128xbf16>
    %51 = vector.shape_cast %48 : vector<1x9x128xbf16> to vector<1x1x9x128xbf16>
    tpu.vector_store %arg15[%c2_40, %c8_41, %c0_42, %c0_43], %51 {strides = array<i32>} : memref<4x9x9x128xbf16, #tpu.memory_space<vmem>>, vector<1x1x9x128xbf16>,
    %cst_44 = arith.constant 0.000000e+00 : bf16
    %52 = vector.broadcast %cst_44 : bf16 to vector<9x1x128xbf16>
    %c2_45 = arith.constant 2 : index
    %c0_46 = arith.constant 0 : index
    %c0_47 = arith.constant 0 : index
    %c0_48 = arith.constant 0 : index
    %53 = vector.load %arg15[%c2_45, %c0_46, %c0_47, %c0_48] : memref<4x9x9x128xbf16, #tpu.memory_space<vmem>>, vector<1x9x1x128xbf16>
    %54 = vector.shape_cast %53 : vector<1x9x1x128xbf16> to vector<9x1x128xbf16>
    %55 = vector.shape_cast %52 : vector<9x1x128xbf16> to vector<1x9x1x128xbf16>
    tpu.vector_store %arg15[%c2_45, %c0_46, %c0_47, %c0_48], %55 {strides = array<i32>} : memref<4x9x9x128xbf16, #tpu.memory_space<vmem>>, vector<1x9x1x128xbf16>,
    %56 = vector.extract_strided_slice %13 {offsets = [192, 0], sizes = [64, 128], strides = [1, 1]} : vector<256x128xf32> to vector<64x128xf32>
    %57 = vector.shape_cast %56 : vector<64x128xf32> to vector<8x8x128xf32>
    %58 = arith.truncf %57 : vector<8x8x128xf32> to vector<8x8x128xbf16>
    %c3 = arith.constant 3 : index
    %c0_49 = arith.constant 0 : index
    %c0_50 = arith.constant 0 : index
    %c0_51 = arith.constant 0 : index
    %59 = vector.load %arg15[%c3, %c0_49, %c0_50, %c0_51] : memref<4x9x9x128xbf16, #tpu.memory_space<vmem>>, vector<1x8x8x128xbf16>
    %60 = vector.shape_cast %59 : vector<1x8x8x128xbf16> to vector<8x8x128xbf16>
    %61 = vector.shape_cast %58 : vector<8x8x128xbf16> to vector<1x8x8x128xbf16>
    tpu.vector_store %arg15[%c3, %c0_49, %c0_50, %c0_51], %61 {strides = array<i32>} : memref<4x9x9x128xbf16, #tpu.memory_space<vmem>>, vector<1x8x8x128xbf16>,
    %cst_52 = arith.constant 0.000000e+00 : bf16
    %62 = vector.broadcast %cst_52 : bf16 to vector<1x9x128xbf16>
    %c3_53 = arith.constant 3 : index
    %c8_54 = arith.constant 8 : index
    %c0_55 = arith.constant 0 : index
    %c0_56 = arith.constant 0 : index
    %63 = vector.load %arg15[%c3_53, %c8_54, %c0_55, %c0_56] : memref<4x9x9x128xbf16, #tpu.memory_space<vmem>>, vector<1x1x9x128xbf16>
    %64 = vector.shape_cast %63 : vector<1x1x9x128xbf16> to vector<1x9x128xbf16>
    %65 = vector.shape_cast %62 : vector<1x9x128xbf16> to vector<1x1x9x128xbf16>
    tpu.vector_store %arg15[%c3_53, %c8_54, %c0_55, %c0_56], %65 {strides = array<i32>} : memref<4x9x9x128xbf16, #tpu.memory_space<vmem>>, vector<1x1x9x128xbf16>,
    %cst_57 = arith.constant 0.000000e+00 : bf16
    %66 = vector.broadcast %cst_57 : bf16 to vector<9x1x128xbf16>
    %c3_58 = arith.constant 3 : index
    %c0_59 = arith.constant 0 : index
    %c8_60 = arith.constant 8 : index
    %c0_61 = arith.constant 0 : index
    %67 = vector.load %arg15[%c3_58, %c0_59, %c8_60, %c0_61] : memref<4x9x9x128xbf16, #tpu.memory_space<vmem>>, vector<1x9x1x128xbf16>
    %68 = vector.shape_cast %67 : vector<1x9x1x128xbf16> to vector<9x1x128xbf16>
    %69 = vector.shape_cast %66 : vector<9x1x128xbf16> to vector<1x9x1x128xbf16>
    tpu.vector_store %arg15[%c3_58, %c0_59, %c8_60, %c0_61], %69 {strides = array<i32>} : memref<4x9x9x128xbf16, #tpu.memory_space<vmem>>, vector<1x9x1x128xbf16>,
    %c0_62 = arith.constant 0 : index
    %c0_63 = arith.constant 0 : index
    %c0_64 = arith.constant 0 : index
    %c0_65 = arith.constant 0 : index
    %70 = vector.load %arg15[%c0_62, %c0_63, %c0_64, %c0_65] : memref<4x9x9x128xbf16, #tpu.memory_space<vmem>>, vector<1x8x8x128xbf16>
    %71 = vector.shape_cast %70 : vector<1x8x8x128xbf16> to vector<8x8x128xbf16>
    %72 = vector.shape_cast %71 : vector<8x8x128xbf16> to vector<64x128xbf16>
    %c0_66 = arith.constant 0 : index
    %c0_67 = arith.constant 0 : index
    %c0_68 = arith.constant 0 : index
    %73 = vector.load %arg5[%c0_66, %c0_67, %c0_68] : memref<9x128x256xbf16, #tpu.memory_space<vmem>>, vector<1x128x256xbf16>
    %74 = vector.shape_cast %73 : vector<1x128x256xbf16> to vector<128x256xbf16>
    %cst_69 = arith.constant dense<0.000000e+00> : vector<64x256xf32>
    %75 = tpu.matmul %72, %74, %cst_69 {dimension_numbers = #tpu.dot_dimension_numbers<[1], [0], [0], [1], [0, 0, 1, 1], [], []>} : vector<64x128xbf16>, vector<128x256xbf16>, vector<64x256xf32> -> vector<64x256xf32>
    %c0_70 = arith.constant 0 : index
    %c0_71 = arith.constant 0 : index
    %76 = vector.load %arg17[%c0_70, %c0_71] : memref<64x256xf32, #tpu.memory_space<vmem>>, vector<64x256xf32>
    tpu.vector_store %arg17[%c0_70, %c0_71], %75 {strides = array<i32>} : memref<64x256xf32, #tpu.memory_space<vmem>>, vector<64x256xf32>,
    %c1_72 = arith.constant 1 : index
    %c0_73 = arith.constant 0 : index
    %c0_74 = arith.constant 0 : index
    %c0_75 = arith.constant 0 : index
    %77 = vector.load %arg15[%c1_72, %c0_73, %c0_74, %c0_75] : memref<4x9x9x128xbf16, #tpu.memory_space<vmem>>, vector<1x8x8x128xbf16>
    %78 = vector.shape_cast %77 : vector<1x8x8x128xbf16> to vector<8x8x128xbf16>
    %79 = vector.shape_cast %78 : vector<8x8x128xbf16> to vector<64x128xbf16>
    %c1_76 = arith.constant 1 : index
    %c0_77 = arith.constant 0 : index
    %c0_78 = arith.constant 0 : index
    %80 = vector.load %arg5[%c1_76, %c0_77, %c0_78] : memref<9x128x256xbf16, #tpu.memory_space<vmem>>, vector<1x128x256xbf16>
    %81 = vector.shape_cast %80 : vector<1x128x256xbf16> to vector<128x256xbf16>
    %cst_79 = arith.constant dense<0.000000e+00> : vector<64x256xf32>
    %82 = tpu.matmul %79, %81, %cst_79 {dimension_numbers = #tpu.dot_dimension_numbers<[1], [0], [0], [1], [0, 0, 1, 1], [], []>} : vector<64x128xbf16>, vector<128x256xbf16>, vector<64x256xf32> -> vector<64x256xf32>
    %c0_80 = arith.constant 0 : index
    %c0_81 = arith.constant 0 : index
    %83 = vector.load %arg17[%c0_80, %c0_81] : memref<64x256xf32, #tpu.memory_space<vmem>>, vector<64x256xf32>
    %84 = arith.addf %83, %82 : vector<64x256xf32>
    %c0_82 = arith.constant 0 : index
    %c0_83 = arith.constant 0 : index
    %85 = vector.load %arg17[%c0_82, %c0_83] : memref<64x256xf32, #tpu.memory_space<vmem>>, vector<64x256xf32>
    tpu.vector_store %arg17[%c0_82, %c0_83], %84 {strides = array<i32>} : memref<64x256xf32, #tpu.memory_space<vmem>>, vector<64x256xf32>,
    %c0_84 = arith.constant 0 : index
    %c0_85 = arith.constant 0 : index
    %c1_86 = arith.constant 1 : index
    %c0_87 = arith.constant 0 : index
    %86 = vector.load %arg15[%c0_84, %c0_85, %c1_86, %c0_87] : memref<4x9x9x128xbf16, #tpu.memory_space<vmem>>, vector<1x8x8x128xbf16>
    %87 = vector.shape_cast %86 : vector<1x8x8x128xbf16> to vector<8x8x128xbf16>
    %88 = vector.shape_cast %87 : vector<8x8x128xbf16> to vector<64x128xbf16>
    %c2_88 = arith.constant 2 : index
    %c0_89 = arith.constant 0 : index
    %c0_90 = arith.constant 0 : index
    %89 = vector.load %arg5[%c2_88, %c0_89, %c0_90] : memref<9x128x256xbf16, #tpu.memory_space<vmem>>, vector<1x128x256xbf16>
    %90 = vector.shape_cast %89 : vector<1x128x256xbf16> to vector<128x256xbf16>
    %cst_91 = arith.constant dense<0.000000e+00> : vector<64x256xf32>
    %91 = tpu.matmul %88, %90, %cst_91 {dimension_numbers = #tpu.dot_dimension_numbers<[1], [0], [0], [1], [0, 0, 1, 1], [], []>} : vector<64x128xbf16>, vector<128x256xbf16>, vector<64x256xf32> -> vector<64x256xf32>
    %c0_92 = arith.constant 0 : index
    %c0_93 = arith.constant 0 : index
    %92 = vector.load %arg17[%c0_92, %c0_93] : memref<64x256xf32, #tpu.memory_space<vmem>>, vector<64x256xf32>
    %93 = arith.addf %92, %91 : vector<64x256xf32>
    %c0_94 = arith.constant 0 : index
    %c0_95 = arith.constant 0 : index
    %94 = vector.load %arg17[%c0_94, %c0_95] : memref<64x256xf32, #tpu.memory_space<vmem>>, vector<64x256xf32>
    tpu.vector_store %arg17[%c0_94, %c0_95], %93 {strides = array<i32>} : memref<64x256xf32, #tpu.memory_space<vmem>>, vector<64x256xf32>,
    %c2_96 = arith.constant 2 : index
    %c0_97 = arith.constant 0 : index
    %c0_98 = arith.constant 0 : index
    %c0_99 = arith.constant 0 : index
    %95 = vector.load %arg15[%c2_96, %c0_97, %c0_98, %c0_99] : memref<4x9x9x128xbf16, #tpu.memory_space<vmem>>, vector<1x8x8x128xbf16>
    %96 = vector.shape_cast %95 : vector<1x8x8x128xbf16> to vector<8x8x128xbf16>
    %97 = vector.shape_cast %96 : vector<8x8x128xbf16> to vector<64x128xbf16>
    %c3_100 = arith.constant 3 : index
    %c0_101 = arith.constant 0 : index
    %c0_102 = arith.constant 0 : index
    %98 = vector.load %arg5[%c3_100, %c0_101, %c0_102] : memref<9x128x256xbf16, #tpu.memory_space<vmem>>, vector<1x128x256xbf16>
    %99 = vector.shape_cast %98 : vector<1x128x256xbf16> to vector<128x256xbf16>
    %cst_103 = arith.constant dense<0.000000e+00> : vector<64x256xf32>
    %100 = tpu.matmul %97, %99, %cst_103 {dimension_numbers = #tpu.dot_dimension_numbers<[1], [0], [0], [1], [0, 0, 1, 1], [], []>} : vector<64x128xbf16>, vector<128x256xbf16>, vector<64x256xf32> -> vector<64x256xf32>
    %c0_104 = arith.constant 0 : index
    %c0_105 = arith.constant 0 : index
    %101 = vector.load %arg17[%c0_104, %c0_105] : memref<64x256xf32, #tpu.memory_space<vmem>>, vector<64x256xf32>
    %102 = arith.addf %101, %100 : vector<64x256xf32>
    %c0_106 = arith.constant 0 : index
    %c0_107 = arith.constant 0 : index
    %103 = vector.load %arg17[%c0_106, %c0_107] : memref<64x256xf32, #tpu.memory_space<vmem>>, vector<64x256xf32>
    tpu.vector_store %arg17[%c0_106, %c0_107], %102 {strides = array<i32>} : memref<64x256xf32, #tpu.memory_space<vmem>>, vector<64x256xf32>,
    %c3_108 = arith.constant 3 : index
    %c0_109 = arith.constant 0 : index
    %c0_110 = arith.constant 0 : index
    %c0_111 = arith.constant 0 : index
    %104 = vector.load %arg15[%c3_108, %c0_109, %c0_110, %c0_111] : memref<4x9x9x128xbf16, #tpu.memory_space<vmem>>, vector<1x8x8x128xbf16>
    %105 = vector.shape_cast %104 : vector<1x8x8x128xbf16> to vector<8x8x128xbf16>
    %106 = vector.shape_cast %105 : vector<8x8x128xbf16> to vector<64x128xbf16>
    %c4 = arith.constant 4 : index
    %c0_112 = arith.constant 0 : index
    %c0_113 = arith.constant 0 : index
    %107 = vector.load %arg5[%c4, %c0_112, %c0_113] : memref<9x128x256xbf16, #tpu.memory_space<vmem>>, vector<1x128x256xbf16>
    %108 = vector.shape_cast %107 : vector<1x128x256xbf16> to vector<128x256xbf16>
    %cst_114 = arith.constant dense<0.000000e+00> : vector<64x256xf32>
    %109 = tpu.matmul %106, %108, %cst_114 {dimension_numbers = #tpu.dot_dimension_numbers<[1], [0], [0], [1], [0, 0, 1, 1], [], []>} : vector<64x128xbf16>, vector<128x256xbf16>, vector<64x256xf32> -> vector<64x256xf32>
    %c0_115 = arith.constant 0 : index
    %c0_116 = arith.constant 0 : index
    %110 = vector.load %arg17[%c0_115, %c0_116] : memref<64x256xf32, #tpu.memory_space<vmem>>, vector<64x256xf32>
    %111 = arith.addf %110, %109 : vector<64x256xf32>
    %c0_117 = arith.constant 0 : index
    %c0_118 = arith.constant 0 : index
    %112 = vector.load %arg17[%c0_117, %c0_118] : memref<64x256xf32, #tpu.memory_space<vmem>>, vector<64x256xf32>
    tpu.vector_store %arg17[%c0_117, %c0_118], %111 {strides = array<i32>} : memref<64x256xf32, #tpu.memory_space<vmem>>, vector<64x256xf32>,
    %c2_119 = arith.constant 2 : index
    %c0_120 = arith.constant 0 : index
    %c1_121 = arith.constant 1 : index
    %c0_122 = arith.constant 0 : index
    %113 = vector.load %arg15[%c2_119, %c0_120, %c1_121, %c0_122] : memref<4x9x9x128xbf16, #tpu.memory_space<vmem>>, vector<1x8x8x128xbf16>
    %114 = vector.shape_cast %113 : vector<1x8x8x128xbf16> to vector<8x8x128xbf16>
    %115 = vector.shape_cast %114 : vector<8x8x128xbf16> to vector<64x128xbf16>
    %c5 = arith.constant 5 : index
    %c0_123 = arith.constant 0 : index
    %c0_124 = arith.constant 0 : index
    %116 = vector.load %arg5[%c5, %c0_123, %c0_124] : memref<9x128x256xbf16, #tpu.memory_space<vmem>>, vector<1x128x256xbf16>
    %117 = vector.shape_cast %116 : vector<1x128x256xbf16> to vector<128x256xbf16>
    %cst_125 = arith.constant dense<0.000000e+00> : vector<64x256xf32>
    %118 = tpu.matmul %115, %117, %cst_125 {dimension_numbers = #tpu.dot_dimension_numbers<[1], [0], [0], [1], [0, 0, 1, 1], [], []>} : vector<64x128xbf16>, vector<128x256xbf16>, vector<64x256xf32> -> vector<64x256xf32>
    %c0_126 = arith.constant 0 : index
    %c0_127 = arith.constant 0 : index
    %119 = vector.load %arg17[%c0_126, %c0_127] : memref<64x256xf32, #tpu.memory_space<vmem>>, vector<64x256xf32>
    %120 = arith.addf %119, %118 : vector<64x256xf32>
    %c0_128 = arith.constant 0 : index
    %c0_129 = arith.constant 0 : index
    %121 = vector.load %arg17[%c0_128, %c0_129] : memref<64x256xf32, #tpu.memory_space<vmem>>, vector<64x256xf32>
    tpu.vector_store %arg17[%c0_128, %c0_129], %120 {strides = array<i32>} : memref<64x256xf32, #tpu.memory_space<vmem>>, vector<64x256xf32>,
    %c0_130 = arith.constant 0 : index
    %c1_131 = arith.constant 1 : index
    %c0_132 = arith.constant 0 : index
    %c0_133 = arith.constant 0 : index
    %122 = vector.load %arg15[%c0_130, %c1_131, %c0_132, %c0_133] : memref<4x9x9x128xbf16, #tpu.memory_space<vmem>>, vector<1x8x8x128xbf16>
    %123 = vector.shape_cast %122 : vector<1x8x8x128xbf16> to vector<8x8x128xbf16>
    %124 = vector.shape_cast %123 : vector<8x8x128xbf16> to vector<64x128xbf16>
    %c6 = arith.constant 6 : index
    %c0_134 = arith.constant 0 : index
    %c0_135 = arith.constant 0 : index
    %125 = vector.load %arg5[%c6, %c0_134, %c0_135] : memref<9x128x256xbf16, #tpu.memory_space<vmem>>, vector<1x128x256xbf16>
    %126 = vector.shape_cast %125 : vector<1x128x256xbf16> to vector<128x256xbf16>
    %cst_136 = arith.constant dense<0.000000e+00> : vector<64x256xf32>
    %127 = tpu.matmul %124, %126, %cst_136 {dimension_numbers = #tpu.dot_dimension_numbers<[1], [0], [0], [1], [0, 0, 1, 1], [], []>} : vector<64x128xbf16>, vector<128x256xbf16>, vector<64x256xf32> -> vector<64x256xf32>
    %c0_137 = arith.constant 0 : index
    %c0_138 = arith.constant 0 : index
    %128 = vector.load %arg17[%c0_137, %c0_138] : memref<64x256xf32, #tpu.memory_space<vmem>>, vector<64x256xf32>
    %129 = arith.addf %128, %127 : vector<64x256xf32>
    %c0_139 = arith.constant 0 : index
    %c0_140 = arith.constant 0 : index
    %130 = vector.load %arg17[%c0_139, %c0_140] : memref<64x256xf32, #tpu.memory_space<vmem>>, vector<64x256xf32>
    tpu.vector_store %arg17[%c0_139, %c0_140], %129 {strides = array<i32>} : memref<64x256xf32, #tpu.memory_space<vmem>>, vector<64x256xf32>,
    %c1_141 = arith.constant 1 : index
    %c1_142 = arith.constant 1 : index
    %c0_143 = arith.constant 0 : index
    %c0_144 = arith.constant 0 : index
    %131 = vector.load %arg15[%c1_141, %c1_142, %c0_143, %c0_144] : memref<4x9x9x128xbf16, #tpu.memory_space<vmem>>, vector<1x8x8x128xbf16>
    %132 = vector.shape_cast %131 : vector<1x8x8x128xbf16> to vector<8x8x128xbf16>
    %133 = vector.shape_cast %132 : vector<8x8x128xbf16> to vector<64x128xbf16>
    %c7 = arith.constant 7 : index
    %c0_145 = arith.constant 0 : index
    %c0_146 = arith.constant 0 : index
    %134 = vector.load %arg5[%c7, %c0_145, %c0_146] : memref<9x128x256xbf16, #tpu.memory_space<vmem>>, vector<1x128x256xbf16>
    %135 = vector.shape_cast %134 : vector<1x128x256xbf16> to vector<128x256xbf16>
    %cst_147 = arith.constant dense<0.000000e+00> : vector<64x256xf32>
    %136 = tpu.matmul %133, %135, %cst_147 {dimension_numbers = #tpu.dot_dimension_numbers<[1], [0], [0], [1], [0, 0, 1, 1], [], []>} : vector<64x128xbf16>, vector<128x256xbf16>, vector<64x256xf32> -> vector<64x256xf32>
    %c0_148 = arith.constant 0 : index
    %c0_149 = arith.constant 0 : index
    %137 = vector.load %arg17[%c0_148, %c0_149] : memref<64x256xf32, #tpu.memory_space<vmem>>, vector<64x256xf32>
    %138 = arith.addf %137, %136 : vector<64x256xf32>
    %c0_150 = arith.constant 0 : index
    %c0_151 = arith.constant 0 : index
    %139 = vector.load %arg17[%c0_150, %c0_151] : memref<64x256xf32, #tpu.memory_space<vmem>>, vector<64x256xf32>
    tpu.vector_store %arg17[%c0_150, %c0_151], %138 {strides = array<i32>} : memref<64x256xf32, #tpu.memory_space<vmem>>, vector<64x256xf32>,
    %c0_152 = arith.constant 0 : index
    %c1_153 = arith.constant 1 : index
    %c1_154 = arith.constant 1 : index
    %c0_155 = arith.constant 0 : index
    %140 = vector.load %arg15[%c0_152, %c1_153, %c1_154, %c0_155] : memref<4x9x9x128xbf16, #tpu.memory_space<vmem>>, vector<1x8x8x128xbf16>
    %141 = vector.shape_cast %140 : vector<1x8x8x128xbf16> to vector<8x8x128xbf16>
    %142 = vector.shape_cast %141 : vector<8x8x128xbf16> to vector<64x128xbf16>
    %c8_156 = arith.constant 8 : index
    %c0_157 = arith.constant 0 : index
    %c0_158 = arith.constant 0 : index
    %143 = vector.load %arg5[%c8_156, %c0_157, %c0_158] : memref<9x128x256xbf16, #tpu.memory_space<vmem>>, vector<1x128x256xbf16>
    %144 = vector.shape_cast %143 : vector<1x128x256xbf16> to vector<128x256xbf16>
    %cst_159 = arith.constant dense<0.000000e+00> : vector<64x256xf32>
    %145 = tpu.matmul %142, %144, %cst_159 {dimension_numbers = #tpu.dot_dimension_numbers<[1], [0], [0], [1], [0, 0, 1, 1], [], []>} : vector<64x128xbf16>, vector<128x256xbf16>, vector<64x256xf32> -> vector<64x256xf32>
    %c0_160 = arith.constant 0 : index
    %c0_161 = arith.constant 0 : index
    %146 = vector.load %arg17[%c0_160, %c0_161] : memref<64x256xf32, #tpu.memory_space<vmem>>, vector<64x256xf32>
    %147 = arith.addf %146, %145 : vector<64x256xf32>
    %c0_162 = arith.constant 0 : index
    %c0_163 = arith.constant 0 : index
    %148 = vector.load %arg17[%c0_162, %c0_163] : memref<64x256xf32, #tpu.memory_space<vmem>>, vector<64x256xf32>
    tpu.vector_store %arg17[%c0_162, %c0_163], %147 {strides = array<i32>} : memref<64x256xf32, #tpu.memory_space<vmem>>, vector<64x256xf32>,
    %c0_164 = arith.constant 0 : index
    %c0_165 = arith.constant 0 : index
    %149 = vector.load %arg17[%c0_164, %c0_165] : memref<64x256xf32, #tpu.memory_space<vmem>>, vector<64x256xf32>
    %150 = arith.truncf %149 : vector<64x256xf32> to vector<64x256xbf16>
    %c0_166 = arith.constant 0 : index
    %c0_167 = arith.constant 0 : index
    %151 = vector.load %arg6[%c0_166, %c0_167] : memref<256x128xbf16, #tpu.memory_space<vmem>>, vector<256x128xbf16>
    %cst_168 = arith.constant dense<0.000000e+00> : vector<64x128xf32>
    %152 = tpu.matmul %150, %151, %cst_168 {dimension_numbers = #tpu.dot_dimension_numbers<[1], [0], [0], [1], [0, 0, 1, 1], [], []>} : vector<64x256xbf16>, vector<256x128xbf16>, vector<64x128xf32> -> vector<64x128xf32>
    %c0_169 = arith.constant 0 : index
    %c0_170 = arith.constant 0 : index
    %153 = vector.load %arg7[%c0_169, %c0_170] : memref<1x128xf32, #tpu.memory_space<vmem>>, vector<1x128xf32>
    %154 = vector.broadcast %153 : vector<1x128xf32> to vector<64x128xf32>
    %155 = arith.addf %152, %154 : vector<64x128xf32>
    %c0_171 = arith.constant 0 : index
    %c0_172 = arith.constant 0 : index
    %156 = vector.load %arg8[%c0_171, %c0_172] : memref<1x128xf32, #tpu.memory_space<vmem>>, vector<1x128xf32>
    %cst_173 = arith.constant 0.000000e+00 : f32
    %157 = vector.broadcast %cst_173 : f32 to vector<64x128xf32>
    %158 = arith.cmpf ogt, %155, %157 : vector<64x128xf32>
    %159 = vector.broadcast %156 : vector<1x128xf32> to vector<64x128xf32>
    %160 = arith.mulf %159, %155 : vector<64x128xf32>
    %161 = arith.select %158, %155, %160 : vector<64x128xi1>, vector<64x128xf32>
    %162 = vector.shape_cast %161 : vector<64x128xf32> to vector<8x8x128xf32>
    %163 = arith.truncf %162 : vector<8x8x128xf32> to vector<8x8x128xbf16>
    %c1_174 = arith.constant 1 : index
    %c1_175 = arith.constant 1 : index
    %c0_176 = arith.constant 0 : index
    %164 = vector.load %arg16[%c1_174, %c1_175, %c0_176] : memref<10x10x128xbf16, #tpu.memory_space<vmem>>, vector<8x8x128xbf16>
    tpu.vector_store %arg16[%c1_174, %c1_175, %c0_176], %163 {strides = array<i32>} : memref<10x10x128xbf16, #tpu.memory_space<vmem>>, vector<8x8x128xbf16>,
    %cst_177 = arith.constant 0.000000e+00 : bf16
    %165 = vector.broadcast %cst_177 : bf16 to vector<1x10x128xbf16>
    %c0_178 = arith.constant 0 : index
    %c0_179 = arith.constant 0 : index
    %c0_180 = arith.constant 0 : index
    %166 = vector.load %arg16[%c0_178, %c0_179, %c0_180] : memref<10x10x128xbf16, #tpu.memory_space<vmem>>, vector<1x10x128xbf16>
    tpu.vector_store %arg16[%c0_178, %c0_179, %c0_180], %165 {strides = array<i32>} : memref<10x10x128xbf16, #tpu.memory_space<vmem>>, vector<1x10x128xbf16>,
    %cst_181 = arith.constant 0.000000e+00 : bf16
    %167 = vector.broadcast %cst_181 : bf16 to vector<1x10x128xbf16>
    %c9 = arith.constant 9 : index
    %c0_182 = arith.constant 0 : index
    %c0_183 = arith.constant 0 : index
    %168 = vector.load %arg16[%c9, %c0_182, %c0_183] : memref<10x10x128xbf16, #tpu.memory_space<vmem>>, vector<1x10x128xbf16>
    tpu.vector_store %arg16[%c9, %c0_182, %c0_183], %167 {strides = array<i32>} : memref<10x10x128xbf16, #tpu.memory_space<vmem>>, vector<1x10x128xbf16>,
    %cst_184 = arith.constant 0.000000e+00 : bf16
    %169 = vector.broadcast %cst_184 : bf16 to vector<10x1x128xbf16>
    %c0_185 = arith.constant 0 : index
    %c0_186 = arith.constant 0 : index
    %c0_187 = arith.constant 0 : index
    %170 = vector.load %arg16[%c0_185, %c0_186, %c0_187] : memref<10x10x128xbf16, #tpu.memory_space<vmem>>, vector<10x1x128xbf16>
    tpu.vector_store %arg16[%c0_185, %c0_186, %c0_187], %169 {strides = array<i32>} : memref<10x10x128xbf16, #tpu.memory_space<vmem>>, vector<10x1x128xbf16>,
    %cst_188 = arith.constant 0.000000e+00 : bf16
    %171 = vector.broadcast %cst_188 : bf16 to vector<10x1x128xbf16>
    %c0_189 = arith.constant 0 : index
    %c9_190 = arith.constant 9 : index
    %c0_191 = arith.constant 0 : index
    %172 = vector.load %arg16[%c0_189, %c9_190, %c0_191] : memref<10x10x128xbf16, #tpu.memory_space<vmem>>, vector<10x1x128xbf16>
    tpu.vector_store %arg16[%c0_189, %c9_190, %c0_191], %171 {strides = array<i32>} : memref<10x10x128xbf16, #tpu.memory_space<vmem>>, vector<10x1x128xbf16>,
    %c0_192 = arith.constant 0 : index
    %c0_193 = arith.constant 0 : index
    %173 = vector.load %arg17[%c0_192, %c0_193] : memref<64x256xf32, #tpu.memory_space<vmem>>, vector<64x256xf32>
    %c0_194 = arith.constant 0 : index
    %c0_195 = arith.constant 0 : index
    %174 = vector.load %arg10[%c0_194, %c0_195] : memref<1x256xf32, #tpu.memory_space<vmem>>, vector<1x256xf32>
    %175 = vector.broadcast %174 : vector<1x256xf32> to vector<64x256xf32>
    %176 = arith.mulf %173, %175 : vector<64x256xf32>
    %c0_196 = arith.constant 0 : index
    %c0_197 = arith.constant 0 : index
    %177 = vector.load %arg17[%c0_196, %c0_197] : memref<64x256xf32, #tpu.memory_space<vmem>>, vector<64x256xf32>
    tpu.vector_store %arg17[%c0_196, %c0_197], %176 {strides = array<i32>} : memref<64x256xf32, #tpu.memory_space<vmem>>, vector<64x256xf32>,
    %c0_198 = arith.constant 0 : index
    %c0_199 = arith.constant 0 : index
    %c0_200 = arith.constant 0 : index
    %178 = vector.load %arg16[%c0_198, %c0_199, %c0_200] : memref<10x10x128xbf16, #tpu.memory_space<vmem>>, vector<8x8x128xbf16>
    %179 = vector.shape_cast %178 : vector<8x8x128xbf16> to vector<64x128xbf16>
    %c0_201 = arith.constant 0 : index
    %c0_202 = arith.constant 0 : index
    %180 = vector.load %arg17[%c0_201, %c0_202] : memref<64x256xf32, #tpu.memory_space<vmem>>, vector<64x256xf32>
    %c0_203 = arith.constant 0 : index
    %c0_204 = arith.constant 0 : index
    %c0_205 = arith.constant 0 : index
    %181 = vector.load %arg9[%c0_203, %c0_204, %c0_205] : memref<9x128x256xbf16, #tpu.memory_space<vmem>>, vector<1x128x256xbf16>
    %182 = vector.shape_cast %181 : vector<1x128x256xbf16> to vector<128x256xbf16>
    %cst_206 = arith.constant dense<0.000000e+00> : vector<64x256xf32>
    %183 = tpu.matmul %179, %182, %cst_206 {dimension_numbers = #tpu.dot_dimension_numbers<[1], [0], [0], [1], [0, 0, 1, 1], [], []>} : vector<64x128xbf16>, vector<128x256xbf16>, vector<64x256xf32> -> vector<64x256xf32>
    %184 = arith.addf %180, %183 : vector<64x256xf32>
    %c0_207 = arith.constant 0 : index
    %c0_208 = arith.constant 0 : index
    %185 = vector.load %arg17[%c0_207, %c0_208] : memref<64x256xf32, #tpu.memory_space<vmem>>, vector<64x256xf32>
    tpu.vector_store %arg17[%c0_207, %c0_208], %184 {strides = array<i32>} : memref<64x256xf32, #tpu.memory_space<vmem>>, vector<64x256xf32>,
    %c0_209 = arith.constant 0 : index
    %c1_210 = arith.constant 1 : index
    %c0_211 = arith.constant 0 : index
    %186 = vector.load %arg16[%c0_209, %c1_210, %c0_211] : memref<10x10x128xbf16, #tpu.memory_space<vmem>>, vector<8x8x128xbf16>
    %187 = vector.shape_cast %186 : vector<8x8x128xbf16> to vector<64x128xbf16>
    %c0_212 = arith.constant 0 : index
    %c0_213 = arith.constant 0 : index
    %188 = vector.load %arg17[%c0_212, %c0_213] : memref<64x256xf32, #tpu.memory_space<vmem>>, vector<64x256xf32>
    %c1_214 = arith.constant 1 : index
    %c0_215 = arith.constant 0 : index
    %c0_216 = arith.constant 0 : index
    %189 = vector.load %arg9[%c1_214, %c0_215, %c0_216] : memref<9x128x256xbf16, #tpu.memory_space<vmem>>, vector<1x128x256xbf16>
    %190 = vector.shape_cast %189 : vector<1x128x256xbf16> to vector<128x256xbf16>
    %cst_217 = arith.constant dense<0.000000e+00> : vector<64x256xf32>
    %191 = tpu.matmul %187, %190, %cst_217 {dimension_numbers = #tpu.dot_dimension_numbers<[1], [0], [0], [1], [0, 0, 1, 1], [], []>} : vector<64x128xbf16>, vector<128x256xbf16>, vector<64x256xf32> -> vector<64x256xf32>
    %192 = arith.addf %188, %191 : vector<64x256xf32>
    %c0_218 = arith.constant 0 : index
    %c0_219 = arith.constant 0 : index
    %193 = vector.load %arg17[%c0_218, %c0_219] : memref<64x256xf32, #tpu.memory_space<vmem>>, vector<64x256xf32>
    tpu.vector_store %arg17[%c0_218, %c0_219], %192 {strides = array<i32>} : memref<64x256xf32, #tpu.memory_space<vmem>>, vector<64x256xf32>,
    %c0_220 = arith.constant 0 : index
    %c2_221 = arith.constant 2 : index
    %c0_222 = arith.constant 0 : index
    %194 = vector.load %arg16[%c0_220, %c2_221, %c0_222] : memref<10x10x128xbf16, #tpu.memory_space<vmem>>, vector<8x8x128xbf16>
    %195 = vector.shape_cast %194 : vector<8x8x128xbf16> to vector<64x128xbf16>
    %c0_223 = arith.constant 0 : index
    %c0_224 = arith.constant 0 : index
    %196 = vector.load %arg17[%c0_223, %c0_224] : memref<64x256xf32, #tpu.memory_space<vmem>>, vector<64x256xf32>
    %c2_225 = arith.constant 2 : index
    %c0_226 = arith.constant 0 : index
    %c0_227 = arith.constant 0 : index
    %197 = vector.load %arg9[%c2_225, %c0_226, %c0_227] : memref<9x128x256xbf16, #tpu.memory_space<vmem>>, vector<1x128x256xbf16>
    %198 = vector.shape_cast %197 : vector<1x128x256xbf16> to vector<128x256xbf16>
    %cst_228 = arith.constant dense<0.000000e+00> : vector<64x256xf32>
    %199 = tpu.matmul %195, %198, %cst_228 {dimension_numbers = #tpu.dot_dimension_numbers<[1], [0], [0], [1], [0, 0, 1, 1], [], []>} : vector<64x128xbf16>, vector<128x256xbf16>, vector<64x256xf32> -> vector<64x256xf32>
    %200 = arith.addf %196, %199 : vector<64x256xf32>
    %c0_229 = arith.constant 0 : index
    %c0_230 = arith.constant 0 : index
    %201 = vector.load %arg17[%c0_229, %c0_230] : memref<64x256xf32, #tpu.memory_space<vmem>>, vector<64x256xf32>
    tpu.vector_store %arg17[%c0_229, %c0_230], %200 {strides = array<i32>} : memref<64x256xf32, #tpu.memory_space<vmem>>, vector<64x256xf32>,
    %c1_231 = arith.constant 1 : index
    %c0_232 = arith.constant 0 : index
    %c0_233 = arith.constant 0 : index
    %202 = vector.load %arg16[%c1_231, %c0_232, %c0_233] : memref<10x10x128xbf16, #tpu.memory_space<vmem>>, vector<8x8x128xbf16>
    %203 = vector.shape_cast %202 : vector<8x8x128xbf16> to vector<64x128xbf16>
    %c0_234 = arith.constant 0 : index
    %c0_235 = arith.constant 0 : index
    %204 = vector.load %arg17[%c0_234, %c0_235] : memref<64x256xf32, #tpu.memory_space<vmem>>, vector<64x256xf32>
    %c3_236 = arith.constant 3 : index
    %c0_237 = arith.constant 0 : index
    %c0_238 = arith.constant 0 : index
    %205 = vector.load %arg9[%c3_236, %c0_237, %c0_238] : memref<9x128x256xbf16, #tpu.memory_space<vmem>>, vector<1x128x256xbf16>
    %206 = vector.shape_cast %205 : vector<1x128x256xbf16> to vector<128x256xbf16>
    %cst_239 = arith.constant dense<0.000000e+00> : vector<64x256xf32>
    %207 = tpu.matmul %203, %206, %cst_239 {dimension_numbers = #tpu.dot_dimension_numbers<[1], [0], [0], [1], [0, 0, 1, 1], [], []>} : vector<64x128xbf16>, vector<128x256xbf16>, vector<64x256xf32> -> vector<64x256xf32>
    %208 = arith.addf %204, %207 : vector<64x256xf32>
    %c0_240 = arith.constant 0 : index
    %c0_241 = arith.constant 0 : index
    %209 = vector.load %arg17[%c0_240, %c0_241] : memref<64x256xf32, #tpu.memory_space<vmem>>, vector<64x256xf32>
    tpu.vector_store %arg17[%c0_240, %c0_241], %208 {strides = array<i32>} : memref<64x256xf32, #tpu.memory_space<vmem>>, vector<64x256xf32>,
    %c1_242 = arith.constant 1 : index
    %c1_243 = arith.constant 1 : index
    %c0_244 = arith.constant 0 : index
    %210 = vector.load %arg16[%c1_242, %c1_243, %c0_244] : memref<10x10x128xbf16, #tpu.memory_space<vmem>>, vector<8x8x128xbf16>
    %211 = vector.shape_cast %210 : vector<8x8x128xbf16> to vector<64x128xbf16>
    %c0_245 = arith.constant 0 : index
    %c0_246 = arith.constant 0 : index
    %212 = vector.load %arg17[%c0_245, %c0_246] : memref<64x256xf32, #tpu.memory_space<vmem>>, vector<64x256xf32>
    %c4_247 = arith.constant 4 : index
    %c0_248 = arith.constant 0 : index
    %c0_249 = arith.constant 0 : index
    %213 = vector.load %arg9[%c4_247, %c0_248, %c0_249] : memref<9x128x256xbf16, #tpu.memory_space<vmem>>, vector<1x128x256xbf16>
    %214 = vector.shape_cast %213 : vector<1x128x256xbf16> to vector<128x256xbf16>
    %cst_250 = arith.constant dense<0.000000e+00> : vector<64x256xf32>
    %215 = tpu.matmul %211, %214, %cst_250 {dimension_numbers = #tpu.dot_dimension_numbers<[1], [0], [0], [1], [0, 0, 1, 1], [], []>} : vector<64x128xbf16>, vector<128x256xbf16>, vector<64x256xf32> -> vector<64x256xf32>
    %216 = arith.addf %212, %215 : vector<64x256xf32>
    %c0_251 = arith.constant 0 : index
    %c0_252 = arith.constant 0 : index
    %217 = vector.load %arg17[%c0_251, %c0_252] : memref<64x256xf32, #tpu.memory_space<vmem>>, vector<64x256xf32>
    tpu.vector_store %arg17[%c0_251, %c0_252], %216 {strides = array<i32>} : memref<64x256xf32, #tpu.memory_space<vmem>>, vector<64x256xf32>,
    %c1_253 = arith.constant 1 : index
    %c2_254 = arith.constant 2 : index
    %c0_255 = arith.constant 0 : index
    %218 = vector.load %arg16[%c1_253, %c2_254, %c0_255] : memref<10x10x128xbf16, #tpu.memory_space<vmem>>, vector<8x8x128xbf16>
    %219 = vector.shape_cast %218 : vector<8x8x128xbf16> to vector<64x128xbf16>
    %c0_256 = arith.constant 0 : index
    %c0_257 = arith.constant 0 : index
    %220 = vector.load %arg17[%c0_256, %c0_257] : memref<64x256xf32, #tpu.memory_space<vmem>>, vector<64x256xf32>
    %c5_258 = arith.constant 5 : index
    %c0_259 = arith.constant 0 : index
    %c0_260 = arith.constant 0 : index
    %221 = vector.load %arg9[%c5_258, %c0_259, %c0_260] : memref<9x128x256xbf16, #tpu.memory_space<vmem>>, vector<1x128x256xbf16>
    %222 = vector.shape_cast %221 : vector<1x128x256xbf16> to vector<128x256xbf16>
    %cst_261 = arith.constant dense<0.000000e+00> : vector<64x256xf32>
    %223 = tpu.matmul %219, %222, %cst_261 {dimension_numbers = #tpu.dot_dimension_numbers<[1], [0], [0], [1], [0, 0, 1, 1], [], []>} : vector<64x128xbf16>, vector<128x256xbf16>, vector<64x256xf32> -> vector<64x256xf32>
    %224 = arith.addf %220, %223 : vector<64x256xf32>
    %c0_262 = arith.constant 0 : index
    %c0_263 = arith.constant 0 : index
    %225 = vector.load %arg17[%c0_262, %c0_263] : memref<64x256xf32, #tpu.memory_space<vmem>>, vector<64x256xf32>
    tpu.vector_store %arg17[%c0_262, %c0_263], %224 {strides = array<i32>} : memref<64x256xf32, #tpu.memory_space<vmem>>, vector<64x256xf32>,
    %c2_264 = arith.constant 2 : index
    %c0_265 = arith.constant 0 : index
    %c0_266 = arith.constant 0 : index
    %226 = vector.load %arg16[%c2_264, %c0_265, %c0_266] : memref<10x10x128xbf16, #tpu.memory_space<vmem>>, vector<8x8x128xbf16>
    %227 = vector.shape_cast %226 : vector<8x8x128xbf16> to vector<64x128xbf16>
    %c0_267 = arith.constant 0 : index
    %c0_268 = arith.constant 0 : index
    %228 = vector.load %arg17[%c0_267, %c0_268] : memref<64x256xf32, #tpu.memory_space<vmem>>, vector<64x256xf32>
    %c6_269 = arith.constant 6 : index
    %c0_270 = arith.constant 0 : index
    %c0_271 = arith.constant 0 : index
    %229 = vector.load %arg9[%c6_269, %c0_270, %c0_271] : memref<9x128x256xbf16, #tpu.memory_space<vmem>>, vector<1x128x256xbf16>
    %230 = vector.shape_cast %229 : vector<1x128x256xbf16> to vector<128x256xbf16>
    %cst_272 = arith.constant dense<0.000000e+00> : vector<64x256xf32>
    %231 = tpu.matmul %227, %230, %cst_272 {dimension_numbers = #tpu.dot_dimension_numbers<[1], [0], [0], [1], [0, 0, 1, 1], [], []>} : vector<64x128xbf16>, vector<128x256xbf16>, vector<64x256xf32> -> vector<64x256xf32>
    %232 = arith.addf %228, %231 : vector<64x256xf32>
    %c0_273 = arith.constant 0 : index
    %c0_274 = arith.constant 0 : index
    %233 = vector.load %arg17[%c0_273, %c0_274] : memref<64x256xf32, #tpu.memory_space<vmem>>, vector<64x256xf32>
    tpu.vector_store %arg17[%c0_273, %c0_274], %232 {strides = array<i32>} : memref<64x256xf32, #tpu.memory_space<vmem>>, vector<64x256xf32>,
    %c2_275 = arith.constant 2 : index
    %c1_276 = arith.constant 1 : index
    %c0_277 = arith.constant 0 : index
    %234 = vector.load %arg16[%c2_275, %c1_276, %c0_277] : memref<10x10x128xbf16, #tpu.memory_space<vmem>>, vector<8x8x128xbf16>
    %235 = vector.shape_cast %234 : vector<8x8x128xbf16> to vector<64x128xbf16>
    %c0_278 = arith.constant 0 : index
    %c0_279 = arith.constant 0 : index
    %236 = vector.load %arg17[%c0_278, %c0_279] : memref<64x256xf32, #tpu.memory_space<vmem>>, vector<64x256xf32>
    %c7_280 = arith.constant 7 : index
    %c0_281 = arith.constant 0 : index
    %c0_282 = arith.constant 0 : index
    %237 = vector.load %arg9[%c7_280, %c0_281, %c0_282] : memref<9x128x256xbf16, #tpu.memory_space<vmem>>, vector<1x128x256xbf16>
    %238 = vector.shape_cast %237 : vector<1x128x256xbf16> to vector<128x256xbf16>
    %cst_283 = arith.constant dense<0.000000e+00> : vector<64x256xf32>
    %239 = tpu.matmul %235, %238, %cst_283 {dimension_numbers = #tpu.dot_dimension_numbers<[1], [0], [0], [1], [0, 0, 1, 1], [], []>} : vector<64x128xbf16>, vector<128x256xbf16>, vector<64x256xf32> -> vector<64x256xf32>
    %240 = arith.addf %236, %239 : vector<64x256xf32>
    %c0_284 = arith.constant 0 : index
    %c0_285 = arith.constant 0 : index
    %241 = vector.load %arg17[%c0_284, %c0_285] : memref<64x256xf32, #tpu.memory_space<vmem>>, vector<64x256xf32>
    tpu.vector_store %arg17[%c0_284, %c0_285], %240 {strides = array<i32>} : memref<64x256xf32, #tpu.memory_space<vmem>>, vector<64x256xf32>,
    %c2_286 = arith.constant 2 : index
    %c2_287 = arith.constant 2 : index
    %c0_288 = arith.constant 0 : index
    %242 = vector.load %arg16[%c2_286, %c2_287, %c0_288] : memref<10x10x128xbf16, #tpu.memory_space<vmem>>, vector<8x8x128xbf16>
    %243 = vector.shape_cast %242 : vector<8x8x128xbf16> to vector<64x128xbf16>
    %c0_289 = arith.constant 0 : index
    %c0_290 = arith.constant 0 : index
    %244 = vector.load %arg17[%c0_289, %c0_290] : memref<64x256xf32, #tpu.memory_space<vmem>>, vector<64x256xf32>
    %c8_291 = arith.constant 8 : index
    %c0_292 = arith.constant 0 : index
    %c0_293 = arith.constant 0 : index
    %245 = vector.load %arg9[%c8_291, %c0_292, %c0_293] : memref<9x128x256xbf16, #tpu.memory_space<vmem>>, vector<1x128x256xbf16>
    %246 = vector.shape_cast %245 : vector<1x128x256xbf16> to vector<128x256xbf16>
    %cst_294 = arith.constant dense<0.000000e+00> : vector<64x256xf32>
    %247 = tpu.matmul %243, %246, %cst_294 {dimension_numbers = #tpu.dot_dimension_numbers<[1], [0], [0], [1], [0, 0, 1, 1], [], []>} : vector<64x128xbf16>, vector<128x256xbf16>, vector<64x256xf32> -> vector<64x256xf32>
    %248 = arith.addf %244, %247 : vector<64x256xf32>
    %c0_295 = arith.constant 0 : index
    %c0_296 = arith.constant 0 : index
    %249 = vector.load %arg17[%c0_295, %c0_296] : memref<64x256xf32, #tpu.memory_space<vmem>>, vector<64x256xf32>
    tpu.vector_store %arg17[%c0_295, %c0_296], %248 {strides = array<i32>} : memref<64x256xf32, #tpu.memory_space<vmem>>, vector<64x256xf32>,
    %c0_297 = arith.constant 0 : index
    %c0_298 = arith.constant 0 : index
    %250 = vector.load %arg17[%c0_297, %c0_298] : memref<64x256xf32, #tpu.memory_space<vmem>>, vector<64x256xf32>
    %251 = arith.truncf %250 : vector<64x256xf32> to vector<64x256xbf16>
    %c0_299 = arith.constant 0 : index
    %c0_300 = arith.constant 0 : index
    %252 = vector.load %arg11[%c0_299, %c0_300] : memref<256x128xbf16, #tpu.memory_space<vmem>>, vector<256x128xbf16>
    %cst_301 = arith.constant dense<0.000000e+00> : vector<64x128xf32>
    %253 = tpu.matmul %251, %252, %cst_301 {dimension_numbers = #tpu.dot_dimension_numbers<[1], [0], [0], [1], [0, 0, 1, 1], [], []>} : vector<64x256xbf16>, vector<256x128xbf16>, vector<64x128xf32> -> vector<64x128xf32>
    %c0_302 = arith.constant 0 : index
    %c0_303 = arith.constant 0 : index
    %254 = vector.load %arg12[%c0_302, %c0_303] : memref<1x128xf32, #tpu.memory_space<vmem>>, vector<1x128xf32>
    %255 = vector.broadcast %254 : vector<1x128xf32> to vector<64x128xf32>
    %256 = arith.addf %253, %255 : vector<64x128xf32>
    %c0_304 = arith.constant 0 : index
    %c0_305 = arith.constant 0 : index
    %257 = vector.load %arg13[%c0_304, %c0_305] : memref<1x128xf32, #tpu.memory_space<vmem>>, vector<1x128xf32>
    %cst_306 = arith.constant 0.000000e+00 : f32
    %258 = vector.broadcast %cst_306 : f32 to vector<64x128xf32>
    %259 = arith.cmpf ogt, %256, %258 : vector<64x128xf32>
    %260 = vector.broadcast %257 : vector<1x128xf32> to vector<64x128xf32>
    %261 = arith.mulf %260, %256 : vector<64x128xf32>
    %262 = arith.select %259, %256, %261 : vector<64x128xi1>, vector<64x128xf32>
    %c0_307 = arith.constant 0 : index
    %c0_308 = arith.constant 0 : index
    %c0_309 = arith.constant 0 : index
    %263 = vector.load %arg14[%c0_307, %c0_308, %c0_309] : memref<1x64x128xf32, #tpu.memory_space<vmem>>, vector<1x64x128xf32>
    %264 = vector.shape_cast %263 : vector<1x64x128xf32> to vector<64x128xf32>
    %265 = vector.shape_cast %262 : vector<64x128xf32> to vector<1x64x128xf32>
    tpu.vector_store %arg14[%c0_307, %c0_308, %c0_309], %265 {strides = array<i32>} : memref<1x64x128xf32, #tpu.memory_space<vmem>>, vector<1x64x128xf32>,
    return
  }
  func.func @transform_0(%arg0: i32) -> (i32, i32, i32, i32) {
    %c0_i32 = arith.constant 0 : i32
    %c0_i32_0 = arith.constant 0 : i32
    %c0_i32_1 = arith.constant 0 : i32
    %c0_i32_2 = arith.constant 0 : i32
    return %arg0, %c0_i32, %c0_i32_0, %c0_i32_1 : i32, i32, i32, i32
  }
  func.func @transform_1(%arg0: i32) -> (i32, i32) {
    %c0_i32 = arith.constant 0 : i32
    %c0_i32_0 = arith.constant 0 : i32
    %c0_i32_1 = arith.constant 0 : i32
    return %c0_i32, %c0_i32_0 : i32, i32
  }
  func.func @transform_2(%arg0: i32) -> (i32, i32) {
    %c0_i32 = arith.constant 0 : i32
    %c0_i32_0 = arith.constant 0 : i32
    %c0_i32_1 = arith.constant 0 : i32
    return %c0_i32, %c0_i32_0 : i32, i32
  }
  func.func @transform_3(%arg0: i32) -> (i32, i32) {
    %c0_i32 = arith.constant 0 : i32
    %c0_i32_0 = arith.constant 0 : i32
    %c0_i32_1 = arith.constant 0 : i32
    return %c0_i32, %c0_i32_0 : i32, i32
  }
  func.func @transform_4(%arg0: i32) -> (i32, i32, i32) {
    %c0_i32 = arith.constant 0 : i32
    %c0_i32_0 = arith.constant 0 : i32
    %c0_i32_1 = arith.constant 0 : i32
    %c0_i32_2 = arith.constant 0 : i32
    return %c0_i32, %c0_i32_0, %c0_i32_1 : i32, i32, i32
  }
  func.func @transform_5(%arg0: i32) -> (i32, i32) {
    %c0_i32 = arith.constant 0 : i32
    %c0_i32_0 = arith.constant 0 : i32
    %c0_i32_1 = arith.constant 0 : i32
    return %c0_i32, %c0_i32_0 : i32, i32
  }
  func.func @transform_6(%arg0: i32) -> (i32, i32) {
    %c0_i32 = arith.constant 0 : i32
    %c0_i32_0 = arith.constant 0 : i32
    %c0_i32_1 = arith.constant 0 : i32
    return %c0_i32, %c0_i32_0 : i32, i32
  }
  func.func @transform_7(%arg0: i32) -> (i32, i32) {
    %c0_i32 = arith.constant 0 : i32
    %c0_i32_0 = arith.constant 0 : i32
    %c0_i32_1 = arith.constant 0 : i32
    return %c0_i32, %c0_i32_0 : i32, i32
  }
  func.func @transform_8(%arg0: i32) -> (i32, i32, i32) {
    %c0_i32 = arith.constant 0 : i32
    %c0_i32_0 = arith.constant 0 : i32
    %c0_i32_1 = arith.constant 0 : i32
    %c0_i32_2 = arith.constant 0 : i32
    return %c0_i32, %c0_i32_0, %c0_i32_1 : i32, i32, i32
  }
  func.func @transform_9(%arg0: i32) -> (i32, i32) {
    %c0_i32 = arith.constant 0 : i32
    %c0_i32_0 = arith.constant 0 : i32
    %c0_i32_1 = arith.constant 0 : i32
    return %c0_i32, %c0_i32_0 : i32, i32
  }
  func.func @transform_10(%arg0: i32) -> (i32, i32) {
    %c0_i32 = arith.constant 0 : i32
    %c0_i32_0 = arith.constant 0 : i32
    %c0_i32_1 = arith.constant 0 : i32
    return %c0_i32, %c0_i32_0 : i32, i32
  }
  func.func @transform_11(%arg0: i32) -> (i32, i32) {
    %c0_i32 = arith.constant 0 : i32
    %c0_i32_0 = arith.constant 0 : i32
    %c0_i32_1 = arith.constant 0 : i32
    return %c0_i32, %c0_i32_0 : i32, i32
  }
  func.func @transform_12(%arg0: i32) -> (i32, i32) {
    %c0_i32 = arith.constant 0 : i32
    %c0_i32_0 = arith.constant 0 : i32
    %c0_i32_1 = arith.constant 0 : i32
    return %c0_i32, %c0_i32_0 : i32, i32
  }
  func.func @transform_13(%arg0: i32) -> (i32, i32, i32) {
    %c0_i32 = arith.constant 0 : i32
    %c0_i32_0 = arith.constant 0 : i32
    %c0_i32_1 = arith.constant 0 : i32
    return %arg0, %c0_i32, %c0_i32_0 : i32, i32, i32
  }
}

</mosaic_0001>

<bundles_post_ra>
// kernel: tile.18
= control target key start
LH: loop header
LB: loop body
LE: loop exit
PB: predicated region body
PF: predicated region fallthrough
CT: control target
= control target key end

     0   :  { %s22_s0 = inlined_call_operand.vmem [shape: f32[128], index: 0, kind: input, shape index: {}]   ;;  %s23_s1 = inlined_call_operand.vmem [shape: f32[2,128], index: 1, kind: output, shape index: {}]  }
   0x1   :  { %v4_v0 = vld [vmem:[%s22_s0] ss:$0 sm:$0xff] }
   0x2   :  { %5 = vst [vmem:[%s23_s1] sm:$0x3] %v4_v0 }

// kernel: _lambda_.1
= control target key start
LH: loop header
LB: loop body
LE: loop exit
PB: predicated region body
PF: predicated region fallthrough
CT: control target
= control target key end

     0   :  { %s9321_s25 = smov 0   ;;  %s11099_s0 = inlined_call_operand.vmem [shape: bf16[2,4,64,18], index: 0, kind: input, shape index: {}]   ;;  %s11100_s1 = inlined_call_operand.vmem [shape: bf16[18,128], index: 1, kind: input, shape index: {}]   ;;  %s11101_s2 = inlined_call_operand.vmem [shape: f32[1,128], index: 2, kind: input, shape index: {}]   ;;  %s11102_s3 = inlined_call_operand.vmem [shape: f32[1,128], index: 3, kind: input, shape index: {}]   ;;  %s11103_s4 = inlined_call_operand.vmem [shape: bf16[9,128,256], index: 4, kind: input, shape index: {}]   ;;  %s11104_s5 = inlined_call_operand.vmem [shape: bf16[256,128], index: 5, kind: input, shape index: {}]   ;;  %s11105_s6 = inlined_call_operand.vmem [shape: f32[1,128], index: 6, kind: input, shape index: {}]   ;;  %s11106_s7 = inlined_call_operand.vmem [shape: f32[1,128], index: 7, kind: input, shape index: {}]   ;;  %s11107_s8 = inlined_call_operand.vmem [shape: bf16[9,128,256], index: 8, kind: input, shape index: {}]   ;;  %s11108_s9 = inlined_call_operand.vmem [shape: f32[1,256], index: 9, kind: input, shape index: {}]   ;;  %s11109_s10 = inlined_call_operand.vmem [shape: bf16[256,128], index: 10, kind: input, shape index: {}]   ;;  %s11110_s11 = inlined_call_operand.vmem [shape: f32[1,128], index: 11, kind: input, shape index: {}]   ;;  %s11111_s12 = inlined_call_operand.vmem [shape: f32[1,128], index: 12, kind: input, shape index: {}]   ;;  %s11112_s13 = inlined_call_operand.vmem [shape: f32[2,64,128], index: 13, kind: output, shape index: {}]  }
   0x1 LB: > { %s7528_s26 = sadd.s32 4294967295, %s9248_s25   ;;  %p7532_p0 = scmp.ge.s32.totalorder %s9248_s25, 1  ;;  %s9248_s25 = sphi %s9321_s25, %s23_s25  }
   0x2   : > { %p387_p1 = scmp.lt.s32.totalorder %s9248_s25, 3 }
   0x4   : > { %p388_p2 = pnand %p7532_p0, %p387_p1 }
   0x5   : > { %v8722_v0 = vld [vmem:[%s11100_s1] sm:$0xff] (!%p388_p2)   ;;  %v8723_v1 = vld [vmem:[%s11100_s1 + $0x8] ss:$0 sps:$4 sm:$0x11] (!%p388_p2)   ;;  %vm622_vm0 = vcmask (!%p388_p2), 1040384   ;;  %p9335_p3 = scmp.lt.s32.totalorder (!%p388_p2), %s7528_s26, 1 }
   0x6   : > { %391 = sbr.rel (%p388_p2) target bundleno = 1712 (0x6b0), region = 72  ;;  %8399 = vmatprep.subr.bf16.mxu0 (!%p388_p2), %v8722_v0  ;;  %8435 = vmatprep.subr.bf16.mxu1 (!%p388_p2), %v8722_v0  ;;  %v9250_v2 = vmov (!%p388_p2), 0   ;;  %vm1004_vm1 = vsmask.f32 (!%p388_p2), 7938  ;;  %v624_v3 = vsel (!%p388_p2), %vm622_vm0, %v8723_v1, 0  ;;  %vm573_vm3 = vcmask (!%p388_p2), 146432  }
   0x7   : > { %8400 = vmatpush3.bf16.msra.mxu0 (!%p388_p2), %v8722_v0  ;;  %4352 = vst [vmem:[#allocation3 + $0x4] sm:$0x1] (!%p388_p2), %v9250_v2  ;;  %4355 = vst [vmem:[#allocation3 + $0x4c] sm:$0x1] (!%p388_p2), %v9250_v2  ;;  %8437 = vmatpush3.bf16.msra.mxu1 (!%p388_p2), %v8722_v0  ;;  %v8742_v25 = vld [vmem:[%s11103_s4 + $0x4] ss:$8 sps:$4 sm:$0xff] (!%p388_p2)  }
   0x8   : > { %1057 = vst [vmem:[#allocation2] sm:$0xf] (!%p388_p2), %v9250_v2  ;;  %1106 = vst [vmem:[#allocation2 + $0x48] sm:$0xf] (!%p388_p2), %v9250_v2  ;;  %8711 = vmatprep.subr.msk.bf16.mxu0 (!%p388_p2), %vm622_vm0, %v8723_v1  ;;  %8712 = vmatprep.subr.msk.bf16.mxu1 (!%p388_p2), %vm622_vm0, %v8723_v1  ;;  %v8740_v26 = vld [vmem:[%s11103_s4] ss:$8 sps:$4 sm:$0xff] (!%p388_p2)  }
   0x9   : > { %1299 = vst [vmem:[#allocation2 + $0xd0] sm:$0xf] (!%p388_p2), %v9250_v2  ;;  %4351 = vst [vmem:[#allocation3] sm:$0xf] (!%p388_p2), %v9250_v2  ;;  %v8745_v27 = vld [vmem:[%s11103_s4 + $0x14] ss:$8 sps:$4 sm:$0xff] (!%p388_p2)  }
   0xa   : > { %4354 = vst [vmem:[#allocation3 + $0x48] sm:$0xf] (!%p388_p2), %v9250_v2  ;;  %vm9355_vm2 = vmand (!%p388_p2), %vm622_vm0, %vm1004_vm1  ;;  %v8743_v28 = vld [vmem:[%s11103_s4 + $0x10] ss:$8 sps:$4 sm:$0xff] (!%p388_p2)   ;;  %v8748_v29 = vld [vmem:[%s11103_s4 + $0x24] ss:$8 sps:$4 sm:$0xff] (!%p388_p2)  }
   0xb   : > { %8402 = vmatpush3.bf16.msra.mxu0 (!%p388_p2), %v624_v3  ;;  %8438 = vmatpush3.bf16.msra.mxu1 (!%p388_p2), %v624_v3  ;;  %v8746_v30 = vld [vmem:[%s11103_s4 + $0x20] ss:$8 sps:$4 sm:$0xff] (!%p388_p2)   ;;  %v8751_v31 = vld [vmem:[%s11103_s4 + $0x34] ss:$8 sps:$4 sm:$0xff] (!%p388_p2)   ;;  %vm1010_vm4 = vsmask.f32 (!%p388_p2), 256 }
   0xc   : > { %1507 = vmatprep.subr.bf16.mxu1 (!%p388_p2), %v8742_v25  ;;  %v8749_v32 = vld [vmem:[%s11103_s4 + $0x30] ss:$8 sps:$4 sm:$0xff] (!%p388_p2)   ;;  %vm9427_vm5 = vmand (!%p388_p2), %vm622_vm0, %vm1010_vm4  ;;  %v8754_v34 = vld [vmem:[%s11103_s4 + $0x44] ss:$8 sps:$4 sm:$0xff] (!%p388_p2)   ;;  %vm1003_vm10 = vcmask (!%p388_p2), 1043456  }
   0xd   : > { %s11125_s26 = smov (!%p9335_p3, %s7528_s26), 1  ;;  %v8752_v35 = vld [vmem:[%s11103_s4 + $0x40] ss:$8 sps:$4 sm:$0xff]   ;;  %v1107_v36 = vld [vmem:[#allocation2 + $0x4c] sm:$0x1]  ;;  %vm9532_vm11 = vmand %vm1003_vm10, %vm1004_vm1 }
   0xe   : > { %s8275_s15 = sshll.u32 %s11125_s26, 7  ;;  %v4387_v7 = vld [vmem:[#allocation3 + $0x4] sm:$0x1]  ;;  %v4414_v8 = vld [vmem:[#allocation3 + $0x4c] sm:$0x1]  ;;  %v1108_v39 = vsel %vm9427_vm5, 0, %v1107_v36 }
   0xf   : > { %s9363_s18 = scalar_lea.vmem %s11099_s0, %s8275_s15  ;;  %v4388_v9 = vsel %vm9355_vm2, 0, %v4387_v7  ;;  %v4415_v10 = vsel %vm9355_vm2, 0, %v4414_v8  ;;  %v1113_v37 = vld [vmem:[#allocation2 + $0x54] sm:$0x1]  ;;  %v1116_v38 = vld [vmem:[#allocation2 + $0x5c] sm:$0x1] }
  0x10   : > { %v8724_v5 = vld [vmem:[%s9363_s18] sm:$0xff]   ;;  %v8725_v6 = vld [vmem:[%s9363_s18 + $0x8] sm:$0xff]   ;;  %v8726_v11 = vld [vmem:[%s9363_s18 + $0x10] sm:$0xff]   ;;  %4389 = vst [vmem:[#allocation3 + $0x4] sm:$0x1] %v4388_v9  ;;  %v1114_v40 = vsel %vm9427_vm5, 0, %v1113_v37 }
  0x11   : > { %8403 = vmatprep.mubr.msk.bf16.mxu0 %vm573_vm3, %v8724_v5  ;;  %4416 = vst [vmem:[#allocation3 + $0x4c] sm:$0x1] %v4415_v10  ;;  %v8727_v12 = vld [vmem:[%s9363_s18 + $0x18] sm:$0xff]   ;;  %v8728_v13 = vld [vmem:[%s9363_s18 + $0x20] sm:$0xff]   ;;  %v8733_v15 = vld [vmem:[%s9363_s18 + $0x48] sm:$0xff]   ;;  %v1117_v41 = vsel %vm9427_vm5, 0, %v1116_v38 }
  0x12   : > { %8404 = vmatmul.mubr.msk.bf16.vlgmr.msra.gmra.mrb[0].mxu0 %vm573_vm3, %v8725_v6  ;;  %v8732_v14 = vld [vmem:[%s9363_s18 + $0x40] sm:$0xff]   ;;  %v8734_v16 = vld [vmem:[%s9363_s18 + $0x50] sm:$0xff]   ;;  %v8729_v17 = vld [vmem:[%s9363_s18 + $0x28] sm:$0xff]   ;;  %1109 = vst [vmem:[#allocation2 + $0x4c] sm:$0x1] %v1108_v39  ;;  %s8276_s15 = sshll.u32 %s11125_s26, 6 }
  0x13   : > { %8407 = vmatprep.mubr.msk.bf16.mxu0 %vm573_vm3, %v8726_v11  ;;  %8419 = vmatprep.mubr.msk.bf16.mxu1 %vm573_vm3, %v8732_v14  ;;  %v8730_v18 = vld [vmem:[%s9363_s18 + $0x30] sm:$0xff]   ;;  %v8735_v19 = vld [vmem:[%s9363_s18 + $0x58] sm:$0xff]   ;;  %v8736_v20 = vld [vmem:[%s9363_s18 + $0x60] sm:$0xff]   ;;  %1115 = vst [vmem:[#allocation2 + $0x54] sm:$0x1] %v1114_v40  ;;  %s11086_s20 = scalar_lea.vmem %s11112_s13, %s8276_s15 }
  0x14   : > { %8420 = vmatmul.mubr.msk.bf16.vlgmr.msra.gmra.mrb[0].mxu1 %vm573_vm3, %v8733_v15  ;;  %v8731_v21 = vld [vmem:[%s9363_s18 + $0x38] sm:$0xff]   ;;  %v8737_v22 = vld [vmem:[%s9363_s18 + $0x68] sm:$0xff]   ;;  %v8738_v23 = vld [vmem:[%s9363_s18 + $0x70] sm:$0xff]   ;;  %1118 = vst [vmem:[#allocation2 + $0x5c] sm:$0x1] %v1117_v41 }
  0x15   : > { %8423 = vmatprep.mubr.msk.bf16.mxu1 %vm573_vm3, %v8734_v16  ;;  %v8739_v24 = vld [vmem:[%s9363_s18 + $0x78] sm:$0xff]   ;;  %1508 = vmatpush1.bf16.msra.mxu1 %v8740_v26  ;;  %v1119_v42 = vld [vmem:[#allocation2 + $0x64] sm:$0x1]  ;;  %v1122_v44 = vld [vmem:[#allocation2 + $0x6c] sm:$0x1] }
  0x16   : > { %1509 = vmatprep.subr.bf16.mxu1 %v8745_v27  ;;  %v1120_v43 = vsel %vm9427_vm5, 0, %v1119_v42  ;;  %v1125_v45 = vld [vmem:[#allocation2 + $0x74] sm:$0x1]  ;;  %v1123_v46 = vsel %vm9427_vm5, 0, %v1122_v44  ;;  %v1128_v48 = vld [vmem:[#allocation2 + $0x7c] sm:$0x1] }
  0x17   : > { %1121 = vst [vmem:[#allocation2 + $0x64] sm:$0x1] %v1120_v43  ;;  %v1126_v47 = vsel %vm9427_vm5, 0, %v1125_v45  ;;  %v1131_v49 = vld [vmem:[#allocation2 + $0x84] sm:$0x1]  ;;  %v1129_v50 = vsel %vm9427_vm5, 0, %v1128_v48 }
  0x18   : > { %1124 = vst [vmem:[#allocation2 + $0x6c] sm:$0x1] %v1123_v46  ;;  %1127 = vst [vmem:[#allocation2 + $0x74] sm:$0x1] %v1126_v47  ;;  %v1132_v51 = vsel %vm9427_vm5, 0, %v1131_v49 }
  0x19   : > { %1510 = vmatpush1.bf16.msra.mxu1 %v8743_v28  ;;  %v1134_v52 = vld [vmem:[#allocation2 + $0x8c] sm:$0x1]  ;;  %v1300_v53 = vld [vmem:[#allocation2 + $0xd4] sm:$0x1]  ;;  %1130 = vst [vmem:[#allocation2 + $0x7c] sm:$0x1] %v1129_v50 }
  0x1a   : > { %8408 = vmatmul.mubr.msk.bf16.gmra.mrb[4].mxu0 %vm573_vm3, %v8727_v12  ;;  %1511 = vmatprep.subr.bf16.mxu1 %v8748_v29  ;;  %1133 = vst [vmem:[#allocation2 + $0x84] sm:$0x1] %v1132_v51  ;;  %v1135_v54 = vsel %vm9427_vm5, 0, %v1134_v52  ;;  %v1301_v55 = vsel %vm9427_vm5, 0, %v1300_v53  ;;  %v1327_v56 = vld [vmem:[#allocation2 + $0xd0] sm:$0x1] }
  0x1b   : > { %8411 = vmatprep.mubr.msk.bf16.mxu0 %vm573_vm3, %v8728_v13  ;;  %v1349_v57 = vld [vmem:[#allocation2 + $0x11c] sm:$0x1]  ;;  %1136 = vst [vmem:[#allocation2 + $0x8c] sm:$0x1] %v1135_v54  ;;  %1302 = vst [vmem:[#allocation2 + $0xd4] sm:$0x1] %v1301_v55 }
  0x1c   : > { %8424 = vmatmul.mubr.msk.bf16.gmra.mrb[4].mxu1 %vm573_vm3, %v8735_v19  ;;  %v1328_v58 = vsel %vm9427_vm5, 0, %v1327_v56  ;;  %v1350_v59 = vsel %vm9427_vm5, 0, %v1349_v57  ;;  %v1352_v60 = vld [vmem:[#allocation2 + $0xdc] sm:$0x1]  ;;  %v1355_v61 = vld [vmem:[#allocation2 + $0xe4] sm:$0x1] }
  0x1d   : > { %8427 = vmatprep.mubr.msk.bf16.mxu1 %vm573_vm3, %v8736_v20  ;;  %1512 = vmatpush1.bf16.msra.mxu1 %v8746_v30  ;;  %1329 = vst [vmem:[#allocation2 + $0xd0] sm:$0x1] %v1328_v58  ;;  %1351 = vst [vmem:[#allocation2 + $0x11c] sm:$0x1] %v1350_v59  ;;  %v1353_v62 = vsel %vm9427_vm5, 0, %v1352_v60  ;;  %v1356_v63 = vsel %vm9427_vm5, 0, %v1355_v61 }
  0x1e   : > { %1513 = vmatprep.subr.bf16.mxu1 %v8751_v31  ;;  %v1358_v0 = vld [vmem:[#allocation2 + $0xec] sm:$0x1]  ;;  %v1361_v1 = vld [vmem:[#allocation2 + $0xf4] sm:$0x1]  ;;  %1354 = vst [vmem:[#allocation2 + $0xdc] sm:$0x1] %v1353_v62 }
  0x1f   : > { %1357 = vst [vmem:[#allocation2 + $0xe4] sm:$0x1] %v1356_v63  ;;  %v1359_v3 = vsel %vm9427_vm5, 0, %v1358_v0  ;;  %v1362_v5 = vsel %vm9427_vm5, 0, %v1361_v1  ;;  %v1364_v6 = vld [vmem:[#allocation2 + $0xfc] sm:$0x1] }
  0x20   : > { %v1367_v7 = vld [vmem:[#allocation2 + $0x104] sm:$0x1]  ;;  %v1110_v8 = vld [vmem:[#allocation2 + $0x4c] sm:$0x1]  ;;  %1360 = vst [vmem:[#allocation2 + $0xec] sm:$0x1] %v1359_v3 }
  0x21   : > { %1514 = vmatpush1.bf16.msra.mxu1 %v8749_v32  ;;  %1363 = vst [vmem:[#allocation2 + $0xf4] sm:$0x1] %v1362_v5  ;;  %v1365_v9 = vsel %vm9427_vm5, 0, %v1364_v6  ;;  %v1368_v10 = vsel %vm9427_vm5, 0, %v1367_v7  ;;  %v1370_v11 = vld [vmem:[#allocation2 + $0x10c] sm:$0x1] }
  0x22   : > { %8412 = vmatmul.mubr.msk.bf16.gmra.mrb[8].mxu0 %vm573_vm3, %v8729_v17  ;;  %1515 = vmatprep.subr.bf16.mxu1 %v8754_v34  ;;  %v1111_v12 = vsel %vm9427_vm5, 0, %v1110_v8  ;;  %1366 = vst [vmem:[#allocation2 + $0xfc] sm:$0x1] %v1365_v9  ;;  %1369 = vst [vmem:[#allocation2 + $0x104] sm:$0x1] %v1368_v10  ;;  %v1371_v13 = vsel %vm9427_vm5, 0, %v1370_v11 }
  0x23   : > { %8415 = vmatprep.mubr.msk.bf16.mxu0 %vm573_vm3, %v8730_v18  ;;  %v1373_v14 = vld [vmem:[#allocation2 + $0x114] sm:$0x1]  ;;  %1112 = vst [vmem:[#allocation2 + $0x4c] sm:$0x1] %v1111_v12  ;;  %1372 = vst [vmem:[#allocation2 + $0x10c] sm:$0x1] %v1371_v13 }
  0x24   : > { %8428 = vmatmul.mubr.msk.bf16.gmra.mrb[8].mxu1 %vm573_vm3, %v8737_v22  ;;  %v1374_v15 = vsel %vm9427_vm5, 0, %v1373_v14  ;;  %v8755_v16 = vld [vmem:[%s11103_s4 + $0x50] ss:$8 sps:$4 sm:$0xff]   ;;  %v8757_v17 = vld [vmem:[%s11103_s4 + $0x54] ss:$8 sps:$4 sm:$0xff]  }
  0x25   : > { %8431 = vmatprep.mubr.msk.bf16.mxu1 %vm573_vm3, %v8738_v23  ;;  %1516 = vmatpush1.bf16.msra.mxu1 %v8752_v35  ;;  %1375 = vst [vmem:[#allocation2 + $0x114] sm:$0x1] %v1374_v15  ;;  %v1376_v18 = vld [vmem:[#allocation2 + $0x11c] sm:$0x1]  ;;  %v8760_v19 = vld [vmem:[%s11103_s4 + $0x64] ss:$8 sps:$4 sm:$0xff]  }
  0x26   : > { %v1377_v20 = vsel %vm9427_vm5, 0, %v1376_v18  ;;  %1517 = vmatprep.subr.bf16.mxu1 %v8757_v17  ;;  %v1061_v22 = vld [vmem:[#allocation2] sm:$0x1]  ;;  %v8763_v23 = vld [vmem:[%s11103_s4 + $0x74] ss:$8 sps:$4 sm:$0xff]  }
  0x27   : > { %1378 = vst [vmem:[#allocation2 + $0x11c] sm:$0x1] %v1377_v20  ;;  %v1058_v25 = vld [vmem:[#allocation2 + $0x4] sm:$0x1]  ;;  %v8761_v26 = vld [vmem:[%s11103_s4 + $0x70] ss:$8 sps:$4 sm:$0xff]  }
  0x28   : > { %v1059_v27 = vsel %vm9427_vm5, 0, %v1058_v25  ;;  %v8766_v28 = vld [vmem:[%s11103_s4 + $0x84] ss:$8 sps:$4 sm:$0xff]   ;;  %v9509_v29 = vld [vmem:[%s11101_s2] ss:$0 sm:$0xff] }
  0x29   : > { %1518 = vmatpush1.bf16.msra.mxu1 %v8755_v16  ;;  %1060 = vst [vmem:[#allocation2 + $0x4] sm:$0x1] %v1059_v27  ;;  %v9514_v31 = vld [vmem:[%s11102_s3] ss:$0 sm:$0xff]  ;;  %v1021_v54 = vld [vmem:[#allocation2 + $0x18] sm:$0xf] }
  0x2a   : > { %8416 = vmatmul.mubr.msk.bf16.gmra.mrb[12].mxu0 %vm573_vm3, %v8731_v21  ;;  %v8758_v21 = vld [vmem:[%s11103_s4 + $0x60] ss:$8 sps:$4 sm:$0xff]   ;;  %1519 = vmatprep.subr.bf16.mxu1 %v8760_v19  ;;  %v1024_v55 = vld [vmem:[#allocation2 + $0x1c] sm:$0x1]  ;;  %v1012_v0 = vld [vmem:[#allocation2 + $0xc] sm:$0x1] }
  0x2b   : > { %v1006_v63 = vld [vmem:[#allocation2 + $0x8] sm:$0xf]  ;;  %v1027_v17 = vld [vmem:[#allocation2 + $0x20] sm:$0xf]  ;;  %v9043_v4 = vld [vmem:[%s11107_s8 + $0xe4] ss:$8 sps:$4 sm:$0xff]  }
  0x2c   : > { %8432 = vmatmul.mubr.msk.bf16.gmra.mrb[12].mxu1 %vm573_vm3, %v8739_v24  ;;  %v1062_v24 = vsel %vm9427_vm5, 0, %v1061_v22  ;;  %v1030_v22 = vld [vmem:[#allocation2 + $0x24] sm:$0x1] }
  0x2d   : > { %1539 = vmatprep.mubr.bf16.mxu1 %v9250_v2  ;;  %1063 = vst [vmem:[#allocation2] sm:$0x1] %v1062_v24  ;;  %1520 = vmatpush1.bf16.msra.mxu1 %v8758_v21 }
  0x2e   : > { %1521 = vmatprep.subr.bf16.mxu1 %v8763_v23 }
  0x31   : > { %1522 = vmatpush1.bf16.msra.mxu1 %v8761_v26 }
  0x32   : > { %1725 = vmatprep.subr.bf16.mxu1 %v8766_v28  ;;  %v1015_v28 = vld [vmem:[#allocation2 + $0x10] sm:$0xf] }
  0xe5   : > { %v8405_v30 = vpop.f32.mrb[0].mxu0 }
  0xe6   : > { %v669_v32 = vadd.f32 %v8405_v30, %v9509_v29  ;;  %v660_v34 = vpop.f32.mrb[1].mxu0  ;;  %v1018_v30 = vld [vmem:[#allocation2 + $0x14] sm:$0x1] }
  0xe7   : > { %v661_v35 = vadd.f32 %v9509_v29, %v660_v34  ;;  %v8406_v36 = vpop.f32.mrb[2].mxu0  ;;  %v9525_v61 = vpop.f32.mrb[0].mxu1 }
  0xe8   : > { %vm790_vm6 = vcmp.gt.f32.partialorder %v669_v32, 0.0  ;;  %v828_v37 = vmul.f32 %v9514_v31, %v669_v32  ;;  %v672_v38 = vadd.f32 %v8406_v36, %v9509_v29  ;;  %v663_v39 = vpop.f32.mrb[3].mxu0  ;;  %v9528_v7 = vpop.f32.mrb[1].mxu1 }
  0xe9   : > { %vm788_vm7 = vcmp.gt.f32.partialorder %v661_v35, 0.0  ;;  %v826_v40 = vmul.f32 %v9514_v31, %v661_v35  ;;  %v664_v41 = vadd.f32 %v9509_v29, %v663_v39  ;;  %v9536_v13 = vpop.f32.mrb[2].mxu1 }
  0xea   : > { %v860_v42 = vsel %vm790_vm6, %v669_v32, %v828_v37  ;;  %vm791_vm8 = vcmp.gt.f32.partialorder %v672_v38, 0.0  ;;  %v829_v43 = vmul.f32 %v9514_v31, %v672_v38  ;;  %v9539_v19 = vpop.f32.mrb[3].mxu1 }
  0xeb   : > { %v8279_v44 = vpack.c.bf16 %v860_v42, %v860_v42  ;;  %v858_v45 = vsel %vm788_vm7, %v661_v35, %v826_v40  ;;  %vm789_vm9 = vcmp.gt.f32.partialorder %v664_v41, 0.0  ;;  %v827_v46 = vmul.f32 %v9514_v31, %v664_v41 }
  0xec   : > { %v8277_v47 = vpack.c.bf16 %v858_v45, %v858_v45  ;;  %v861_v48 = vsel %vm791_vm8, %v672_v38, %v829_v43 }
  0xed   : > { %v939_v49 = vshrl.u32 %v8279_v44, 16  ;;  %v942_v50 = vshll.u32 %v8279_v44, 16  ;;  %v8280_v51 = vpack.c.bf16 %v861_v48, %v861_v48  ;;  %v859_v52 = vsel %vm789_vm9, %v664_v41, %v827_v46  ;;  %v8409_v53 = vpop.f32.mrb[4].mxu0 }
  0xee   : > { %v923_v56 = vshrl.u32 %v8277_v47, 16  ;;  %v926_v57 = vshll.u32 %v8277_v47, 16  ;;  %v8278_v58 = vpack.c.bf16 %v859_v52, %v859_v52  ;;  %v685_v59 = vadd.f32 %v8409_v53, %v9509_v29  ;;  %v676_v60 = vpop.f32.mrb[5].mxu0 }
  0xef   : > { %v941_v62 = vrot.slane %v939_v49, 7  ;;  %v947_v1 = vshrl.u32 %v8280_v51, 16  ;;  %v950_v3 = vshll.u32 %v8280_v51, 16  ;;  %v677_v5 = vadd.f32 %v9509_v29, %v676_v60  ;;  %v8410_v6 = vpop.f32.mrb[6].mxu0  ;;  %v9560_v47 = vpop.f32.mrb[4].mxu1 }
  0xf0   : > { %v925_v9 = vrot.slane %v923_v56, 7  ;;  %v931_v10 = vshrl.u32 %v8278_v58, 16  ;;  %v934_v11 = vshll.u32 %v8278_v58, 16  ;;  %vm794_vm12 = vcmp.gt.f32.partialorder %v685_v59, 0.0  ;;  %v679_v12 = vpop.f32.mrb[7].mxu0  ;;  %v9570_v53 = vpop.f32.mrb[5].mxu1 }
  0xf1   : > { %v944_v14 = vor.u32 %v942_v50, %v941_v62  ;;  %v945_v15 = vrot.slane %v941_v62, 4  ;;  %v949_v16 = vrot.slane %v947_v1, 7  ;;  %v832_v18 = vmul.f32 %v9514_v31, %v685_v59  ;;  %v9574_v58 = vpop.f32.mrb[6].mxu1 }
  0xf2   : > { %v928_v20 = vor.u32 %v926_v57, %v925_v9  ;;  %v929_v21 = vrot.slane %v925_v9, 4  ;;  %v933_v23 = vrot.slane %v931_v10, 7  ;;  %vm792_vm13 = vcmp.gt.f32.partialorder %v677_v5, 0.0  ;;  %v9578_v62 = vpop.f32.mrb[7].mxu1  ;;  %v1048_v9 = vld [vmem:[#allocation2 + $0x3c] sm:$0x1] }
  0xf3   : > { %v1022_v24 = vsel %vm9532_vm11, %v944_v14, %v1021_v54  ;;  %v1025_v25 = vsel %vm9427_vm5, %v945_v15, %v1024_v55  ;;  %v952_v26 = vor.u32 %v950_v3, %v949_v16  ;;  %v953_v27 = vrot.slane %v949_v16, 4 }
  0xf4   : > { %1023 = vst [vmem:[#allocation2 + $0x18] sm:$0xf] %v1022_v24  ;;  %1026 = vst [vmem:[#allocation2 + $0x1c] sm:$0x1] %v1025_v25  ;;  %v1007_v32 = vsel %vm9532_vm11, %v928_v20, %v1006_v63  ;;  %v1013_v34 = vsel %vm9427_vm5, %v929_v21, %v1012_v0  ;;  %v936_v35 = vor.u32 %v934_v11, %v933_v23  ;;  %v937_v36 = vrot.slane %v933_v23, 4 }
  0xf5   : > { %1008 = vst [vmem:[#allocation2 + $0x8] sm:$0xf] %v1007_v32  ;;  %1014 = vst [vmem:[#allocation2 + $0xc] sm:$0x1] %v1013_v34  ;;  %v1028_v37 = vsel %vm9532_vm11, %v952_v26, %v1027_v17  ;;  %v1031_v38 = vsel %vm9427_vm5, %v953_v27, %v1030_v22  ;;  %v864_v39 = vsel %vm794_vm12, %v685_v59, %v832_v18  ;;  %v8413_v41 = vpop.f32.mrb[8].mxu0 }
  0xf6   : > { %v830_v40 = vmul.f32 %v9514_v31, %v677_v5  ;;  %1029 = vst [vmem:[#allocation2 + $0x20] sm:$0xf] %v1028_v37  ;;  %1032 = vst [vmem:[#allocation2 + $0x24] sm:$0x1] %v1031_v38  ;;  %v1016_v42 = vsel %vm9532_vm11, %v936_v35, %v1015_v28  ;;  %v1019_v43 = vsel %vm9427_vm5, %v937_v36, %v1018_v30  ;;  %v692_v46 = vpop.f32.mrb[9].mxu0 }
  0xf7   : > { %v8283_v44 = vpack.c.bf16 %v864_v39, %v864_v39  ;;  %v688_v45 = vadd.f32 %v8410_v6, %v9509_v29  ;;  %1017 = vst [vmem:[#allocation2 + $0x10] sm:$0xf] %v1016_v42  ;;  %1020 = vst [vmem:[#allocation2 + $0x14] sm:$0x1] %v1019_v43  ;;  %v680_v49 = vadd.f32 %v9509_v29, %v679_v12  ;;  %v9568_v52 = vpop.f32.mrb[10].mxu0  ;;  %v9601_v42 = vpop.f32.mrb[8].mxu1 }
  0xf8   : > { %v862_v48 = vsel %vm792_vm13, %v677_v5, %v830_v40  ;;  %v701_v50 = vadd.f32 %v8413_v41, %v9509_v29  ;;  %v9566_v51 = vadd.f32 %v9509_v29, %v692_v46  ;;  %v9572_v57 = vpop.f32.mrb[11].mxu0  ;;  %v1045_v0 = vld [vmem:[#allocation2 + $0x38] sm:$0xf]  ;;  %v1033_v22 = vld [vmem:[#allocation2 + $0x28] sm:$0xf] }
  0xf9   : > { %v971_v54 = vshrl.u32 %v8283_v44, 16  ;;  %v974_v55 = vshll.u32 %v8283_v44, 16  ;;  %v8281_v56 = vpack.c.bf16 %v862_v48, %v862_v48  ;;  %vm795_vm14 = vcmp.gt.f32.partialorder %v688_v45, 0.0  ;;  %v1036_v35 = vld [vmem:[#allocation2 + $0x2c] sm:$0x1] }
  0xfa   : > { %v833_v59 = vmul.f32 %v9514_v31, %v688_v45  ;;  %vm793_vm15 = vcmp.gt.f32.partialorder %v680_v49, 0.0  ;;  %v831_v60 = vmul.f32 %v9514_v31, %v680_v49  ;;  %vm798_vm0 = vcmp.gt.f32.partialorder %v701_v50, 0.0 }
  0xfb   : > { %v973_v63 = vrot.slane %v971_v54, 7  ;;  %v955_v1 = vshrl.u32 %v8281_v56, 16  ;;  %v958_v3 = vshll.u32 %v8281_v56, 16  ;;  %v836_v5 = vmul.f32 %v9514_v31, %v701_v50  ;;  %v1070_v6 = vld [vmem:[#allocation2 + $0x18] sm:$0x1] }
  0xfc   : > { %v865_v10 = vsel %vm795_vm14, %v688_v45, %v833_v59  ;;  %v863_v11 = vsel %vm793_vm15, %v680_v49, %v831_v60  ;;  %vm796_vm1 = vcmp.gt.f32.partialorder %v9566_v51, 0.0  ;;  %v834_v12 = vmul.f32 %v9514_v31, %v9566_v51  ;;  %v1064_v15 = vld [vmem:[#allocation2 + $0x8] sm:$0x1]  ;;  %v9605_v49 = vpop.f32.mrb[9].mxu1 }
  0xfd   : > { %v1071_v14 = vsel %vm9427_vm5, 0, %v1070_v6  ;;  %v976_v16 = vor.u32 %v974_v55, %v973_v63  ;;  %v977_v17 = vrot.slane %v973_v63, 4  ;;  %v957_v18 = vrot.slane %v955_v1, 7  ;;  %v1073_v21 = vld [vmem:[#allocation2 + $0x20] sm:$0x1]  ;;  %v8417_v26 = vpop.f32.mrb[12].mxu0 }
  0xfe   : > { %1072 = vst [vmem:[#allocation2 + $0x18] sm:$0x1] %v1071_v14  ;;  %v1065_v20 = vsel %vm9427_vm5, 0, %v1064_v15  ;;  %v8284_v23 = vpack.c.bf16 %v865_v10, %v865_v10  ;;  %v8282_v24 = vpack.c.bf16 %v863_v11, %v863_v11  ;;  %v868_v25 = vsel %vm798_vm0, %v701_v50, %v836_v5  ;;  %v1067_v28 = vld [vmem:[#allocation2 + $0x10] sm:$0x1]  ;;  %v9595_v36 = vpop.f32.mrb[13].mxu0 }
  0xff   : > { %1066 = vst [vmem:[#allocation2 + $0x8] sm:$0x1] %v1065_v20  ;;  %v1074_v27 = vsel %vm9427_vm5, 0, %v1073_v21  ;;  %v1046_v30 = vsel %vm9532_vm11, %v976_v16, %v1045_v0  ;;  %v1049_v32 = vsel %vm9427_vm5, %v977_v17, %v1048_v9  ;;  %v960_v34 = vor.u32 %v958_v3, %v957_v18  ;;  %v9599_v41 = vpop.f32.mrb[14].mxu0  ;;  %v1051_v55 = vld [vmem:[#allocation2 + $0x40] sm:$0xf] }
 0x100   : > { %1075 = vst [vmem:[#allocation2 + $0x20] sm:$0x1] %v1074_v27  ;;  %v1068_v37 = vsel %vm9427_vm5, 0, %v1067_v28  ;;  %1047 = vst [vmem:[#allocation2 + $0x38] sm:$0xf] %v1046_v30  ;;  %v961_v38 = vrot.slane %v957_v18, 4  ;;  %v1090_v46 = vpack.c.bf16 %v868_v25, %v868_v25  ;;  %v866_v56 = vsel %vm796_vm1, %v9566_v51, %v834_v12 }
 0x101   : > { %1050 = vst [vmem:[#allocation2 + $0x3c] sm:$0x1] %v1049_v32  ;;  %v979_v39 = vshrl.u32 %v8284_v23, 16  ;;  %v982_v40 = vshll.u32 %v8284_v23, 16  ;;  %1069 = vst [vmem:[#allocation2 + $0x10] sm:$0x1] %v1068_v37  ;;  %v1034_v43 = vsel %vm9532_vm11, %v960_v34, %v1033_v22  ;;  %v704_v59 = vadd.f32 %v9568_v52, %v9509_v29 }
 0x102   : > { %v963_v44 = vshrl.u32 %v8282_v24, 16  ;;  %v966_v45 = vshll.u32 %v8282_v24, 16  ;;  %v711_v48 = vpop.f32.mrb[15].mxu0  ;;  %1035 = vst [vmem:[#allocation2 + $0x28] sm:$0xf] %v1034_v43  ;;  %v1037_v50 = vsel %vm9427_vm5, %v961_v38, %v1036_v35  ;;  %v9614_v60 = vpop.f32.mrb[10].mxu1  ;;  %v1088_v3 = vpack.c.bf16 %v866_v56, %v866_v56 }
 0x103   : > { %v981_v54 = vrot.slane %v979_v39, 7  ;;  %1038 = vst [vmem:[#allocation2 + $0x2c] sm:$0x1] %v1037_v50  ;;  %v1054_v63 = vld [vmem:[#allocation2 + $0x44] sm:$0x1]  ;;  %v696_v5 = vadd.f32 %v9509_v29, %v9572_v57  ;;  %v717_v6 = vadd.f32 %v8417_v26, %v9509_v29  ;;  %v9619_v9 = vpop.f32.mrb[11].mxu1  ;;  %v837_v12 = vmul.f32 %v9514_v31, %v704_v59 }
 0x104   : > { %v965_v0 = vrot.slane %v963_v44, 7  ;;  %v1039_v1 = vld [vmem:[#allocation2 + $0x30] sm:$0xf]  ;;  %1099 = vst [vmem:[#allocation2 + $0x60] sm:$0xf] %v1090_v46  ;;  %vm799_vm3 = vcmp.gt.f32.partialorder %v704_v59, 0.0  ;;  %v709_v32 = vadd.f32 %v9509_v29, %v9595_v36  ;;  %v720_v38 = vadd.f32 %v9599_v41, %v9509_v29 }
 0x105   : > { %v984_v10 = vor.u32 %v982_v40, %v981_v54  ;;  %v985_v51 = vrot.slane %v981_v54, 4  ;;  %v1042_v11 = vld [vmem:[#allocation2 + $0x34] sm:$0x1]  ;;  %v8764_v52 = vld [vmem:[%s11103_s4 + $0x80] ss:$8 sps:$4 sm:$0xff]   ;;  %vm797_vm4 = vcmp.gt.f32.partialorder %v696_v5, 0.0  ;;  %v835_v16 = vmul.f32 %v9514_v31, %v696_v5 }
 0x106   : > { %v968_v14 = vor.u32 %v966_v45, %v965_v0  ;;  %v969_v15 = vrot.slane %v965_v0, 4  ;;  %v8770_v57 = vld [vmem:[%s11103_s4 + $0x94] ss:$8 sps:$4 sm:$0xff]   ;;  %1097 = vst [vmem:[#allocation2 + $0x50] sm:$0xf] %v1088_v3  ;;  %v869_v21 = vsel %vm799_vm3, %v704_v59, %v837_v12  ;;  %vm802_vm6 = vcmp.gt.f32.partialorder %v717_v6, 0.0 }
 0x107   : > { %v1052_v17 = vsel %vm9532_vm11, %v984_v10, %v1051_v55  ;;  %v1055_v18 = vsel %vm9427_vm5, %v985_v51, %v1054_v63  ;;  %v8767_v20 = vld [vmem:[#allocation2] ss:$8 sps:$4 sm:$0xff]   ;;  %v1082_v22 = vld [vmem:[#allocation2 + $0x38] sm:$0x1]  ;;  %v1091_v25 = vpack.c.bf16 %v869_v21, %v869_v21  ;;  %v867_v26 = vsel %vm797_vm4, %v696_v5, %v835_v16  ;;  %v9642_v34 = vpop.f32.mrb[12].mxu1 }
 0x108   : > { %1053 = vst [vmem:[#allocation2 + $0x40] sm:$0xf] %v1052_v17  ;;  %1056 = vst [vmem:[#allocation2 + $0x44] sm:$0x1] %v1055_v18  ;;  %v1040_v23 = vsel %vm9532_vm11, %v968_v14, %v1039_v1  ;;  %v1043_v24 = vsel %vm9427_vm5, %v969_v15, %v1042_v11  ;;  %v1083_v27 = vsel %vm9427_vm5, 0, %v1082_v22  ;;  %1540 = vmatmul.mubr.bf16.vlgmr.msra.gmra.mrb[16].mxu1 %v8767_v20  ;;  %v9653_v40 = vpop.f32.mrb[13].mxu1 }
 0x109   : > { %1041 = vst [vmem:[#allocation2 + $0x30] sm:$0xf] %v1040_v23  ;;  %1044 = vst [vmem:[#allocation2 + $0x34] sm:$0x1] %v1043_v24  ;;  %v1089_v28 = vpack.c.bf16 %v867_v26, %v867_v26  ;;  %v840_v30 = vmul.f32 %v9514_v31, %v717_v6  ;;  %v1076_v35 = vld [vmem:[#allocation2 + $0x28] sm:$0x1]  ;;  %1726 = vmatpush1.bf16.msra.mxu1 %v8764_v52  ;;  %1549 = vmatprep.mubr.bf16.mxu1 %v9250_v2 }
 0x10a   : > { %1084 = vst [vmem:[#allocation2 + $0x38] sm:$0x1] %v1083_v27  ;;  %v8768_v37 = vld [vmem:[%s11103_s4 + $0x90] ss:$8 sps:$4 sm:$0xff]   ;;  %1100 = vst [vmem:[#allocation2 + $0x68] sm:$0xf] %v1091_v25  ;;  %v712_v39 = vadd.f32 %v9509_v29, %v711_v48  ;;  %v733_v36 = vadd.f32 %v9525_v61, %v9509_v29  ;;  %1727 = vmatprep.subr.bf16.mxu1 %v8770_v57  ;;  %v838_v41 = vmul.f32 %v9514_v31, %v709_v32 }
 0x10b   : > { %v1077_v43 = vsel %vm9427_vm5, 0, %v1076_v35  ;;  %v8773_v44 = vld [vmem:[%s11103_s4 + $0xa4] ss:$8 sps:$4 sm:$0xff]   ;;  %1098 = vst [vmem:[#allocation2 + $0x58] sm:$0xf] %v1089_v28  ;;  %v872_v45 = vsel %vm802_vm6, %v717_v6, %v840_v30  ;;  %vm800_vm7 = vcmp.gt.f32.partialorder %v709_v32, 0.0  ;;  %v841_v61 = vmul.f32 %v9514_v31, %v720_v38 }
 0x10c   : > { %1078 = vst [vmem:[#allocation2 + $0x28] sm:$0x1] %v1077_v43  ;;  %v1094_v46 = vpack.c.bf16 %v872_v45, %v872_v45  ;;  %vm803_vm8 = vcmp.gt.f32.partialorder %v720_v38, 0.0  ;;  %vm801_vm9 = vcmp.gt.f32.partialorder %v712_v39, 0.0  ;;  %v870_v48 = vsel %vm800_vm7, %v709_v32, %v838_v41  ;;  %v9665_v55 = vpop.f32.mrb[14].mxu1 }
 0x10d   : > { %v839_v50 = vmul.f32 %v9514_v31, %v712_v39  ;;  %vm806_vm10 = vcmp.gt.f32.partialorder %v733_v36, 0.0  ;;  %v844_v54 = vmul.f32 %v9514_v31, %v733_v36  ;;  %1728 = vmatpush1.bf16.msra.mxu1 %v8768_v37  ;;  %v8771_v56 = vld [vmem:[%s11103_s4 + $0xa0] ss:$8 sps:$4 sm:$0xff]   ;;  %v1092_v59 = vpack.c.bf16 %v870_v48, %v870_v48  ;;  %v9674_v3 = vpop.f32.mrb[15].mxu1  ;;  %v8774_v6 = vld [vmem:[#allocation2 + $0x10] ss:$8 sps:$4 sm:$0xff]  }
 0x10e   : > { %1103 = vst [vmem:[#allocation2 + $0x80] sm:$0xf] %v1094_v46  ;;  %v873_v63 = vsel %vm803_vm8, %v720_v38, %v841_v61  ;;  %v725_v0 = vadd.f32 %v9509_v29, %v9528_v7  ;;  %v736_v1 = vadd.f32 %v9536_v13, %v9509_v29  ;;  %1729 = vmatprep.subr.bf16.mxu1 %v8773_v44  ;;  %v8777_v10 = vld [vmem:[%s11103_s4 + $0xb4] ss:$8 sps:$4 sm:$0xff]   ;;  %v8780_v23 = vld [vmem:[%s11103_s4 + $0xc4] ss:$8 sps:$4 sm:$0xff]  }
 0x10f   : > { %v1085_v5 = vld [vmem:[#allocation2 + $0x40] sm:$0x1]  ;;  %v1095_v51 = vpack.c.bf16 %v873_v63, %v873_v63  ;;  %v871_v11 = vsel %vm801_vm9, %v712_v39, %v839_v50  ;;  %v876_v52 = vsel %vm806_vm10, %v733_v36, %v844_v54  ;;  %v728_v7 = vadd.f32 %v9509_v29, %v9539_v19  ;;  %1101 = vst [vmem:[#allocation2 + $0x70] sm:$0xf] %v1092_v59  ;;  %v8775_v19 = vld [vmem:[%s11103_s4 + $0xb0] ss:$8 sps:$4 sm:$0xff]  }
 0x110   : > { %v1086_v13 = vsel %vm9427_vm5, 0, %v1085_v5  ;;  %v1079_v12 = vld [vmem:[#allocation2 + $0x30] sm:$0x1]  ;;  %v1093_v14 = vpack.c.bf16 %v871_v11, %v871_v11  ;;  %v8287_v15 = vpack.c.bf16 %v876_v52, %v876_v52  ;;  %vm804_vm12 = vcmp.gt.f32.partialorder %v725_v0, 0.0  ;;  %1550 = vmatmul.mubr.bf16.gmra.mrb[20].mxu1 %v8774_v6  ;;  %v8778_v27 = vld [vmem:[%s11103_s4 + $0xc0] ss:$8 sps:$4 sm:$0xff]  }
 0x111   : > { %1087 = vst [vmem:[#allocation2 + $0x40] sm:$0x1] %v1086_v13  ;;  %v1080_v57 = vsel %vm9427_vm5, 0, %v1079_v12  ;;  %1104 = vst [vmem:[#allocation2 + $0x88] sm:$0xf] %v1095_v51  ;;  %v842_v16 = vmul.f32 %v9514_v31, %v725_v0  ;;  %vm807_vm13 = vcmp.gt.f32.partialorder %v736_v1, 0.0  ;;  %v845_v17 = vmul.f32 %v9514_v31, %v736_v1  ;;  %1730 = vmatpush1.bf16.msra.mxu1 %v8771_v56 }
 0x112   : > { %1081 = vst [vmem:[#allocation2 + $0x30] sm:$0x1] %v1080_v57  ;;  %1559 = vmatprep.mubr.bf16.mxu1 %v9250_v2  ;;  %1102 = vst [vmem:[#allocation2 + $0x78] sm:$0xf] %v1093_v14  ;;  %v1186_v18 = vshrl.u32 %v8287_v15, 16  ;;  %v1189_v20 = vshll.u32 %v8287_v15, 16  ;;  %v843_v21 = vmul.f32 %v9514_v31, %v728_v7  ;;  %v749_v22 = vadd.f32 %v9560_v47, %v9509_v29 }
 0x113   : > { %1731 = vmatprep.subr.bf16.mxu1 %v8777_v10  ;;  %v874_v24 = vsel %vm804_vm12, %v725_v0, %v842_v16  ;;  %v877_v25 = vsel %vm807_vm13, %v736_v1, %v845_v17  ;;  %vm805_vm14 = vcmp.gt.f32.partialorder %v728_v7, 0.0  ;;  %v9702_v26 = vadd.f32 %v9509_v29, %v9570_v53  ;;  %v1262_v30 = vld [vmem:[#allocation2 + $0xa0] sm:$0xf]  ;;  %v8784_v37 = vld [vmem:[%s11103_s4 + $0xd4] ss:$8 sps:$4 sm:$0xff]  }
 0x114   : > { %v1188_v28 = vrot.slane %v1186_v18, 7  ;;  %v8285_v47 = vpack.c.bf16 %v874_v24, %v874_v24  ;;  %v8288_v32 = vpack.c.bf16 %v877_v25, %v877_v25  ;;  %v875_v35 = vsel %vm805_vm14, %v728_v7, %v843_v21  ;;  %v1265_v38 = vld [vmem:[#allocation2 + $0xa4] sm:$0x1]  ;;  %v8781_v53 = vld [vmem:[#allocation2 + $0x20] ss:$8 sps:$4 sm:$0xff]  }
 0x115   : > { %v8286_v39 = vpack.c.bf16 %v875_v35, %v875_v35  ;;  %vm810_vm15 = vcmp.gt.f32.partialorder %v749_v22, 0.0  ;;  %v848_v36 = vmul.f32 %v9514_v31, %v749_v22  ;;  %vm808_vm0 = vcmp.gt.f32.partialorder %v9702_v26, 0.0  ;;  %1732 = vmatpush1.bf16.msra.mxu1 %v8775_v19  ;;  %v1250_v46 = vld [vmem:[#allocation2 + $0x90] sm:$0xf]  ;;  %v1253_v61 = vld [vmem:[#allocation2 + $0x94] sm:$0x1] }
 0x116   : > { %v1191_v43 = vor.u32 %v1189_v20, %v1188_v28  ;;  %v1192_v44 = vrot.slane %v1188_v28, 4  ;;  %v1170_v45 = vshrl.u32 %v8285_v47, 16  ;;  %v1173_v41 = vshll.u32 %v8285_v47, 16  ;;  %1733 = vmatprep.subr.bf16.mxu1 %v8780_v23  ;;  %v8782_v59 = vld [vmem:[%s11103_s4 + $0xd0] ss:$8 sps:$4 sm:$0xff]  }
 0x117   : > { %v1194_v48 = vshrl.u32 %v8288_v32, 16  ;;  %v1197_v50 = vshll.u32 %v8288_v32, 16  ;;  %v1178_v54 = vshrl.u32 %v8286_v39, 16  ;;  %v1181_v56 = vshll.u32 %v8286_v39, 16  ;;  %v1268_v5 = vld [vmem:[#allocation2 + $0xa8] sm:$0xf] }
 0x118   : > { %v1263_v63 = vsel %vm9532_vm11, %v1191_v43, %v1262_v30  ;;  %v1266_v0 = vsel %vm9427_vm5, %v1192_v44, %v1265_v38  ;;  %v1172_v1 = vrot.slane %v1170_v45, 7  ;;  %v1271_v6 = vld [vmem:[#allocation2 + $0xac] sm:$0x1]  ;;  %v880_v10 = vsel %vm810_vm15, %v749_v22, %v848_v36  ;;  %1560 = vmatmul.mubr.bf16.gmra.mrb[24].mxu1 %v8781_v53  ;;  %v1256_v52 = vld [vmem:[#allocation2 + $0x98] sm:$0xf] }
 0x119   : > { %1264 = vst [vmem:[#allocation2 + $0xa0] sm:$0xf] %v1263_v63  ;;  %1267 = vst [vmem:[#allocation2 + $0xa4] sm:$0x1] %v1266_v0  ;;  %v1196_v51 = vrot.slane %v1194_v48, 7  ;;  %v1180_v11 = vrot.slane %v1178_v54, 7  ;;  %v8291_v7 = vpack.c.bf16 %v880_v10, %v880_v10  ;;  %v846_v13 = vmul.f32 %v9514_v31, %v9702_v26  ;;  %1734 = vmatpush1.bf16.msra.mxu1 %v8778_v27 }
 0x11a   : > { %1569 = vmatprep.mubr.bf16.mxu1 %v9250_v2  ;;  %v1175_v12 = vor.u32 %v1173_v41, %v1172_v1  ;;  %v1176_v14 = vrot.slane %v1172_v1, 4  ;;  %v1259_v15 = vld [vmem:[#allocation2 + $0x9c] sm:$0x1]  ;;  %v752_v57 = vadd.f32 %v9574_v58, %v9509_v29  ;;  %v744_v16 = vadd.f32 %v9509_v29, %v9578_v62  ;;  %1735 = vmatprep.subr.bf16.mxu1 %v8784_v37  ;;  %v8787_v17 = vld [vmem:[%s11103_s4 + $0xe4] ss:$8 sps:$4 sm:$0xff]  }
 0x11b   : > { %v1199_v19 = vor.u32 %v1197_v50, %v1196_v51  ;;  %v1200_v18 = vrot.slane %v1196_v51, 4  ;;  %v1183_v20 = vor.u32 %v1181_v56, %v1180_v11  ;;  %v1184_v21 = vrot.slane %v1180_v11, 4  ;;  %v8785_v62 = vld [vmem:[%s11103_s4 + $0xe0] ss:$8 sps:$4 sm:$0xff]   ;;  %v8791_v25 = vld [vmem:[%s11103_s4 + $0xf4] ss:$8 sps:$4 sm:$0xff]  }
 0x11c   : > { %v1251_v22 = vsel %vm9532_vm11, %v1175_v12, %v1250_v46  ;;  %v1254_v23 = vsel %vm9427_vm5, %v1176_v14, %v1253_v61  ;;  %v1218_v24 = vshrl.u32 %v8291_v7, 16  ;;  %v1221_v58 = vshll.u32 %v8291_v7, 16  ;;  %v1286_v35 = vld [vmem:[#allocation2 + $0xc0] sm:$0xf]  ;;  %v1289_v37 = vld [vmem:[#allocation2 + $0xc4] sm:$0x1] }
 0x11d   : > { %1252 = vst [vmem:[#allocation2 + $0x90] sm:$0xf] %v1251_v22  ;;  %1255 = vst [vmem:[#allocation2 + $0x94] sm:$0x1] %v1254_v23  ;;  %v1269_v27 = vsel %vm9532_vm11, %v1199_v19, %v1268_v5  ;;  %v1272_v28 = vsel %vm9427_vm5, %v1200_v18, %v1271_v6  ;;  %v1257_v30 = vsel %vm9532_vm11, %v1183_v20, %v1256_v52  ;;  %1736 = vmatpush1.bf16.msra.mxu1 %v8782_v59  ;;  %v8788_v36 = vld [vmem:[#allocation2 + $0x30] ss:$8 sps:$4 sm:$0xff]  }
 0x11e   : > { %v1260_v47 = vsel %vm9427_vm5, %v1184_v21, %v1259_v15  ;;  %1270 = vst [vmem:[#allocation2 + $0xa8] sm:$0xf] %v1269_v27  ;;  %1273 = vst [vmem:[#allocation2 + $0xac] sm:$0x1] %v1272_v28  ;;  %v1220_v32 = vrot.slane %v1218_v24, 7  ;;  %v878_v38 = vsel %vm808_vm0, %v9702_v26, %v846_v13  ;;  %vm811_vm1 = vcmp.gt.f32.partialorder %v752_v57, 0.0  ;;  %1737 = vmatprep.subr.bf16.mxu1 %v8787_v17 }
 0x11f   : > { %1258 = vst [vmem:[#allocation2 + $0x98] sm:$0xf] %v1257_v30  ;;  %1261 = vst [vmem:[#allocation2 + $0x9c] sm:$0x1] %v1260_v47  ;;  %v849_v39 = vmul.f32 %v9514_v31, %v752_v57  ;;  %v8289_v53 = vpack.c.bf16 %v878_v38, %v878_v38  ;;  %vm809_vm3 = vcmp.gt.f32.partialorder %v744_v16, 0.0  ;;  %v847_v43 = vmul.f32 %v9514_v31, %v744_v16 }
 0x120   : > { %v1309_v44 = vld [vmem:[#allocation2 + $0xa0] sm:$0x1]  ;;  %v1223_v45 = vor.u32 %v1221_v58, %v1220_v32  ;;  %v1224_v41 = vrot.slane %v1220_v32, 4  ;;  %1570 = vmatmul.mubr.bf16.gmra.mrb[28].mxu1 %v8788_v36  ;;  %v8789_v54 = vld [vmem:[%s11103_s4 + $0xf0] ss:$8 sps:$4 sm:$0xff]  }
 0x121   : > { %v881_v46 = vsel %vm811_vm1, %v752_v57, %v849_v39  ;;  %v1310_v61 = vsel %vm9427_vm5, 0, %v1309_v44  ;;  %v1202_v48 = vshrl.u32 %v8289_v53, 16  ;;  %v1205_v50 = vshll.u32 %v8289_v53, 16  ;;  %1738 = vmatpush1.bf16.msra.mxu1 %v8785_v62  ;;  %1757 = vmatprep.mubr.bf16.mxu1 %v9250_v2  ;;  %v8794_v56 = vld [vmem:[%s11103_s4 + $0x104] ss:$8 sps:$4 sm:$0xff]  }
 0x122   : > { %v8292_v26 = vpack.c.bf16 %v881_v46, %v881_v46  ;;  %1311 = vst [vmem:[#allocation2 + $0xa0] sm:$0x1] %v1310_v61  ;;  %v1287_v59 = vsel %vm9532_vm11, %v1223_v45, %v1286_v35  ;;  %v1290_v63 = vsel %vm9427_vm5, %v1224_v41, %v1289_v37  ;;  %v879_v0 = vsel %vm809_vm3, %v744_v16, %v847_v43  ;;  %v1846_v1 = vld [vmem:[#allocation2] sm:$0xf]  ;;  %v1274_v6 = vld [vmem:[#allocation2 + $0xb0] sm:$0xf] }
 0x123   : > { %1739 = vmatprep.subr.bf16.mxu1 %v8791_v25  ;;  %1288 = vst [vmem:[#allocation2 + $0xc0] sm:$0xf] %v1287_v59  ;;  %1291 = vst [vmem:[#allocation2 + $0xc4] sm:$0x1] %v1290_v63  ;;  %v1204_v5 = vrot.slane %v1202_v48, 7  ;;  %v8290_v51 = vpack.c.bf16 %v879_v0, %v879_v0  ;;  %v1866_v27 = vshrl.u32 %v1846_v1, 16 }
 0x124   : > { %v1226_v10 = vshrl.u32 %v8292_v26, 16  ;;  %v8792_v11 = vld [vmem:[%s11103_s4 + $0x100] ss:$8 sps:$4 sm:$0xff]   ;;  %v1303_v52 = vld [vmem:[#allocation2 + $0x90] sm:$0x1]  ;;  %v1229_v13 = vshll.u32 %v8292_v26, 16 }
 0x125   : > { %v1277_v7 = vld [vmem:[#allocation2 + $0xb4] sm:$0x1]  ;;  %v1304_v14 = vsel %vm9427_vm5, 0, %v1303_v52  ;;  %v1312_v15 = vld [vmem:[#allocation2 + $0xa8] sm:$0x1]  ;;  %v1207_v16 = vor.u32 %v1205_v50, %v1204_v5  ;;  %v1208_v17 = vrot.slane %v1204_v5, 4  ;;  %1740 = vmatpush1.bf16.msra.mxu1 %v8789_v54 }
 0x126   : > { %v8798_v12 = vld [vmem:[%s11103_s4 + $0x114] ss:$8 sps:$4 sm:$0xff]   ;;  %v1306_v57 = vld [vmem:[#allocation2 + $0x98] sm:$0x1]  ;;  %1305 = vst [vmem:[#allocation2 + $0x90] sm:$0x1] %v1304_v14  ;;  %2090 = vmatprep.subr.bf16.mxu1 %v8794_v56 }
 0x127   : > { %v1313_v19 = vsel %vm9427_vm5, 0, %v1312_v15  ;;  %v1307_v18 = vsel %vm9427_vm5, 0, %v1306_v57  ;;  %v1228_v20 = vrot.slane %v1226_v10, 7  ;;  %v1292_v21 = vld [vmem:[#allocation2 + $0xc8] sm:$0xf]  ;;  %v1210_v22 = vshrl.u32 %v8290_v51, 16 }
 0x128   : > { %v8795_v23 = vld [vmem:[#allocation2 + $0x48] ss:$8 sps:$4 sm:$0xff]   ;;  %1314 = vst [vmem:[#allocation2 + $0xa8] sm:$0x1] %v1313_v19  ;;  %1308 = vst [vmem:[#allocation2 + $0x98] sm:$0x1] %v1307_v18  ;;  %v1275_v24 = vsel %vm9532_vm11, %v1207_v16, %v1274_v6  ;;  %v1278_v58 = vsel %vm9427_vm5, %v1208_v17, %v1277_v7  ;;  %v765_v16 = vadd.f32 %v9601_v42, %v9509_v29 }
 0x129   : > { %v1295_v62 = vld [vmem:[#allocation2 + $0xcc] sm:$0x1]  ;;  %v1213_v25 = vshll.u32 %v8290_v51, 16  ;;  %v8796_v28 = vld [vmem:[%s11103_s4 + $0x110] ss:$8 sps:$4 sm:$0xff]   ;;  %v1231_v30 = vor.u32 %v1229_v13, %v1228_v20  ;;  %v1232_v47 = vrot.slane %v1228_v20, 4  ;;  %1758 = vmatmul.mubr.bf16.vlgmr.msra.gmra.mrb[16].mxu1 %v8795_v23 }
 0x12a   : > { %1276 = vst [vmem:[#allocation2 + $0xb0] sm:$0xf] %v1275_v24  ;;  %1279 = vst [vmem:[#allocation2 + $0xb4] sm:$0x1] %v1278_v58  ;;  %v1212_v32 = vrot.slane %v1210_v22, 7  ;;  %v1869_v35 = vshll.u32 %v1846_v1, 16  ;;  %2091 = vmatpush1.bf16.msra.mxu1 %v8792_v11  ;;  %1767 = vmatprep.mubr.bf16.mxu1 %v9250_v2 }
 0x12b   : > { %v1280_v37 = vld [vmem:[#allocation2 + $0xb8] sm:$0xf]  ;;  %v1283_v38 = vld [vmem:[#allocation2 + $0xbc] sm:$0x1]  ;;  %v1321_v39 = vld [vmem:[#allocation2 + $0xc0] sm:$0x1]  ;;  %v1293_v36 = vsel %vm9532_vm11, %v1231_v30, %v1292_v21  ;;  %v1296_v53 = vsel %vm9427_vm5, %v1232_v47, %v1295_v62  ;;  %2092 = vmatprep.subr.bf16.mxu1 %v8798_v12  ;;  %v757_v30 = vadd.f32 %v9509_v29, %v9605_v49 }
 0x12c   : > { %v1215_v43 = vor.u32 %v1213_v25, %v1212_v32  ;;  %v1216_v44 = vrot.slane %v1212_v32, 4  ;;  %v1848_v45 = vld [vmem:[#allocation2 + $0x8] sm:$0xf]  ;;  %v8801_v41 = vld [vmem:[%s11103_s4 + $0x124] ss:$8 sps:$4 sm:$0xff]   ;;  %v1322_v46 = vsel %vm9427_vm5, 0, %v1321_v39  ;;  %v852_v25 = vmul.f32 %v9514_v31, %v765_v16 }
 0x12d   : > { %1294 = vst [vmem:[#allocation2 + $0xc8] sm:$0xf] %v1293_v36  ;;  %1297 = vst [vmem:[#allocation2 + $0xcc] sm:$0x1] %v1296_v53  ;;  %v1868_v50 = vrot.slane %v1866_v27, 4  ;;  %v1871_v26 = vrot.slane %v1869_v35, 5 }
 0x12e   : > { %1323 = vst [vmem:[#allocation2 + $0xc0] sm:$0x1] %v1322_v46  ;;  %v1281_v61 = vsel %vm9532_vm11, %v1215_v43, %v1280_v37  ;;  %v1284_v48 = vsel %vm9427_vm5, %v1216_v44, %v1283_v38  ;;  %v1847_v54 = vld [vmem:[#allocation2 + $0x4] sm:$0x1]  ;;  %v1880_v56 = vshrl.u32 %v1848_v45, 16  ;;  %v1883_v59 = vshll.u32 %v1848_v45, 16  ;;  %2093 = vmatpush1.bf16.msra.mxu1 %v8796_v28 }
 0x12f   : > { %1282 = vst [vmem:[#allocation2 + $0xb8] sm:$0xf] %v1281_v61  ;;  %1285 = vst [vmem:[#allocation2 + $0xbc] sm:$0x1] %v1284_v48  ;;  %v8799_v63 = vld [vmem:[%s11103_s4 + $0x120] ss:$8 sps:$4 sm:$0xff]   ;;  %2094 = vmatprep.subr.bf16.mxu1 %v8801_v41  ;;  %v1872_v10 = vor.u32 %v1871_v26, %v1868_v50 }
 0x130   : > { %v8802_v0 = vld [vmem:[#allocation2 + $0x58] ss:$8 sps:$4 sm:$0xff]   ;;  %v8805_v1 = vld [vmem:[%s11103_s4 + $0x134] ss:$8 sps:$4 sm:$0xff]   ;;  %vm1862_vm4 = vsmask.f32 3328 }
 0x131   : > { %v1315_v5 = vld [vmem:[#allocation2 + $0xb0] sm:$0x1]  ;;  %v1875_v51 = vshll.u32 %v1847_v54, 16  ;;  %1768 = vmatmul.mubr.bf16.gmra.mrb[20].mxu1 %v8802_v0  ;;  %vm1863_vm6 = vsmask.f32 7440  ;;  %v1882_v11 = vrot.slane %v1880_v56, 4 }
 0x132   : > { %v1316_v6 = vsel %vm9427_vm5, 0, %v1315_v5  ;;  %v1885_v52 = vrot.slane %v1883_v59, 5  ;;  %2095 = vmatpush1.bf16.msra.mxu1 %v8799_v63  ;;  %v8803_v7 = vld [vmem:[%s11103_s4 + $0x130] ss:$8 sps:$4 sm:$0xff]   ;;  %1777 = vmatprep.mubr.bf16.mxu1 %v9250_v2  ;;  %v8808_v13 = vld [vmem:[%s11103_s4 + $0x144] ss:$8 sps:$4 sm:$0xff]   ;;  %vm9827_vm7 = vmor %vm1862_vm4, %vm1863_vm6 }
 0x133   : > { %1317 = vst [vmem:[#allocation2 + $0xb0] sm:$0x1] %v1316_v6  ;;  %2096 = vmatprep.subr.bf16.mxu1 %v8805_v1  ;;  %v1849_v15 = vld [vmem:[#allocation2 + $0xc] sm:$0x1]  ;;  %v1850_v57 = vld [vmem:[#allocation2 + $0x10] sm:$0xf] }
 0x134   : > { %v1324_v12 = vld [vmem:[#allocation2 + $0xc8] sm:$0x1]  ;;  %v9819_v19 = vrot.slane %v1872_v10, 4  ;;  %v9821_v18 = vrot.slane %v1875_v51, 5  ;;  %v1886_v22 = vor.u32 %v1885_v52, %v1882_v11  ;;  %v1889_v23 = vshll.u32 %v1849_v15, 16 }
 0x135   : > { %v1325_v14 = vsel %vm9427_vm5, 0, %v1324_v12  ;;  %v8806_v42 = vld [vmem:[%s11103_s4 + $0x140] ss:$8 sps:$4 sm:$0xff]   ;;  %v1894_v24 = vshrl.u32 %v1850_v57, 16  ;;  %v8812_v62 = vld [vmem:[%s11103_s4 + $0x154] ss:$8 sps:$4 sm:$0xff]  }
 0x136   : > { %1326 = vst [vmem:[#allocation2 + $0xc8] sm:$0x1] %v1325_v14  ;;  %v1318_v17 = vld [vmem:[#allocation2 + $0xb8] sm:$0x1]  ;;  %2097 = vmatpush1.bf16.msra.mxu1 %v8803_v7  ;;  %v8809_v58 = vld [vmem:[#allocation2 + $0x68] ss:$8 sps:$4 sm:$0xff]   ;;  %v1878_v27 = vsel %vm9827_vm7, %v9819_v19, %v9821_v18 }
 0x137   : > { %v1319_v20 = vsel %vm9427_vm5, 0, %v1318_v17  ;;  %2098 = vmatprep.subr.bf16.mxu1 %v8808_v13  ;;  %vm814_vm8 = vcmp.gt.f32.partialorder %v765_v16, 0.0  ;;  %v1897_v28 = vshll.u32 %v1850_v57, 16  ;;  %v9844_v47 = vrot.slane %v1886_v22, 4  ;;  %v1852_v32 = vld [vmem:[#allocation2 + $0x18] sm:$0xf] }
 0x138   : > { %1320 = vst [vmem:[#allocation2 + $0xb8] sm:$0x1] %v1319_v20  ;;  %v884_v35 = vsel %vm814_vm8, %v765_v16, %v852_v25  ;;  %v9240_v37 = vld [vmem:[%s11101_s2] ss:$0 sm:$0xff]  ;;  %v8810_v39 = vld [vmem:[%s11103_s4 + $0x150] ss:$8 sps:$4 sm:$0xff]  }
 0x139   : > { %1778 = vmatmul.mubr.bf16.gmra.mrb[24].mxu1 %v8809_v58  ;;  %v768_v31 = vadd.f32 %v9240_v37, %v9614_v60  ;;  %v760_v38 = vadd.f32 %v9240_v37, %v9619_v9  ;;  %v9855_v29 = vrot.slane %v1889_v23, 5  ;;  %v9857_v49 = vrot.slane %v1894_v24, 4  ;;  %v8815_v60 = vld [vmem:[%s11103_s4 + $0x164] ss:$8 sps:$4 sm:$0xff]   ;;  %v9241_v9 = vld [vmem:[%s11102_s3] ss:$0 sm:$0xff] }
 0x13a   : > { %2099 = vmatpush1.bf16.msra.mxu1 %v8806_v42  ;;  %1787 = vmatprep.mubr.bf16.mxu1 %v9250_v2  ;;  %v1332_v36 = vpack.c.bf16 %v884_v35, %v884_v35  ;;  %vm812_vm9 = vcmp.gt.f32.partialorder %v757_v30, 0.0  ;;  %v850_v53 = vmul.f32 %v9241_v9, %v757_v30  ;;  %v1908_v44 = vshrl.u32 %v1852_v32, 16  ;;  %v8813_v54 = vld [vmem:[%s11103_s4 + $0x160] ss:$8 sps:$4 sm:$0xff]   ;;  %v8817_v10 = vld [vmem:[%s11103_s4 + $0x170] ss:$8 sps:$4 sm:$0xff]  }
 0x13b   : > { %2100 = vmatprep.subr.bf16.mxu1 %v8812_v62  ;;  %vm815_vm10 = vcmp.gt.f32.partialorder %v768_v31, 0.0  ;;  %v853_v43 = vmul.f32 %v9241_v9, %v768_v31  ;;  %vm813_vm12 = vcmp.gt.f32.partialorder %v760_v38, 0.0  ;;  %v851_v45 = vmul.f32 %v9241_v9, %v760_v38  ;;  %v8816_v1 = vld [vmem:[#allocation2 + $0x78] ss:$8 sps:$4 sm:$0xff]   ;;  %v1856_v11 = vld [vmem:[#allocation2 + $0x28] sm:$0xf] }
 0x13c   : > { %1341 = vst [vmem:[#allocation2 + $0xe8] sm:$0xf] %v1332_v36  ;;  %v781_v41 = vadd.f32 %v9240_v37, %v9642_v34  ;;  %v773_v46 = vadd.f32 %v9240_v37, %v9653_v40  ;;  %v882_v61 = vsel %vm812_vm9, %v757_v30, %v850_v53  ;;  %v784_v50 = vadd.f32 %v9240_v37, %v9665_v55  ;;  %v8819_v34 = vld [vmem:[%s11103_s4 + $0x174] ss:$8 sps:$4 sm:$0xff]   ;;  %v8822_v13 = vld [vmem:[%s11103_s4 + $0x184] ss:$8 sps:$4 sm:$0xff]  }
 0x13d   : > { %v885_v48 = vsel %vm815_vm10, %v768_v31, %v853_v43  ;;  %v776_v26 = vadd.f32 %v9240_v37, %v9674_v3  ;;  %v1911_v56 = vshll.u32 %v1852_v32, 16  ;;  %v1330_v59 = vpack.c.bf16 %v882_v61, %v882_v61  ;;  %v1851_v12 = vld [vmem:[#allocation2 + $0x14] sm:$0x1]  ;;  %v1854_v20 = vld [vmem:[#allocation2 + $0x20] sm:$0xf] }
 0x13e   : > { %2101 = vmatpush1.bf16.msra.mxu1 %v8810_v39  ;;  %v1333_v63 = vpack.c.bf16 %v885_v48, %v885_v48  ;;  %v883_v0 = vsel %vm813_vm12, %v760_v38, %v851_v45  ;;  %v1899_v40 = vrot.slane %v1897_v28, 5  ;;  %vm818_vm13 = vcmp.gt.f32.partialorder %v781_v41, 0.0  ;;  %v1853_v24 = vld [vmem:[#allocation2 + $0x1c] sm:$0x1]  ;;  %v8820_v30 = vld [vmem:[%s11103_s4 + $0x180] ss:$8 sps:$4 sm:$0xff]  }
 0x13f   : > { %2102 = vmatprep.subr.bf16.mxu1 %v8815_v60  ;;  %v1331_v5 = vpack.c.bf16 %v883_v0, %v883_v0  ;;  %v856_v55 = vmul.f32 %v9241_v9, %v781_v41  ;;  %1339 = vst [vmem:[#allocation2 + $0xd8] sm:$0xf] %v1330_v59  ;;  %vm816_vm14 = vcmp.gt.f32.partialorder %v773_v46, 0.0  ;;  %v854_v3 = vmul.f32 %v9241_v9, %v773_v46  ;;  %v8823_v60 = vld [vmem:[%s11103_s4 + $0x190] ss:$8 sps:$4 sm:$0xff]  }
 0x140   : > { %1342 = vst [vmem:[#allocation2 + $0xf0] sm:$0xf] %v1333_v63  ;;  %vm819_vm15 = vcmp.gt.f32.partialorder %v784_v50, 0.0  ;;  %v857_v6 = vmul.f32 %v9241_v9, %v784_v50  ;;  %v1910_v51 = vrot.slane %v1908_v44, 4  ;;  %vm817_vm0 = vcmp.gt.f32.partialorder %v776_v26, 0.0 }
 0x141   : > { %1788 = vmatmul.mubr.bf16.gmra.mrb[28].mxu1 %v8816_v1  ;;  %1340 = vst [vmem:[#allocation2 + $0xe0] sm:$0xf] %v1331_v5  ;;  %v888_v52 = vsel %vm818_vm13, %v781_v41, %v856_v55  ;;  %v855_v7 = vmul.f32 %v9241_v9, %v776_v26  ;;  %v1913_v14 = vrot.slane %v1911_v56, 5  ;;  %v886_v57 = vsel %vm816_vm14, %v773_v46, %v854_v3  ;;  %v8828_v9 = vld [vmem:[%s11103_s4 + $0x1a4] ss:$8 sps:$4 sm:$0xff]  }
 0x142   : > { %2103 = vmatpush1.bf16.msra.mxu1 %v8813_v54  ;;  %2122 = vmatprep.mubr.bf16.mxu1 %v9250_v2  ;;  %v1336_v15 = vpack.c.bf16 %v888_v52, %v888_v52  ;;  %v889_v16 = vsel %vm819_vm15, %v784_v50, %v857_v6  ;;  %v1892_v17 = vsel %vm9827_vm7, %v9844_v47, %v9855_v29  ;;  %v1936_v62 = vshrl.u32 %v1856_v11, 16  ;;  %v8825_v47 = vld [vmem:[%s11103_s4 + $0x194] ss:$8 sps:$4 sm:$0xff]   ;;  %v1858_v53 = vld [vmem:[#allocation2 + $0x30] sm:$0xf] }
 0x143   : > { %2104 = vmatprep.subr.bf16.mxu1 %v8819_v34  ;;  %v1334_v22 = vpack.c.bf16 %v886_v57, %v886_v57  ;;  %v1337_v42 = vpack.c.bf16 %v889_v16, %v889_v16  ;;  %v887_v23 = vsel %vm817_vm0, %v776_v26, %v855_v7  ;;  %v1900_v58 = vor.u32 %v1899_v40, %v9857_v49  ;;  %v1857_v18 = vld [vmem:[#allocation2 + $0x2c] sm:$0x1]  ;;  %v1860_v41 = vld [vmem:[#allocation2 + $0x38] sm:$0xf]  ;;  %v1855_v26 = vld [vmem:[#allocation2 + $0x24] sm:$0x1] }
 0x144   : > { %v1939_v25 = vshll.u32 %v1856_v11, 16  ;;  %1345 = vst [vmem:[#allocation2 + $0x108] sm:$0xf] %v1336_v15  ;;  %v1335_v28 = vpack.c.bf16 %v887_v23, %v887_v23  ;;  %v1903_v32 = vshll.u32 %v1851_v12, 16  ;;  %v1914_v35 = vor.u32 %v1913_v14, %v1910_v51  ;;  %v8826_v56 = vld [vmem:[%s11103_s4 + $0x1a0] ss:$8 sps:$4 sm:$0xff]  }
 0x145   : > { %1343 = vst [vmem:[#allocation2 + $0xf8] sm:$0xf] %v1334_v22  ;;  %1346 = vst [vmem:[#allocation2 + $0x110] sm:$0xf] %v1337_v42  ;;  %v1922_v37 = vshrl.u32 %v1854_v20, 16  ;;  %v1925_v31 = vshll.u32 %v1854_v20, 16  ;;  %v7661_v38 = vcombine.low %v1878_v27, %v1892_v17 }
 0x146   : > { %2105 = vmatpush1.bf16.msra.mxu1 %v8817_v10  ;;  %1344 = vst [vmem:[#allocation2 + $0x100] sm:$0xf] %v1335_v28  ;;  %v1917_v39 = vshll.u32 %v1853_v24, 16  ;;  %v1901_v29 = vrot.slane %v1900_v58, 4  ;;  %v1938_v49 = vrot.slane %v1936_v62, 4  ;;  %v1941_v36 = vrot.slane %v1939_v25, 5 }
 0x147   : > { %2340 = vmatprep.subr.bf16.mxu1 %v8822_v13  ;;  %v1905_v43 = vrot.slane %v1903_v32, 5  ;;  %v1915_v19 = vrot.slane %v1914_v35, 4  ;;  %v1924_v27 = vrot.slane %v1922_v37, 4  ;;  %v1927_v44 = vrot.slane %v1925_v31, 5  ;;  %v8831_v40 = vld [vmem:[%s11103_s4 + $0x1b4] ss:$8 sps:$4 sm:$0xff]  }
 0x148   : > { %v1919_v45 = vrot.slane %v1917_v39, 5  ;;  %v1942_v61 = vor.u32 %v1941_v36, %v1938_v49  ;;  %v1950_v48 = vshrl.u32 %v1858_v53, 16  ;;  %v1953_v50 = vshll.u32 %v1858_v53, 16  ;;  %v8829_v10 = vld [vmem:[%s11103_s4 + $0x1b0] ss:$8 sps:$4 sm:$0xff]  }
 0x149   : > { %2123 = vmatmul.mubr.bf16.vlgmr.msra.gmra.mrb[16].mxu1 %v7661_v38  ;;  %v1906_v46 = vsel %vm9827_vm7, %v1901_v29, %v1905_v43  ;;  %v1945_v54 = vshll.u32 %v1857_v18, 16  ;;  %v1928_v63 = vor.u32 %v1927_v44, %v1924_v27  ;;  %v1964_v0 = vshrl.u32 %v1860_v41, 16  ;;  %v8834_v13 = vld [vmem:[%s11103_s4 + $0x1c4] ss:$8 sps:$4 sm:$0xff]   ;;  %v1859_v12 = vld [vmem:[#allocation2 + $0x34] sm:$0x1] }
 0x14a   : > { %2341 = vmatpush1.bf16.msra.mxu1 %v8820_v30  ;;  %2132 = vmatprep.mubr.bf16.mxu1 %v9250_v2  ;;  %v1920_v59 = vsel %vm9827_vm7, %v1915_v19, %v1919_v45  ;;  %v1967_v1 = vshll.u32 %v1860_v41, 16  ;;  %v1931_v5 = vshll.u32 %v1855_v26, 16  ;;  %v1943_v55 = vrot.slane %v1942_v61, 4  ;;  %v1861_v16 = vld [vmem:[#allocation2 + $0x3c] sm:$0x1] }
 0x14b   : > { %2342 = vmatprep.subr.bf16.mxu1 %v8825_v47  ;;  %v7662_v34 = vcombine.low %v1906_v46, %v1920_v59  ;;  %v1952_v3 = vrot.slane %v1950_v48, 4  ;;  %v1955_v6 = vrot.slane %v1953_v50, 5  ;;  %v1929_v51 = vrot.slane %v1928_v63, 4  ;;  %v8832_v17 = vld [vmem:[%s11103_s4 + $0x1c0] ss:$8 sps:$4 sm:$0xff]  }
 0x14c   : > { %v1947_v11 = vrot.slane %v1945_v54, 5  ;;  %v1966_v52 = vrot.slane %v1964_v0, 4  ;;  %v1969_v7 = vrot.slane %v1967_v1, 5  ;;  %v1933_v14 = vrot.slane %v1931_v5, 5  ;;  %v8837_v24 = vld [vmem:[%s11103_s4 + $0x1d4] ss:$8 sps:$4 sm:$0xff]  }
 0x14d   : > { %v1956_v57 = vor.u32 %v1955_v6, %v1952_v3  ;;  %v1959_v22 = vshll.u32 %v1859_v12, 16  ;;  %v1973_v62 = vshll.u32 %v1861_v16, 16  ;;  %v8835_v25 = vld [vmem:[%s11103_s4 + $0x1d0] ss:$8 sps:$4 sm:$0xff]   ;;  %v8840_v47 = vld [vmem:[%s11103_s4 + $0x1e4] ss:$8 sps:$4 sm:$0xff]  }
 0x14e   : > { %2343 = vmatpush1.bf16.msra.mxu1 %v8823_v60  ;;  %v1948_v15 = vsel %vm9827_vm7, %v1943_v55, %v1947_v11  ;;  %v1934_v20 = vsel %vm9827_vm7, %v1929_v51, %v1933_v14  ;;  %v1970_v42 = vor.u32 %v1969_v7, %v1966_v52  ;;  %v8838_v37 = vld [vmem:[%s11103_s4 + $0x1e0] ss:$8 sps:$4 sm:$0xff]   ;;  %v8843_v39 = vld [vmem:[%s11103_s4 + $0x1f4] ss:$8 sps:$4 sm:$0xff]   ;;  %v8841_v29 = vld [vmem:[%s11103_s4 + $0x1f0] ss:$8 sps:$4 sm:$0xff]  }
 0x14f   : > { %2344 = vmatprep.subr.bf16.mxu1 %v8828_v9  ;;  %v7663_v23 = vcombine.low %v1934_v20, %v1948_v15  ;;  %v1957_v58 = vrot.slane %v1956_v57, 4  ;;  %v1961_v28 = vrot.slane %v1959_v22, 5  ;;  %v1975_v35 = vrot.slane %v1973_v62, 5  ;;  %v8846_v49 = vld [vmem:[%s11103_s4 + $0x204] ss:$8 sps:$4 sm:$0xff]  }
 0x150   : > { %v1971_v30 = vrot.slane %v1970_v42, 4  ;;  %v8844_v36 = vld [vmem:[%s11103_s4 + $0x200] ss:$8 sps:$4 sm:$0xff]   ;;  %v8847_v60 = vld [vmem:[#allocation2 + $0x90] ss:$8 sps:$4 sm:$0xff]  }
 0x151   : > { %2133 = vmatmul.mubr.bf16.gmra.mrb[20].mxu1 %v7662_v34  ;;  %v1962_v32 = vsel %vm9827_vm7, %v1957_v58, %v1961_v28  ;;  %v8850_v9 = vld [vmem:[%s11103_s4 + $0x214] ss:$8 sps:$4 sm:$0xff]   ;;  %v8848_v53 = vld [vmem:[%s11103_s4 + $0x210] ss:$8 sps:$4 sm:$0xff]   ;;  %v8853_v43 = vld [vmem:[%s11103_s4 + $0x224] ss:$8 sps:$4 sm:$0xff]  }
 0x152   : > { %2345 = vmatpush1.bf16.msra.mxu1 %v8826_v56  ;;  %2142 = vmatprep.mubr.bf16.mxu1 %v9250_v2  ;;  %v1976_v31 = vsel %vm9827_vm7, %v1971_v30, %v1975_v35  ;;  %v8851_v19 = vld [vmem:[%s11103_s4 + $0x220] ss:$8 sps:$4 sm:$0xff]   ;;  %v8857_v27 = vld [vmem:[%s11103_s4 + $0x234] ss:$8 sps:$4 sm:$0xff]   ;;  %v8855_v44 = vld [vmem:[%s11103_s4 + $0x230] ss:$8 sps:$4 sm:$0xff]  }
 0x153   : > { %2346 = vmatprep.subr.bf16.mxu1 %v8831_v40  ;;  %v7664_v38 = vcombine.low %v1962_v32, %v1976_v31  ;;  %v8854_v18 = vld [vmem:[#allocation2 + $0xa0] ss:$8 sps:$4 sm:$0xff]   ;;  %v8860_v45 = vld [vmem:[%s11103_s4 + $0x244] ss:$8 sps:$4 sm:$0xff]   ;;  %v8861_v46 = vld [vmem:[#allocation2 + $0xb0] ss:$8 sps:$4 sm:$0xff]  }
 0x154   : > { %v8858_v41 = vld [vmem:[%s11103_s4 + $0x240] ss:$8 sps:$4 sm:$0xff]   ;;  %v8864_v61 = vld [vmem:[%s11103_s4 + $0x254] ss:$8 sps:$4 sm:$0xff]   ;;  %v8862_v48 = vld [vmem:[%s11103_s4 + $0x250] ss:$8 sps:$4 sm:$0xff]  }
 0x155   : > { %v8867_v50 = vld [vmem:[%s11103_s4 + $0x264] ss:$8 sps:$4 sm:$0xff]   ;;  %v8865_v26 = vld [vmem:[%s11103_s4 + $0x260] ss:$8 sps:$4 sm:$0xff]   ;;  %v8871_v56 = vld [vmem:[%s11103_s4 + $0x274] ss:$8 sps:$4 sm:$0xff]  }
 0x156   : > { %2347 = vmatpush1.bf16.msra.mxu1 %v8829_v10  ;;  %v8868_v54 = vld [vmem:[#allocation2 + $0xc0] ss:$8 sps:$4 sm:$0xff]   ;;  %v8869_v59 = vld [vmem:[%s11103_s4 + $0x270] ss:$8 sps:$4 sm:$0xff]   ;;  %v8874_v63 = vld [vmem:[%s11103_s4 + $0x284] ss:$8 sps:$4 sm:$0xff]  }
 0x157   : > { %2348 = vmatprep.subr.bf16.mxu1 %v8834_v13  ;;  %v8872_v0 = vld [vmem:[%s11103_s4 + $0x280] ss:$8 sps:$4 sm:$0xff]   ;;  %v8878_v34 = vld [vmem:[%s11103_s4 + $0x294] ss:$8 sps:$4 sm:$0xff]   ;;  %v8876_v40 = vld [vmem:[%s11103_s4 + $0x290] ss:$8 sps:$4 sm:$0xff]  }
 0x158   : > { %v8875_v1 = vld [vmem:[#allocation2 + $0xd8] ss:$8 sps:$4 sm:$0xff]   ;;  %v8881_v5 = vld [vmem:[%s11103_s4 + $0x2a4] ss:$8 sps:$4 sm:$0xff]   ;;  %v8882_v3 = vld [vmem:[#allocation2 + $0xe8] ss:$8 sps:$4 sm:$0xff]  }
 0x159   : > { %2143 = vmatmul.mubr.bf16.gmra.mrb[24].mxu1 %v7663_v23  ;;  %v8879_v55 = vld [vmem:[%s11103_s4 + $0x2a0] ss:$8 sps:$4 sm:$0xff]   ;;  %v8885_v6 = vld [vmem:[%s11103_s4 + $0x2b4] ss:$8 sps:$4 sm:$0xff]   ;;  %v2711_v10 = vld [vmem:[#allocation2 + $0x90] sm:$0xf] }
 0x15a   : > { %2349 = vmatpush1.bf16.msra.mxu1 %v8832_v17  ;;  %2152 = vmatprep.mubr.bf16.mxu1 %v9250_v2  ;;  %v2713_v51 = vld [vmem:[#allocation2 + $0x98] sm:$0xf]  ;;  %v8888_v52 = vld [vmem:[%s11103_s4 + $0x2c4] ss:$8 sps:$4 sm:$0xff]   ;;  %v2728_v7 = vshrl.u32 %v2711_v10, 16  ;;  %v2731_v13 = vshll.u32 %v2711_v10, 16 }
 0x15b   : > { %2350 = vmatprep.subr.bf16.mxu1 %v8837_v24  ;;  %v8883_v11 = vld [vmem:[%s11103_s4 + $0x2b0] ss:$8 sps:$4 sm:$0xff]   ;;  %v2742_v12 = vshrl.u32 %v2713_v51, 16  ;;  %v2745_v14 = vshll.u32 %v2713_v51, 16  ;;  %v8886_v15 = vld [vmem:[%s11103_s4 + $0x2c0] ss:$8 sps:$4 sm:$0xff]  }
 0x15c   : > { %v8892_v57 = vld [vmem:[%s11103_s4 + $0x2d4] ss:$8 sps:$4 sm:$0xff]   ;;  %v8889_v16 = vld [vmem:[#allocation2 + $0xf8] ss:$8 sps:$4 sm:$0xff]   ;;  %v2730_v17 = vrot.slane %v2728_v7, 4  ;;  %v2733_v20 = vrot.slane %v2731_v13, 5 }
 0x15d   : > { %v2715_v22 = vld [vmem:[#allocation2 + $0xa0] sm:$0xf]  ;;  %v2712_v42 = vld [vmem:[#allocation2 + $0x94] sm:$0x1]  ;;  %v2744_v23 = vrot.slane %v2742_v12, 4  ;;  %v2747_v24 = vrot.slane %v2745_v14, 5 }
 0x15e   : > { %2351 = vmatpush1.bf16.msra.mxu1 %v8835_v25  ;;  %v2714_v58 = vld [vmem:[#allocation2 + $0x9c] sm:$0x1]  ;;  %v2717_v62 = vld [vmem:[#allocation2 + $0xa8] sm:$0xf]  ;;  %v8890_v25 = vld [vmem:[%s11103_s4 + $0x2d0] ss:$8 sps:$4 sm:$0xff]   ;;  %v2734_v32 = vor.u32 %v2733_v20, %v2730_v17 }
 0x15f   : > { %2352 = vmatprep.subr.bf16.mxu1 %v8840_v47  ;;  %v2756_v28 = vshrl.u32 %v2715_v22, 16  ;;  %v2759_v30 = vshll.u32 %v2715_v22, 16  ;;  %v8895_v47 = vld [vmem:[%s11103_s4 + $0x2e4] ss:$8 sps:$4 sm:$0xff]   ;;  %v2737_v35 = vshll.u32 %v2712_v42, 16  ;;  %v2751_v31 = vshll.u32 %v2714_v58, 16 }
 0x160   : > { %v8983_v10 = vld [vmem:[%s11104_s5 + $0x8] sm:$0xff]   ;;  %v2720_v12 = vld [vmem:[#allocation2 + $0xb4] sm:$0x1]  ;;  %v2723_v17 = vld [vmem:[#allocation2 + $0xc0] sm:$0xf] }
 0x161   : > { %2153 = vmatmul.mubr.bf16.gmra.mrb[28].mxu1 %v7664_v38  ;;  %v2770_v38 = vshrl.u32 %v2717_v62, 16  ;;  %v8900_v51 = vld [vmem:[%s11103_s4 + $0x300] ss:$8 sps:$4 sm:$0xff]   ;;  %v9221_v21 = vld [vmem:[%s11107_s8 + $0x470] ss:$8 sps:$4 sm:$0xff]  }
 0x162   : > { %2353 = vmatpush1.bf16.msra.mxu1 %v8838_v37  ;;  %2372 = vmatprep.mubr.bf16.mxu1 %v9250_v2  ;;  %v2748_v37 = vor.u32 %v2747_v24, %v2744_v23  ;;  %v8985_v24 = vld [vmem:[%s11104_s5 + $0x10] sm:$0xff]   ;;  %v2725_v58 = vld [vmem:[#allocation2 + $0xc8] sm:$0xf] }
 0x163   : > { %2354 = vmatprep.subr.bf16.mxu1 %v8843_v39  ;;  %v2773_v39 = vshll.u32 %v2717_v62, 16  ;;  %v8986_v62 = vld [vmem:[%s11104_s5 + $0x58] sm:$0xff]  }
 0x166   : > { %2355 = vmatpush1.bf16.msra.mxu1 %v8841_v29  ;;  %v8893_v29 = vld [vmem:[%s11103_s4 + $0x2e0] ss:$8 sps:$4 sm:$0xff]  }
 0x167   : > { %2590 = vmatprep.subr.bf16.mxu1 %v8846_v49  ;;  %v2716_v49 = vld [vmem:[#allocation2 + $0xa4] sm:$0x1] }
 0x169   : > { %2373 = vmatmul.mubr.bf16.vlgmr.msra.gmra.mrb[16].mxu1 %v8847_v60  ;;  %v2718_v60 = vld [vmem:[#allocation2 + $0xac] sm:$0x1] }
 0x16a   : > { %2591 = vmatpush1.bf16.msra.mxu1 %v8844_v36  ;;  %2382 = vmatprep.mubr.bf16.mxu1 %v9250_v2  ;;  %v8899_v36 = vld [vmem:[%s11103_s4 + $0x2f4] ss:$8 sps:$4 sm:$0xff]  }
 0x16b   : > { %2592 = vmatprep.subr.bf16.mxu1 %v8850_v9  ;;  %v2758_v9 = vrot.slane %v2756_v28, 4 }
 0x16e   : > { %2593 = vmatpush1.bf16.msra.mxu1 %v8848_v53  ;;  %v2761_v53 = vrot.slane %v2759_v30, 5  ;;  %v2793_v30 = vshll.u32 %v2720_v12, 16  ;;  %v8993_v12 = vld [vmem:[%s11104_s5 + $0x30] sm:$0xff]  }
 0x16f   : > { %2594 = vmatprep.subr.bf16.mxu1 %v8853_v43  ;;  %v8896_v43 = vld [vmem:[#allocation2 + $0x108] ss:$8 sps:$4 sm:$0xff]  }
 0x171   : > { %2383 = vmatmul.mubr.bf16.gmra.mrb[20].mxu1 %v8854_v18  ;;  %v2739_v18 = vrot.slane %v2737_v35, 5 }
 0x172   : > { %2595 = vmatpush1.bf16.msra.mxu1 %v8851_v19  ;;  %2392 = vmatprep.mubr.bf16.mxu1 %v9250_v2  ;;  %v2735_v19 = vrot.slane %v2734_v32, 4 }
 0x173   : > { %2596 = vmatprep.subr.bf16.mxu1 %v8857_v27  ;;  %v2719_v27 = vld [vmem:[#allocation2 + $0xb0] sm:$0xf] }
 0x176   : > { %2597 = vmatpush1.bf16.msra.mxu1 %v8855_v44  ;;  %v2749_v44 = vrot.slane %v2748_v37, 4  ;;  %v2812_v37 = vshrl.u32 %v2723_v17, 16 }
 0x177   : > { %2598 = vmatprep.subr.bf16.mxu1 %v8860_v45  ;;  %v2753_v45 = vrot.slane %v2751_v31, 5  ;;  %v2815_v31 = vshll.u32 %v2723_v17, 16  ;;  %v8918_v17 = vld [vmem:[%s11103_s4 + $0x360] ss:$8 sps:$4 sm:$0xff]  }
 0x179   : > { %2393 = vmatmul.mubr.bf16.gmra.mrb[24].mxu1 %v8861_v46  ;;  %v2775_v46 = vrot.slane %v2773_v39, 5 }
 0x17a   : > { %2599 = vmatpush1.bf16.msra.mxu1 %v8858_v41  ;;  %2402 = vmatprep.mubr.bf16.mxu1 %v9250_v2  ;;  %v2772_v41 = vrot.slane %v2770_v38, 4 }
 0x17b   : > { %2600 = vmatprep.subr.bf16.mxu1 %v8864_v61  ;;  %v2721_v61 = vld [vmem:[#allocation2 + $0xb8] sm:$0xf] }
 0x17e   : > { %2601 = vmatpush1.bf16.msra.mxu1 %v8862_v48  ;;  %v8980_v48 = vld [vmem:[%s11104_s5 + $0x40] sm:$0xff]  }
 0x17f   : > { %2602 = vmatprep.subr.bf16.mxu1 %v8867_v50  ;;  %v8981_v50 = vld [vmem:[%s11104_s5] sm:$0xff]   ;;  %8319 = vmatprep.subr.bf16.mxu0 %v8980_v48 }
 0x180   : > { %8320 = vmatpush3.bf16.msra.mxu0 %v8981_v50  ;;  %v8989_v50 = vld [vmem:[%s11104_s5 + $0x20] sm:$0xff]  }
 0x181   : > { %2403 = vmatmul.mubr.bf16.gmra.mrb[28].mxu1 %v8868_v54  ;;  %v8897_v54 = vld [vmem:[%s11103_s4 + $0x2f0] ss:$8 sps:$4 sm:$0xff]  }
 0x182   : > { %2603 = vmatpush1.bf16.msra.mxu1 %v8865_v26  ;;  %2622 = vmatprep.mubr.bf16.mxu1 %v9250_v2  ;;  %v8982_v26 = vld [vmem:[%s11104_s5 + $0x48] sm:$0xff]  }
 0x183   : > { %2604 = vmatprep.subr.bf16.mxu1 %v8871_v56  ;;  %v2762_v56 = vor.u32 %v2761_v53, %v2758_v9  ;;  %8321 = vmatprep.subr.bf16.mxu0 %v8982_v26  ;;  %v8906_v9 = vld [vmem:[%s11103_s4 + $0x320] ss:$8 sps:$4 sm:$0xff]   ;;  %v2795_v53 = vrot.slane %v2793_v30, 5  ;;  %v2726_v26 = vld [vmem:[#allocation2 + $0xcc] sm:$0x1] }
 0x184   : > { %8322 = vmatpush3.bf16.msra.mxu0 %v8983_v10  ;;  %v8931_v30 = vld [vmem:[%s11103_s4 + $0x3a0] ss:$8 sps:$4 sm:$0xff]  }
 0x185   : > { %v2763_v7 = vrot.slane %v2762_v56, 4  ;;  %v8909_v56 = vld [vmem:[%s11103_s4 + $0x330] ss:$8 sps:$4 sm:$0xff]  }
 0x186   : > { %2605 = vmatpush1.bf16.msra.mxu1 %v8869_v59  ;;  %v2765_v59 = vshll.u32 %v2716_v49, 16  ;;  %v2829_v49 = vshll.u32 %v2725_v58, 16 }
 0x187   : > { %2952 = vmatprep.subr.bf16.mxu1 %v8874_v63  ;;  %v8902_v63 = vld [vmem:[%s11103_s4 + $0x304] ss:$8 sps:$4 sm:$0xff]  }
 0x188   : > { %v2767_v13 = vrot.slane %v2765_v59, 5  ;;  %v2831_v48 = vrot.slane %v2829_v49, 5  ;;  %v8914_v59 = vld [vmem:[%s11103_s4 + $0x344] ss:$8 sps:$4 sm:$0xff]  }
 0x189   : > { %2623 = vmatmul.mubr.bf16.vlgmr.msra.gmra.mrb[16].mxu1 %v8875_v1  ;;  %v2779_v1 = vshll.u32 %v2718_v60, 16  ;;  %v8988_v60 = vld [vmem:[%s11104_s5 + $0x60] sm:$0xff]  }
 0x18a   : > { %2953 = vmatpush1.bf16.msra.mxu1 %v8872_v0  ;;  %2632 = vmatprep.mubr.bf16.mxu1 %v9250_v2  ;;  %v2740_v0 = vsel %vm9827_vm7, %v2735_v19, %v2739_v18  ;;  %v2768_v28 = vsel %vm9827_vm7, %v2763_v7, %v2767_v13  ;;  %v8911_v18 = vld [vmem:[%s11103_s4 + $0x334] ss:$8 sps:$4 sm:$0xff]   ;;  %v8947_v49 = vld [vmem:[%s11103_s4 + $0x3e4] ss:$8 sps:$4 sm:$0xff]  }
 0x18b   : > { %2954 = vmatprep.subr.bf16.mxu1 %v8878_v34  ;;  %v2784_v34 = vshrl.u32 %v2719_v27, 16  ;;  %v2781_v22 = vrot.slane %v2779_v1, 5 }
 0x18e   : > { %2955 = vmatpush1.bf16.msra.mxu1 %v8876_v40  ;;  %v2787_v40 = vshll.u32 %v2719_v27, 16 }
 0x18f   : > { %2956 = vmatprep.subr.bf16.mxu1 %v8881_v5  ;;  %v2754_v5 = vsel %vm9827_vm7, %v2749_v44, %v2753_v45  ;;  %v2814_v45 = vrot.slane %v2812_v37, 4  ;;  %v8940_v37 = vld [vmem:[%s11103_s4 + $0x3c4] ss:$8 sps:$4 sm:$0xff]  }
 0x190   : > { %v7769_v14 = vcombine.low %v2740_v0, %v2754_v5  ;;  %v2835_v5 = vshll.u32 %v2726_v26, 16  ;;  %v8968_v26 = vld [vmem:[%s11103_s4 + $0x444] ss:$8 sps:$4 sm:$0xff]  }
 0x191   : > { %2633 = vmatmul.mubr.bf16.gmra.mrb[20].mxu1 %v8882_v3  ;;  %v2798_v3 = vshrl.u32 %v2721_v61, 16 }
 0x192   : > { %2957 = vmatpush1.bf16.msra.mxu1 %v8879_v55  ;;  %2642 = vmatprep.mubr.bf16.mxu1 %v9250_v2  ;;  %v2776_v55 = vor.u32 %v2775_v46, %v2772_v41  ;;  %v2817_v46 = vrot.slane %v2815_v31, 5  ;;  %v2837_v13 = vrot.slane %v2835_v5, 5  ;;  %v8938_v31 = vld [vmem:[%s11103_s4 + $0x3c0] ss:$8 sps:$4 sm:$0xff]  }
 0x193   : > { %2958 = vmatprep.subr.bf16.mxu1 %v8885_v6  ;;  %v2801_v6 = vshll.u32 %v2721_v61, 16  ;;  %v2800_v42 = vrot.slane %v2798_v3, 4  ;;  %v8992_v3 = vld [vmem:[%s11104_s5 + $0x70] sm:$0xff]  }
 0x194   : > { %v2777_v20 = vrot.slane %v2776_v55, 4  ;;  %v8991_v55 = vld [vmem:[%s11104_s5 + $0x28] sm:$0xff]  }
 0x195   : > { %v2803_v23 = vrot.slane %v2801_v6, 5  ;;  %v8912_v6 = vld [vmem:[%s11103_s4 + $0x340] ss:$8 sps:$4 sm:$0xff]  }
 0x196   : > { %2959 = vmatpush1.bf16.msra.mxu1 %v8883_v11  ;;  %v8984_v11 = vld [vmem:[%s11104_s5 + $0x50] sm:$0xff]   ;;  %v2782_v38 = vsel %vm9827_vm7, %v2777_v20, %v2781_v22 }
 0x197   : > { %2960 = vmatprep.subr.bf16.mxu1 %v8888_v52  ;;  %v8905_v52 = vld [vmem:[%s11103_s4 + $0x314] ss:$8 sps:$4 sm:$0xff]   ;;  %8323 = vmatprep.subr.bf16.mxu0 %v8984_v11  ;;  %v2804_v39 = vor.u32 %v2803_v23, %v2800_v42  ;;  %v7770_v19 = vcombine.low %v2768_v28, %v2782_v38  ;;  %v8921_v42 = vld [vmem:[%s11103_s4 + $0x370] ss:$8 sps:$4 sm:$0xff]   ;;  %v8926_v23 = vld [vmem:[%s11103_s4 + $0x384] ss:$8 sps:$4 sm:$0xff]  }
 0x198   : > { %8324 = vmatpush3.bf16.msra.mxu0 %v8985_v24  ;;  %v8923_v22 = vld [vmem:[%s11103_s4 + $0x374] ss:$8 sps:$4 sm:$0xff]   ;;  %v8924_v24 = vld [vmem:[%s11103_s4 + $0x380] ss:$8 sps:$4 sm:$0xff]   ;;  %v8933_v28 = vld [vmem:[%s11103_s4 + $0x3a4] ss:$8 sps:$4 sm:$0xff]  }
 0x199   : > { %2643 = vmatmul.mubr.bf16.gmra.mrb[24].mxu1 %v8889_v16  ;;  %v2789_v16 = vrot.slane %v2787_v40, 5  ;;  %8325 = vmatprep.subr.bf16.mxu0 %v8986_v62  ;;  %v2805_v41 = vrot.slane %v2804_v39, 4  ;;  %v8930_v62 = vld [vmem:[%s11103_s4 + $0x394] ss:$8 sps:$4 sm:$0xff]   ;;  %v8941_v38 = vld [vmem:[#allocation2 + $0x28] ss:$8 sps:$4 sm:$0xff]  }
 0x19a   : > { %2961 = vmatpush1.bf16.msra.mxu1 %v8886_v15  ;;  %2652 = vmatprep.mubr.bf16.mxu1 %v9250_v2  ;;  %v2722_v15 = vld [vmem:[#allocation2 + $0xbc] sm:$0x1] }
 0x19b   : > { %2962 = vmatprep.subr.bf16.mxu1 %v8892_v57  ;;  %v2786_v57 = vrot.slane %v2784_v34, 4  ;;  %v2807_v35 = vshll.u32 %v2722_v15, 16  ;;  %v2818_v34 = vor.u32 %v2817_v46, %v2814_v45  ;;  %v8920_v15 = vld [vmem:[%s11103_s4 + $0x364] ss:$8 sps:$4 sm:$0xff]   ;;  %v8944_v39 = vld [vmem:[%s11103_s4 + $0x3d4] ss:$8 sps:$4 sm:$0xff]  }
 0x19c   : > { %v8961_v45 = vld [vmem:[%s11103_s4 + $0x424] ss:$8 sps:$4 sm:$0xff]   ;;  %v8962_v46 = vld [vmem:[#allocation2 + $0x60] ss:$8 sps:$4 sm:$0xff]  }
 0x19d   : > { %v2790_v32 = vor.u32 %v2789_v16, %v2786_v57  ;;  %v2809_v44 = vrot.slane %v2807_v35, 5  ;;  %v2819_v11 = vrot.slane %v2818_v34, 4  ;;  %v8935_v35 = vld [vmem:[%s11103_s4 + $0x3b0] ss:$8 sps:$4 sm:$0xff]  }
 0x19e   : > { %2963 = vmatpush1.bf16.msra.mxu1 %v8890_v25  ;;  %v8903_v25 = vld [vmem:[%s11103_s4 + $0x310] ss:$8 sps:$4 sm:$0xff]  }
 0x19f   : > { %2964 = vmatprep.subr.bf16.mxu1 %v8895_v47  ;;  %v8908_v47 = vld [vmem:[%s11103_s4 + $0x324] ss:$8 sps:$4 sm:$0xff]   ;;  %v2791_v27 = vrot.slane %v2790_v32, 4  ;;  %v2810_v1 = vsel %vm9827_vm7, %v2805_v41, %v2809_v44  ;;  %v8937_v32 = vld [vmem:[%s11103_s4 + $0x3b4] ss:$8 sps:$4 sm:$0xff]  }
 0x1a0   : > { %v8956_v44 = vld [vmem:[%s11103_s4 + $0x410] ss:$8 sps:$4 sm:$0xff]   ;;  %v8959_v41 = vld [vmem:[%s11103_s4 + $0x420] ss:$8 sps:$4 sm:$0xff]  }
 0x1a1   : > { %2653 = vmatmul.mubr.bf16.gmra.mrb[28].mxu1 %v8896_v43  ;;  %v2724_v43 = vld [vmem:[#allocation2 + $0xc4] sm:$0x1]  ;;  %v8969_v34 = vld [vmem:[#allocation2 + $0x70] ss:$8 sps:$4 sm:$0xff]  }
 0x1a2   : > { %2965 = vmatpush1.bf16.msra.mxu1 %v8893_v29  ;;  %2984 = vmatprep.mubr.bf16.mxu1 %v9250_v2  ;;  %v2826_v29 = vshrl.u32 %v2725_v58, 16  ;;  %v2821_v0 = vshll.u32 %v2724_v43, 16  ;;  %v8927_v58 = vld [vmem:[#allocation2 + $0x8] ss:$8 sps:$4 sm:$0xff]   ;;  %v8954_v43 = vld [vmem:[%s11103_s4 + $0x404] ss:$8 sps:$4 sm:$0xff]  }
 0x1a3   : > { %2966 = vmatprep.subr.bf16.mxu1 %v8899_v36  ;;  %v8987_v36 = vld [vmem:[%s11104_s5 + $0x18] sm:$0xff]  }
 0x1a4   : > { %v2828_v61 = vrot.slane %v2826_v29, 4  ;;  %8326 = vmatpush3.bf16.msra.mxu0 %v8987_v36  ;;  %v8942_v29 = vld [vmem:[%s11103_s4 + $0x3d0] ss:$8 sps:$4 sm:$0xff]   ;;  %v8945_v36 = vld [vmem:[%s11103_s4 + $0x3e0] ss:$8 sps:$4 sm:$0xff]  }
 0x1a5   : > { %8327 = vmatprep.subr.bf16.mxu0 %v8988_v60  ;;  %v8948_v60 = vld [vmem:[#allocation2 + $0x38] ss:$8 sps:$4 sm:$0xff]  }
 0x1a6   : > { %2967 = vmatpush1.bf16.msra.mxu1 %v8897_v54  ;;  %v8990_v54 = vld [vmem:[%s11104_s5 + $0x68] sm:$0xff]   ;;  %v2832_v40 = vor.u32 %v2831_v48, %v2828_v61  ;;  %v8965_v61 = vld [vmem:[%s11103_s4 + $0x434] ss:$8 sps:$4 sm:$0xff]   ;;  %v3575_v48 = vld [vmem:[#allocation2 + $0x10] sm:$0xf] }
 0x1a7   : > { %3202 = vmatprep.subr.bf16.mxu1 %v8902_v63  ;;  %v2796_v63 = vsel %vm9827_vm7, %v2791_v27, %v2795_v53  ;;  %v8949_v53 = vld [vmem:[%s11103_s4 + $0x3f0] ss:$8 sps:$4 sm:$0xff]   ;;  %v8958_v27 = vld [vmem:[%s11103_s4 + $0x414] ss:$8 sps:$4 sm:$0xff]  }
 0x1a8   : > { %8328 = vmatpush3.bf16.msra.mxu0 %v8989_v50  ;;  %v7771_v10 = vcombine.low %v2796_v63, %v2810_v1  ;;  %v2833_v7 = vrot.slane %v2832_v40, 4  ;;  %v8963_v50 = vld [vmem:[%s11103_s4 + $0x430] ss:$8 sps:$4 sm:$0xff]   ;;  %v8966_v63 = vld [vmem:[%s11103_s4 + $0x440] ss:$8 sps:$4 sm:$0xff]  }
 0x1a9   : > { %2985 = vmatmul.mubr.bf16.vlgmr.msra.gmra.mrb[16].mxu1 %v7769_v14  ;;  %8329 = vmatprep.subr.bf16.mxu0 %v8990_v54  ;;  %v8915_v14 = vld [vmem:[%s11103_s4 + $0x350] ss:$8 sps:$4 sm:$0xff]   ;;  %v3573_v54 = vld [vmem:[#allocation2 + $0x8] sm:$0xf]  ;;  %v8972_v40 = vld [vmem:[%s11103_s4 + $0x454] ss:$8 sps:$4 sm:$0xff]  }
 0x1aa   : > { %3203 = vmatpush1.bf16.msra.mxu1 %v8900_v51  ;;  %2994 = vmatprep.mubr.bf16.mxu1 %v9250_v2  ;;  %v8917_v51 = vld [vmem:[%s11103_s4 + $0x354] ss:$8 sps:$4 sm:$0xff]   ;;  %v2838_v16 = vsel %vm9827_vm7, %v2833_v7, %v2837_v13  ;;  %v3593_v1 = vshll.u32 %v3573_v54, 16  ;;  %v3574_v13 = vld [vmem:[#allocation2 + $0xc] sm:$0x1] }
 0x1ab   : > { %3204 = vmatprep.subr.bf16.mxu1 %v8905_v52  ;;  %v2823_v52 = vrot.slane %v2821_v0, 5  ;;  %v3590_v0 = vshrl.u32 %v3573_v54, 16  ;;  %v3576_v7 = vld [vmem:[#allocation2 + $0x14] sm:$0x1] }
 0x1ac   : > { %8330 = vmatpush3.bf16.msra.mxu0 %v8991_v55 }
 0x1ad   : > { %8331 = vmatprep.subr.bf16.mxu0 %v8992_v3  ;;  %v2824_v57 = vsel %vm9827_vm7, %v2819_v11, %v2823_v52  ;;  %v3579_v3 = vld [vmem:[#allocation2 + $0x20] sm:$0xf]  ;;  %v3577_v11 = vld [vmem:[#allocation2 + $0x18] sm:$0xf]  ;;  %v8975_v52 = vld [vmem:[%s11103_s4 + $0x464] ss:$8 sps:$4 sm:$0xff]  }
 0x1ae   : > { %3205 = vmatpush1.bf16.msra.mxu1 %v8903_v25  ;;  %v7772_v20 = vcombine.low %v2824_v57, %v2838_v16  ;;  %v8928_v25 = vld [vmem:[%s11103_s4 + $0x390] ss:$8 sps:$4 sm:$0xff]   ;;  %v3618_v57 = vshrl.u32 %v3577_v11, 16  ;;  %v3621_v16 = vshll.u32 %v3577_v11, 16 }
 0x1af   : > { %3206 = vmatprep.subr.bf16.mxu1 %v8908_v47  ;;  %v8934_v47 = vld [vmem:[#allocation2 + $0x18] ss:$8 sps:$4 sm:$0xff]  }
 0x1b0   : > { %8332 = vmatpush3.bf16.msra.mxu0 %v8993_v12 }
 0x1b1   : > { %2995 = vmatmul.mubr.bf16.gmra.mrb[20].mxu1 %v7770_v19  ;;  %v8952_v19 = vld [vmem:[%s11103_s4 + $0x400] ss:$8 sps:$4 sm:$0xff]  }
 0x1b2   : > { %3207 = vmatpush1.bf16.msra.mxu1 %v8906_v9  ;;  %3004 = vmatprep.mubr.bf16.mxu1 %v9250_v2  ;;  %v8951_v9 = vld [vmem:[%s11103_s4 + $0x3f4] ss:$8 sps:$4 sm:$0xff]  }
 0x1b3   : > { %3208 = vmatprep.subr.bf16.mxu1 %v8911_v18  ;;  %v8955_v18 = vld [vmem:[#allocation2 + $0x50] ss:$8 sps:$4 sm:$0xff]  }
 0x1b6   : > { %3209 = vmatpush1.bf16.msra.mxu1 %v8909_v56  ;;  %v3604_v56 = vshrl.u32 %v3575_v48, 16 }
 0x1b7   : > { %3210 = vmatprep.subr.bf16.mxu1 %v8914_v59  ;;  %v3607_v59 = vshll.u32 %v3575_v48, 16 }
 0x1b8   : > { %v3606_v5 = vrot.slane %v3604_v56, 4 }
 0x1b9   : > { %3005 = vmatmul.mubr.bf16.gmra.mrb[24].mxu1 %v7771_v10  ;;  %v3609_v55 = vrot.slane %v3607_v59, 5  ;;  %v3592_v10 = vrot.slane %v3590_v0, 4  ;;  %v3585_v0 = vld [vmem:[#allocation2 + $0x38] sm:$0xf] }
 0x1ba   : > { %3211 = vmatpush1.bf16.msra.mxu1 %v8912_v6  ;;  %3014 = vmatprep.mubr.bf16.mxu1 %v9250_v2  ;;  %v8970_v6 = vld [vmem:[%s11103_s4 + $0x450] ss:$8 sps:$4 sm:$0xff]   ;;  %v3677_v11 = vshll.u32 %v3585_v0, 16 }
 0x1bb   : > { %3212 = vmatprep.subr.bf16.mxu1 %v8917_v51  ;;  %v3595_v51 = vrot.slane %v3593_v1, 5  ;;  %v3610_v12 = vor.u32 %v3609_v55, %v3606_v5 }
 0x1be   : > { %3213 = vmatpush1.bf16.msra.mxu1 %v8915_v14  ;;  %v3632_v14 = vshrl.u32 %v3579_v3, 16 }
 0x1bf   : > { %3214 = vmatprep.subr.bf16.mxu1 %v8920_v15  ;;  %v3635_v15 = vshll.u32 %v3579_v3, 16  ;;  %v3582_v3 = vld [vmem:[#allocation2 + $0x2c] sm:$0x1] }
 0x1c1   : > { %3015 = vmatmul.mubr.bf16.gmra.mrb[28].mxu1 %v7772_v20  ;;  %v3596_v20 = vor.u32 %v3595_v51, %v3592_v10  ;;  %v3674_v51 = vshrl.u32 %v3585_v0, 16 }
 0x1c2   : > { %3215 = vmatpush1.bf16.msra.mxu1 %v8918_v17  ;;  %3234 = vmatprep.mubr.bf16.mxu1 %v9250_v2  ;;  %v8973_v17 = vld [vmem:[%s11103_s4 + $0x460] ss:$8 sps:$4 sm:$0xff]  }
 0x1c3   : > { %3216 = vmatprep.subr.bf16.mxu1 %v8923_v22  ;;  %v3613_v22 = vshll.u32 %v3576_v7, 16  ;;  %v3655_v7 = vshll.u32 %v3582_v3, 16  ;;  %v9001_v3 = vld [vmem:[%s11107_s8 + $0x14] ss:$8 sps:$4 sm:$0xff]  }
 0x1c6   : > { %3217 = vmatpush1.bf16.msra.mxu1 %v8921_v42  ;;  %v8976_v42 = vld [vmem:[#allocation2 + $0x80] ss:$8 sps:$4 sm:$0xff]  }
 0x1c7   : > { %3452 = vmatprep.subr.bf16.mxu1 %v8926_v23  ;;  %v8979_v23 = vld [vmem:[%s11103_s4 + $0x474] ss:$8 sps:$4 sm:$0xff]  }
 0x1c9   : > { %3235 = vmatmul.mubr.bf16.vlgmr.msra.gmra.mrb[16].mxu1 %v8927_v58  ;;  %v3611_v58 = vrot.slane %v3610_v12, 4 }
 0x1ca   : > { %3453 = vmatpush1.bf16.msra.mxu1 %v8924_v24  ;;  %3244 = vmatprep.mubr.bf16.mxu1 %v9250_v2  ;;  %v3599_v24 = vshll.u32 %v3574_v13, 16 }
 0x1cb   : > { %3454 = vmatprep.subr.bf16.mxu1 %v8930_v62  ;;  %v3634_v62 = vrot.slane %v3632_v14, 4 }
 0x1ce   : > { %3455 = vmatpush1.bf16.msra.mxu1 %v8928_v25  ;;  %v3637_v25 = vrot.slane %v3635_v15, 5 }
 0x1cf   : > { %3456 = vmatprep.subr.bf16.mxu1 %v8933_v28  ;;  %v3620_v28 = vrot.slane %v3618_v57, 4 }
 0x1d1   : > { %3245 = vmatmul.mubr.bf16.gmra.mrb[20].mxu1 %v8934_v47  ;;  %v3583_v47 = vld [vmem:[#allocation2 + $0x30] sm:$0xf] }
 0x1d2   : > { %3457 = vmatpush1.bf16.msra.mxu1 %v8931_v30  ;;  %3254 = vmatprep.mubr.bf16.mxu1 %v9250_v2  ;;  %v3623_v30 = vrot.slane %v3621_v16, 5  ;;  %v3676_v16 = vrot.slane %v3674_v51, 4  ;;  %v9004_v51 = vld [vmem:[%s11107_s8 + $0x24] ss:$8 sps:$4 sm:$0xff]  }
 0x1d3   : > { %3458 = vmatprep.subr.bf16.mxu1 %v8937_v32  ;;  %v8977_v32 = vld [vmem:[%s11103_s4 + $0x470] ss:$8 sps:$4 sm:$0xff]  }
 0x1d6   : > { %3459 = vmatpush1.bf16.msra.mxu1 %v8935_v35  ;;  %v3597_v35 = vrot.slane %v3596_v20, 4  ;;  %v3588_v20 = vld [vmem:[#allocation2 + $0x44] sm:$0x1] }
 0x1d7   : > { %3460 = vmatprep.subr.bf16.mxu1 %v8940_v37  ;;  %v3615_v37 = vrot.slane %v3613_v22, 5  ;;  %v3657_v22 = vrot.slane %v3655_v7, 5  ;;  %v9008_v7 = vld [vmem:[%s11107_s8 + $0x40] ss:$8 sps:$4 sm:$0xff]  }
 0x1d9   : > { %3255 = vmatmul.mubr.bf16.gmra.mrb[24].mxu1 %v8941_v38  ;;  %v3580_v38 = vld [vmem:[#allocation2 + $0x24] sm:$0x1] }
 0x1da   : > { %3461 = vmatpush1.bf16.msra.mxu1 %v8938_v31  ;;  %3264 = vmatprep.mubr.bf16.mxu1 %v9250_v2  ;;  %v3601_v31 = vrot.slane %v3599_v24, 5  ;;  %v3586_v24 = vld [vmem:[#allocation2 + $0x3c] sm:$0x1] }
 0x1db   : > { %3462 = vmatprep.subr.bf16.mxu1 %v8944_v39  ;;  %v3581_v39 = vld [vmem:[#allocation2 + $0x28] sm:$0xf] }
 0x1de   : > { %3463 = vmatpush1.bf16.msra.mxu1 %v8942_v29  ;;  %v3616_v29 = vsel %vm9827_vm7, %v3611_v58, %v3615_v37 }
 0x1df   : > { %3464 = vmatprep.subr.bf16.mxu1 %v8947_v49  ;;  %v3578_v49 = vld [vmem:[#allocation2 + $0x1c] sm:$0x1] }
 0x1e1   : > { %3265 = vmatmul.mubr.bf16.gmra.mrb[28].mxu1 %v8948_v60  ;;  %v3660_v60 = vshrl.u32 %v3583_v47, 16 }
 0x1e2   : > { %3465 = vmatpush1.bf16.msra.mxu1 %v8945_v36  ;;  %3484 = vmatprep.mubr.bf16.mxu1 %v9250_v2  ;;  %v3638_v36 = vor.u32 %v3637_v25, %v3634_v62  ;;  %v3697_v25 = vshll.u32 %v3588_v20, 16 }
 0x1e3   : > { %3466 = vmatprep.subr.bf16.mxu1 %v8951_v9  ;;  %v3663_v9 = vshll.u32 %v3583_v47, 16 }
 0x1e6   : > { %3467 = vmatpush1.bf16.msra.mxu1 %v8949_v53  ;;  %v3624_v53 = vor.u32 %v3623_v30, %v3620_v28  ;;  %v3683_v30 = vshll.u32 %v3586_v24, 16  ;;  %v10403_v24 = vld [vmem:[%s11105_s6] ss:$0 sm:$0xff] }
 0x1e7   : > { %3814 = vmatprep.subr.bf16.mxu1 %v8954_v43  ;;  %v3602_v43 = vsel %vm9827_vm7, %v3597_v35, %v3601_v31  ;;  %v3699_v35 = vrot.slane %v3697_v25, 5 }
 0x1e8   : > { %v3625_v48 = vrot.slane %v3624_v53, 4  ;;  %v3685_v37 = vrot.slane %v3683_v30, 5 }
 0x1e9   : > { %3485 = vmatmul.mubr.bf16.vlgmr.msra.gmra.mrb[16].mxu1 %v8955_v18  ;;  %v3646_v18 = vshrl.u32 %v3581_v39, 16 }
 0x1ea   : > { %3815 = vmatpush1.bf16.msra.mxu1 %v8952_v19  ;;  %3494 = vmatprep.mubr.bf16.mxu1 %v9250_v2  ;;  %v3641_v19 = vshll.u32 %v3580_v38, 16 }
 0x1eb   : > { %3816 = vmatprep.subr.bf16.mxu1 %v8958_v27  ;;  %v3649_v27 = vshll.u32 %v3581_v39, 16  ;;  %v3648_v54 = vrot.slane %v3646_v18, 4 }
 0x1ed   : > { %v3651_v56 = vrot.slane %v3649_v27, 5 }
 0x1ee   : > { %3817 = vmatpush1.bf16.msra.mxu1 %v8956_v44  ;;  %v7877_v44 = vcombine.low %v3602_v43, %v3616_v29  ;;  %v8994_v29 = vld [vmem:[%s11104_s5 + $0x78] sm:$0xff]  }
 0x1ef   : > { %3818 = vmatprep.subr.bf16.mxu1 %v8961_v45  ;;  %v3627_v45 = vshll.u32 %v3578_v49, 16  ;;  %v8995_v49 = vld [vmem:[%s11104_s5 + $0x38] sm:$0xff]   ;;  %8333 = vmatprep.subr.bf16.mxu0 %v8994_v29 }
 0x1f0   : > { %8334 = vmatpush3.bf16.msra.mxu0 %v8995_v49 }
 0x1f1   : > { %3495 = vmatmul.mubr.bf16.gmra.mrb[20].mxu1 %v8962_v46  ;;  %v3662_v46 = vrot.slane %v3660_v60, 4  ;;  %v3629_v59 = vrot.slane %v3627_v45, 5 }
 0x1f2   : > { %3819 = vmatpush1.bf16.msra.mxu1 %v8959_v41  ;;  %3504 = vmatprep.mubr.bf16.mxu1 %v9250_v2  ;;  %v3639_v41 = vrot.slane %v3638_v36, 4 }
 0x1f3   : > { %3820 = vmatprep.subr.bf16.mxu1 %v8965_v61  ;;  %v3665_v61 = vrot.slane %v3663_v9, 5  ;;  %v3630_v55 = vsel %vm9827_vm7, %v3625_v48, %v3629_v59 }
 0x1f6   : > { %3821 = vmatpush1.bf16.msra.mxu1 %v8963_v50  ;;  %v3587_v50 = vld [vmem:[#allocation2 + $0x40] sm:$0xf] }
 0x1f7   : > { %3822 = vmatprep.subr.bf16.mxu1 %v8968_v26  ;;  %v3643_v26 = vrot.slane %v3641_v19, 5  ;;  %v3691_v5 = vshll.u32 %v3587_v50, 16 }
 0x1f9   : > { %3505 = vmatmul.mubr.bf16.gmra.mrb[24].mxu1 %v8969_v34  ;;  %v3644_v1 = vsel %vm9827_vm7, %v3639_v41, %v3643_v26  ;;  %v3666_v34 = vor.u32 %v3665_v61, %v3662_v46  ;;  %v3693_v14 = vrot.slane %v3691_v5, 5  ;;  %v8996_v5 = vld [vmem:[%s11107_s8] ss:$8 sps:$4 sm:$0xff]  }
 0x1fa   : > { %3823 = vmatpush1.bf16.msra.mxu1 %v8966_v63  ;;  %3514 = vmatprep.mubr.bf16.mxu1 %v9250_v2  ;;  %v3584_v63 = vld [vmem:[#allocation2 + $0x34] sm:$0x1] }
 0x1fb   : > { %3824 = vmatprep.subr.bf16.mxu1 %v8972_v40  ;;  %v3688_v40 = vshrl.u32 %v3587_v50, 16  ;;  %v3669_v10 = vshll.u32 %v3584_v63, 16  ;;  %v3667_v13 = vrot.slane %v3666_v34, 4 }
 0x1fd   : > { %v3690_v12 = vrot.slane %v3688_v40, 4  ;;  %v3671_v57 = vrot.slane %v3669_v10, 5  ;;  %v9002_v10 = vld [vmem:[%s11107_s8 + $0x20] ss:$8 sps:$4 sm:$0xff]  }
 0x1fe   : > { %3825 = vmatpush1.bf16.msra.mxu1 %v8970_v6  ;;  %v3652_v6 = vor.u32 %v3651_v56, %v3648_v54 }
 0x1ff   : > { %3826 = vmatprep.subr.bf16.mxu1 %v8975_v52  ;;  %v7878_v52 = vcombine.low %v3630_v55, %v3644_v1  ;;  %v8998_v55 = vld [vmem:[%s11107_s8 + $0x4] ss:$8 sps:$4 sm:$0xff]  }
 0x200   : > { %v3653_v15 = vrot.slane %v3652_v6, 4  ;;  %4621 = vmatprep.subr.bf16.mxu0 %v8998_v55  ;;  %v8999_v6 = vld [vmem:[%s11107_s8 + $0x10] ss:$8 sps:$4 sm:$0xff]  }
 0x201   : > { %3515 = vmatmul.mubr.bf16.gmra.mrb[28].mxu1 %v8976_v42  ;;  %v3672_v42 = vsel %vm9827_vm7, %v3667_v13, %v3671_v57  ;;  %v9010_v13 = vld [vmem:[%s11107_s8 + $0x44] ss:$8 sps:$4 sm:$0xff]  }
 0x202   : > { %3827 = vmatpush1.bf16.msra.mxu1 %v8973_v17  ;;  %3846 = vmatprep.mubr.bf16.mxu1 %v9250_v2  ;;  %v3679_v17 = vrot.slane %v3677_v11, 5  ;;  %v3658_v58 = vsel %vm9827_vm7, %v3653_v15, %v3657_v22  ;;  %v9007_v11 = vld [vmem:[%s11107_s8 + $0x34] ss:$8 sps:$4 sm:$0xff]   ;;  %v9014_v15 = vld [vmem:[%s11107_s8 + $0x60] ss:$8 sps:$4 sm:$0xff]  }
 0x203   : > { %3828 = vmatprep.subr.bf16.mxu1 %v8979_v23  ;;  %v3694_v23 = vor.u32 %v3693_v14, %v3690_v12  ;;  %v7879_v28 = vcombine.low %v3658_v58, %v3672_v42  ;;  %v9013_v12 = vld [vmem:[%s11107_s8 + $0x54] ss:$8 sps:$4 sm:$0xff]   ;;  %v9011_v14 = vld [vmem:[%s11107_s8 + $0x50] ss:$8 sps:$4 sm:$0xff]   ;;  %v9016_v57 = vld [vmem:[%s11107_s8 + $0x64] ss:$8 sps:$4 sm:$0xff]  }
 0x204   : > { %v3680_v62 = vor.u32 %v3679_v17, %v3676_v16  ;;  %v9019_v16 = vld [vmem:[%s11107_s8 + $0x74] ss:$8 sps:$4 sm:$0xff]   ;;  %v4356_v17 = vld [vmem:[#allocation3] sm:$0x1]  ;;  %v9017_v22 = vld [vmem:[%s11107_s8 + $0x70] ss:$8 sps:$4 sm:$0xff]  }
 0x205   : > { %v3695_v47 = vrot.slane %v3694_v23, 4  ;;  %v4357_v20 = vsel %vm9427_vm5, 0, %v4356_v17  ;;  %v9022_v42 = vld [vmem:[%s11107_s8 + $0x84] ss:$8 sps:$4 sm:$0xff]  }
 0x206   : > { %3829 = vmatpush1.bf16.msra.mxu1 %v8977_v32  ;;  %v3681_v32 = vrot.slane %v3680_v62, 4  ;;  %4358 = vst [vmem:[#allocation3] sm:$0x1] %v4357_v20 }
 0x207   : > { %v3700_v31 = vsel %vm9827_vm7, %v3695_v47, %v3699_v35 }
 0x208   : > { %v3686_v38 = vsel %vm9827_vm7, %v3681_v32, %v3685_v37 }
 0x209   : > { %3847 = vmatmul.mubr.bf16.vlgmr.msra.gmra.mrb[16].mxu1 %v7877_v44  ;;  %v7880_v39 = vcombine.low %v3686_v38, %v3700_v31 }
 0x20a   : > { %3856 = vmatprep.mubr.bf16.mxu1 %v9250_v2 }
 0x211   : > { %3857 = vmatmul.mubr.bf16.gmra.mrb[20].mxu1 %v7878_v52  ;;  %v9005_v52 = vld [vmem:[%s11107_s8 + $0x30] ss:$8 sps:$4 sm:$0xff]  }
 0x212   : > { %3866 = vmatprep.mubr.bf16.mxu1 %v9250_v2 }
 0x219   : > { %3867 = vmatmul.mubr.bf16.gmra.mrb[24].mxu1 %v7879_v28  ;;  %v10408_v28 = vld [vmem:[%s11106_s7] ss:$0 sm:$0xff] }
 0x21a   : > { %3876 = vmatprep.mubr.bf16.mxu1 %v9250_v2 }
 0x221   : > { %3877 = vmatmul.mubr.bf16.gmra.mrb[28].mxu1 %v7880_v39 }
 0x2dc   : > { %v10298_v36 = vpop.f32.mrb[16].mxu1 }
 0x2dd   : > { %v10300_v60 = vpop.f32.mrb[17].mxu1 }
 0x2de   : > { %v10302_v9 = vpop.f32.mrb[18].mxu1 }
 0x2df   : > { %v3951_v53 = vpack.c.bf16 %v10302_v9, %v10298_v36  ;;  %v10306_v43 = vpop.f32.mrb[19].mxu1 }
 0x2e0   : > { %v3952_v19 = vpack.c.bf16 %v10306_v43, %v10300_v60 }
 0x2e2   : > { %4126 = vmatprep.mubr.bf16.mxu0 %v3952_v19 }
 0x2e3   : > { %4127 = vmatmul.mubr.bf16.vlgmr.msra.gmra.mrb[16].mxu0 %v3951_v53 }
 0x2e4   : > { %v10310_v18 = vpop.f32.mrb[20].mxu1  ;;  %4622 = vmatpush1.bf16.msra.mxu0 %v8996_v5 }
 0x2e5   : > { %v10312_v27 = vpop.f32.mrb[21].mxu1  ;;  %4623 = vmatprep.subr.bf16.mxu0 %v9001_v3 }
 0x2e6   : > { %v10314_v44 = vpop.f32.mrb[22].mxu1 }
 0x2e7   : > { %v3953_v45 = vpack.c.bf16 %v10314_v44, %v10310_v18  ;;  %v10318_v41 = vpop.f32.mrb[23].mxu1 }
 0x2e8   : > { %v3954_v46 = vpack.c.bf16 %v10318_v41, %v10312_v27  ;;  %4624 = vmatpush1.bf16.msra.mxu0 %v8999_v6  ;;  %v4303_v6 = vld [vmem:[#allocation3 + $0x8] sm:$0xf] }
 0x2e9   : > { %4625 = vmatprep.subr.bf16.mxu0 %v9004_v51 }
 0x2ea   : > { %4134 = vmatprep.mubr.bf16.mxu0 %v3954_v46 }
 0x2eb   : > { %4135 = vmatmul.mubr.bf16.gmra.mrb[20].mxu0 %v3953_v45 }
 0x2ec   : > { %v10322_v61 = vpop.f32.mrb[24].mxu1  ;;  %4626 = vmatpush1.bf16.msra.mxu0 %v9002_v10  ;;  %v4306_v10 = vld [vmem:[#allocation3 + $0xc] sm:$0x1] }
 0x2ed   : > { %v10324_v48 = vpop.f32.mrb[25].mxu1  ;;  %4627 = vmatprep.subr.bf16.mxu0 %v9007_v11 }
 0x2ee   : > { %v10326_v50 = vpop.f32.mrb[26].mxu1 }
 0x2ef   : > { %v3955_v26 = vpack.c.bf16 %v10326_v50, %v10322_v61  ;;  %v10330_v54 = vpop.f32.mrb[27].mxu1 }
 0x2f0   : > { %v3956_v56 = vpack.c.bf16 %v10330_v54, %v10324_v48  ;;  %4628 = vmatpush1.bf16.msra.mxu0 %v9005_v52 }
 0x2f1   : > { %4629 = vmatprep.subr.bf16.mxu0 %v9010_v13 }
 0x2f2   : > { %4142 = vmatprep.mubr.bf16.mxu0 %v3956_v56 }
 0x2f3   : > { %4143 = vmatmul.mubr.bf16.gmra.mrb[24].mxu0 %v3955_v26 }
 0x2f4   : > { %v10334_v59 = vpop.f32.mrb[28].mxu1  ;;  %4630 = vmatpush1.bf16.msra.mxu0 %v9008_v7 }
 0x2f5   : > { %v10336_v63 = vpop.f32.mrb[29].mxu1  ;;  %4631 = vmatprep.subr.bf16.mxu0 %v9013_v12 }
 0x2f6   : > { %v10338_v0 = vpop.f32.mrb[30].mxu1 }
 0x2f7   : > { %v3957_v1 = vpack.c.bf16 %v10338_v0, %v10334_v59  ;;  %v10342_v34 = vpop.f32.mrb[31].mxu1 }
 0x2f8   : > { %v3958_v40 = vpack.c.bf16 %v10342_v34, %v10336_v63  ;;  %4632 = vmatpush1.bf16.msra.mxu0 %v9011_v14  ;;  %v4309_v14 = vld [vmem:[#allocation3 + $0x10] sm:$0xf] }
 0x2f9   : > { %4633 = vmatprep.subr.bf16.mxu0 %v9016_v57 }
 0x2fa   : > { %4150 = vmatprep.mubr.bf16.mxu0 %v3958_v40 }
 0x2fb   : > { %4151 = vmatmul.mubr.bf16.gmra.mrb[28].mxu0 %v3957_v1 }
 0x2fc   : > { %4653 = vmatprep.mubr.bf16.mxu0 %v9250_v2  ;;  %4634 = vmatpush1.bf16.msra.mxu0 %v9014_v15  ;;  %v4312_v15 = vld [vmem:[#allocation3 + $0x14] sm:$0x1] }
 0x2fd   : > { %4635 = vmatprep.subr.bf16.mxu0 %v9019_v16 }
 0x300   : > { %4636 = vmatpush1.bf16.msra.mxu0 %v9017_v22 }
 0x301   : > { %4983 = vmatprep.subr.bf16.mxu0 %v9022_v42 }
 0x3b6   : > { %v8335_v23 = vpop.f32.mrb[16].mxu0 }
 0x3b7   : > { %v8336_v58 = vpop.f32.mrb[17].mxu0 }
 0x3b8   : > { %v8337_v62 = vadd.f32 %v8336_v58, %v8335_v23  ;;  %v8338_v25 = vpop.f32.mrb[18].mxu0 }
 0x3b9   : > { %v8339_v30 = vpop.f32.mrb[19].mxu0 }
 0x3ba   : > { %v4129_v47 = vadd.f32 %v8337_v62, %v10403_v24  ;;  %v8340_v32 = vadd.f32 %v8339_v30, %v8338_v25 }
 0x3bc   : > { %vm4160_vm1 = vcmp.gt.f32.partialorder %v4129_v47, 0.0  ;;  %v4174_v35 = vmul.f32 %v10408_v28, %v4129_v47  ;;  %v4132_v37 = vadd.f32 %v8340_v32, %v10403_v24 }
 0x3be   : > { %v4182_v31 = vsel %vm4160_vm1, %v4129_v47, %v4174_v35  ;;  %vm4161_vm3 = vcmp.gt.f32.partialorder %v4132_v37, 0.0  ;;  %v4175_v38 = vmul.f32 %v10408_v28, %v4132_v37  ;;  %v8341_v39 = vpop.f32.mrb[20].mxu0 }
 0x3bf   : > { %v8293_v29 = vpack.c.bf16 %v4182_v31, %v4182_v31  ;;  %v8342_v49 = vpop.f32.mrb[21].mxu0 }
 0x3c0   : > { %v4183_v53 = vsel %vm4161_vm3, %v4132_v37, %v4175_v38  ;;  %v8343_v19 = vadd.f32 %v8342_v49, %v8341_v39  ;;  %v8344_v45 = vpop.f32.mrb[22].mxu0 }
 0x3c1   : > { %v4223_v46 = vshrl.u32 %v8293_v29, 16  ;;  %v8294_v26 = vpack.c.bf16 %v4183_v53, %v4183_v53  ;;  %v8345_v56 = vpop.f32.mrb[23].mxu0  ;;  %v4226_v55 = vshll.u32 %v8293_v29, 16  ;;  %v4315_v53 = vld [vmem:[#allocation3 + $0x18] sm:$0xf] }
 0x3c2   : > { %v4137_v1 = vadd.f32 %v8343_v19, %v10403_v24  ;;  %v8346_v40 = vadd.f32 %v8345_v56, %v8344_v45 }
 0x3c3   : > { %v4225_v5 = vrot.slane %v4223_v46, 7  ;;  %v4231_v3 = vshrl.u32 %v8294_v26, 16  ;;  %v4234_v12 = vshll.u32 %v8294_v26, 16  ;;  %v4318_v46 = vld [vmem:[#allocation3 + $0x1c] sm:$0x1] }
 0x3c4   : > { %vm4162_vm4 = vcmp.gt.f32.partialorder %v4137_v1, 0.0  ;;  %v4176_v51 = vmul.f32 %v10408_v28, %v4137_v1  ;;  %v4140_v11 = vadd.f32 %v8346_v40, %v10403_v24 }
 0x3c5   : > { %v4228_v52 = vor.u32 %v4226_v55, %v4225_v5  ;;  %v4229_v7 = vrot.slane %v4225_v5, 4  ;;  %v4233_v13 = vrot.slane %v4231_v3, 7  ;;  %v4321_v55 = vld [vmem:[#allocation3 + $0x20] sm:$0xf] }
 0x3c6   : > { %v4184_v57 = vsel %vm4162_vm4, %v4137_v1, %v4176_v51  ;;  %vm4163_vm6 = vcmp.gt.f32.partialorder %v4140_v11, 0.0  ;;  %v4177_v16 = vmul.f32 %v10408_v28, %v4140_v11  ;;  %v8347_v17 = vpop.f32.mrb[24].mxu0  ;;  %v4383_v1 = vld [vmem:[#allocation3 + $0x48] sm:$0x1]  ;;  %v4324_v51 = vld [vmem:[#allocation3 + $0x24] sm:$0x1] }
 0x3c7   : > { %v4304_v20 = vsel %vm9532_vm11, %v4228_v52, %v4303_v6  ;;  %v4307_v22 = vsel %vm9427_vm5, %v4229_v7, %v4306_v10  ;;  %v4236_v42 = vor.u32 %v4234_v12, %v4233_v13  ;;  %v4237_v23 = vrot.slane %v4233_v13, 4  ;;  %v8348_v58 = vpop.f32.mrb[25].mxu0 }
 0x3c8   : > { %4305 = vst [vmem:[#allocation3 + $0x8] sm:$0xf] %v4304_v20  ;;  %4308 = vst [vmem:[#allocation3 + $0xc] sm:$0x1] %v4307_v22  ;;  %v8295_v62 = vpack.c.bf16 %v4184_v57, %v4184_v57  ;;  %v4185_v25 = vsel %vm4163_vm6, %v4140_v11, %v4177_v16  ;;  %v8349_v30 = vadd.f32 %v8348_v58, %v8347_v17  ;;  %v8350_v47 = vpop.f32.mrb[26].mxu0  ;;  %v4384_v3 = vsel %vm9427_vm5, 0, %v4383_v1 }
 0x3c9   : > { %v4310_v32 = vsel %vm9532_vm11, %v4236_v42, %v4309_v14  ;;  %v4313_v35 = vsel %vm9427_vm5, %v4237_v23, %v4312_v15  ;;  %v8296_v37 = vpack.c.bf16 %v4185_v25, %v4185_v25  ;;  %v8351_v31 = vpop.f32.mrb[27].mxu0  ;;  %4385 = vst [vmem:[#allocation3 + $0x48] sm:$0x1] %v4384_v3 }
 0x3ca   : > { %4311 = vst [vmem:[#allocation3 + $0x10] sm:$0xf] %v4310_v32  ;;  %4314 = vst [vmem:[#allocation3 + $0x14] sm:$0x1] %v4313_v35  ;;  %v4239_v38 = vshrl.u32 %v8295_v62, 16  ;;  %v4145_v39 = vadd.f32 %v8349_v30, %v10403_v24  ;;  %v8352_v29 = vadd.f32 %v8351_v31, %v8350_v47  ;;  %v4242_v49 = vshll.u32 %v8295_v62, 16 }
 0x3cb   : > { %v4247_v19 = vshrl.u32 %v8296_v37, 16  ;;  %v4250_v5 = vshll.u32 %v8296_v37, 16 }
 0x3cc   : > { %v4241_v45 = vrot.slane %v4239_v38, 7  ;;  %vm4164_vm8 = vcmp.gt.f32.partialorder %v4145_v39, 0.0  ;;  %v4178_v26 = vmul.f32 %v10408_v28, %v4145_v39  ;;  %v4148_v56 = vadd.f32 %v8352_v29, %v10403_v24 }
 0x3cd   : > { %v4249_v40 = vrot.slane %v4247_v19, 7  ;;  %v4327_v19 = vld [vmem:[#allocation3 + $0x28] sm:$0xf] }
 0x3ce   : > { %v4244_v6 = vor.u32 %v4242_v49, %v4241_v45  ;;  %v4245_v10 = vrot.slane %v4241_v45, 4  ;;  %v4186_v11 = vsel %vm4164_vm8, %v4145_v39, %v4178_v26  ;;  %vm4165_vm9 = vcmp.gt.f32.partialorder %v4148_v56, 0.0  ;;  %v8353_v52 = vpop.f32.mrb[28].mxu0  ;;  %v4330_v45 = vld [vmem:[#allocation3 + $0x2c] sm:$0x1] }
 0x3cf   : > { %v4359_v7 = vld [vmem:[#allocation3 + $0x8] sm:$0x1]  ;;  %v4390_v13 = vld [vmem:[#allocation3 + $0xc] sm:$0x1]  ;;  %v4252_v12 = vor.u32 %v4250_v5, %v4249_v40  ;;  %v4253_v14 = vrot.slane %v4249_v40, 4  ;;  %v8297_v15 = vpack.c.bf16 %v4186_v11, %v4186_v11  ;;  %v4179_v57 = vmul.f32 %v10408_v28, %v4148_v56  ;;  %v8354_v16 = vpop.f32.mrb[29].mxu0 }
 0x3d0   : > { %v4360_v17 = vsel %vm9427_vm5, 0, %v4359_v7  ;;  %v4391_v20 = vsel %vm9355_vm2, 0, %v4390_v13  ;;  %v4316_v22 = vsel %vm9532_vm11, %v4244_v6, %v4315_v53  ;;  %v4319_v42 = vsel %vm9427_vm5, %v4245_v10, %v4318_v46  ;;  %v8356_v23 = vpop.f32.mrb[30].mxu0  ;;  %v4333_v5 = vld [vmem:[#allocation3 + $0x30] sm:$0xf] }
 0x3d1   : > { %4361 = vst [vmem:[#allocation3 + $0x8] sm:$0x1] %v4360_v17  ;;  %4392 = vst [vmem:[#allocation3 + $0xc] sm:$0x1] %v4391_v20  ;;  %v4362_v58 = vld [vmem:[#allocation3 + $0x10] sm:$0x1]  ;;  %v4322_v25 = vsel %vm9532_vm11, %v4252_v12, %v4321_v55  ;;  %v4325_v30 = vsel %vm9427_vm5, %v4253_v14, %v4324_v51  ;;  %v4187_v37 = vsel %vm4165_vm9, %v4148_v56, %v4179_v57 }
 0x3d2   : > { %v4393_v62 = vld [vmem:[#allocation3 + $0x14] sm:$0x1]  ;;  %4317 = vst [vmem:[#allocation3 + $0x18] sm:$0xf] %v4316_v22  ;;  %4320 = vst [vmem:[#allocation3 + $0x1c] sm:$0x1] %v4319_v42  ;;  %v8355_v31 = vadd.f32 %v8354_v16, %v8353_v52  ;;  %v8298_v49 = vpack.c.bf16 %v4187_v37, %v4187_v37 }
 0x3d3   : > { %v4255_v47 = vshrl.u32 %v8297_v15, 16  ;;  %v4363_v32 = vsel %vm9427_vm5, 0, %v4362_v58  ;;  %v4394_v35 = vsel %vm9355_vm2, 0, %v4393_v62  ;;  %4323 = vst [vmem:[#allocation3 + $0x20] sm:$0xf] %v4322_v25  ;;  %v8357_v38 = vpop.f32.mrb[31].mxu0 }
 0x3d4   : > { %4326 = vst [vmem:[#allocation3 + $0x24] sm:$0x1] %v4325_v30  ;;  %4364 = vst [vmem:[#allocation3 + $0x10] sm:$0x1] %v4363_v32  ;;  %v4258_v29 = vshll.u32 %v8297_v15, 16  ;;  %v8358_v53 = vadd.f32 %v8357_v38, %v8356_v23  ;;  %v4153_v46 = vadd.f32 %v8355_v31, %v10403_v24  ;;  %v4263_v40 = vshrl.u32 %v8298_v49, 16 }
 0x3d5   : > { %4395 = vst [vmem:[#allocation3 + $0x14] sm:$0x1] %v4394_v35  ;;  %v4257_v39 = vrot.slane %v4255_v47, 7  ;;  %v4266_v51 = vshll.u32 %v8298_v49, 16  ;;  %v4336_v11 = vld [vmem:[#allocation3 + $0x34] sm:$0x1] }
 0x3d6   : > { %vm4166_vm10 = vcmp.gt.f32.partialorder %v4153_v46, 0.0  ;;  %v4180_v55 = vmul.f32 %v10408_v28, %v4153_v46  ;;  %v4156_v56 = vadd.f32 %v8358_v53, %v10403_v24  ;;  %v4265_v10 = vrot.slane %v4263_v40, 7  ;;  %v9020_v24 = vld [vmem:[%s11107_s8 + $0x80] ss:$8 sps:$4 sm:$0xff]   ;;  %v9026_v22 = vld [vmem:[%s11107_s8 + $0x94] ss:$8 sps:$4 sm:$0xff]  }
 0x3d7   : > { %v4260_v26 = vor.u32 %v4258_v29, %v4257_v39  ;;  %v4261_v1 = vrot.slane %v4257_v39, 4  ;;  %v4339_v35 = vld [vmem:[#allocation3 + $0x38] sm:$0xf]  ;;  %v4342_v38 = vld [vmem:[#allocation3 + $0x3c] sm:$0x1] }
 0x3d8   : > { %v4188_v13 = vsel %vm4166_vm10, %v4153_v46, %v4180_v55  ;;  %vm4167_vm12 = vcmp.gt.f32.partialorder %v4156_v56, 0.0  ;;  %v4181_v12 = vmul.f32 %v10408_v28, %v4156_v56  ;;  %v4268_v17 = vor.u32 %v4266_v51, %v4265_v10  ;;  %v9023_v47 = vld [vmem:[#allocation3] ss:$8 sps:$4 sm:$0xff]   ;;  %v9024_v49 = vld [vmem:[%s11107_s8 + $0x90] ss:$8 sps:$4 sm:$0xff]  }
 0x3d9   : > { %v4328_v3 = vsel %vm9532_vm11, %v4260_v26, %v4327_v19  ;;  %v4331_v6 = vsel %vm9427_vm5, %v4261_v1, %v4330_v45  ;;  %v4365_v52 = vld [vmem:[#allocation3 + $0x18] sm:$0x1]  ;;  %v4396_v7 = vld [vmem:[#allocation3 + $0x1c] sm:$0x1]  ;;  %v8299_v20 = vpack.c.bf16 %v4188_v13, %v4188_v13  ;;  %v4269_v23 = vrot.slane %v4265_v10, 4  ;;  %4654 = vmatmul.mubr.bf16.vlgmr.msra.gmra.mrb[32].mxu0 %v9023_v47 }
 0x3da   : > { %4329 = vst [vmem:[#allocation3 + $0x28] sm:$0xf] %v4328_v3  ;;  %4332 = vst [vmem:[#allocation3 + $0x2c] sm:$0x1] %v4331_v6  ;;  %v4366_v14 = vsel %vm9427_vm5, 0, %v4365_v52  ;;  %v4397_v15 = vsel %vm9355_vm2, 0, %v4396_v7  ;;  %v4189_v58 = vsel %vm4167_vm12, %v4156_v56, %v4181_v12  ;;  %v4334_v62 = vsel %vm9532_vm11, %v4268_v17, %v4333_v5  ;;  %4984 = vmatpush1.bf16.msra.mxu0 %v9020_v24 }
 0x3db   : > { %v4368_v57 = vld [vmem:[#allocation3 + $0x20] sm:$0x1]  ;;  %v4399_v16 = vld [vmem:[#allocation3 + $0x24] sm:$0x1]  ;;  %4367 = vst [vmem:[#allocation3 + $0x18] sm:$0x1] %v4366_v14  ;;  %v8300_v30 = vpack.c.bf16 %v4189_v58, %v4189_v58  ;;  %v4337_v32 = vsel %vm9427_vm5, %v4269_v23, %v4336_v11  ;;  %4663 = vmatprep.mubr.bf16.mxu0 %v9250_v2  ;;  %4985 = vmatprep.subr.bf16.mxu0 %v9026_v22 }
 0x3dc   : > { %4398 = vst [vmem:[#allocation3 + $0x1c] sm:$0x1] %v4397_v15  ;;  %v4369_v28 = vsel %vm9427_vm5, 0, %v4368_v57  ;;  %v4400_v42 = vsel %vm9355_vm2, 0, %v4399_v16  ;;  %v4271_v25 = vshrl.u32 %v8299_v20, 16  ;;  %v4274_v31 = vshll.u32 %v8299_v20, 16 }
 0x3dd   : > { %4370 = vst [vmem:[#allocation3 + $0x20] sm:$0x1] %v4369_v28  ;;  %4401 = vst [vmem:[#allocation3 + $0x24] sm:$0x1] %v4400_v42  ;;  %v4279_v39 = vshrl.u32 %v8300_v30, 16  ;;  %v4282_v29 = vshll.u32 %v8300_v30, 16 }
 0x3de   : > { %4335 = vst [vmem:[#allocation3 + $0x30] sm:$0xf] %v4334_v62  ;;  %4338 = vst [vmem:[#allocation3 + $0x34] sm:$0x1] %v4337_v32  ;;  %v4273_v37 = vrot.slane %v4271_v25, 7  ;;  %4986 = vmatpush1.bf16.msra.mxu0 %v9024_v49 }
 0x3df   : > { %v9029_v53 = vld [vmem:[%s11107_s8 + $0xa4] ss:$8 sps:$4 sm:$0xff]   ;;  %v4281_v1 = vrot.slane %v4279_v39, 7  ;;  %v4345_v55 = vld [vmem:[#allocation3 + $0x40] sm:$0xf] }
 0x3e0   : > { %v4276_v46 = vor.u32 %v4274_v31, %v4273_v37  ;;  %v4277_v26 = vrot.slane %v4273_v37, 4  ;;  %v4348_v56 = vld [vmem:[#allocation3 + $0x44] sm:$0x1]  ;;  %v9027_v52 = vld [vmem:[%s11107_s8 + $0xa0] ss:$8 sps:$4 sm:$0xff]   ;;  %4987 = vmatprep.subr.bf16.mxu0 %v9029_v53 }
 0x3e1   : > { %v4371_v19 = vld [vmem:[#allocation3 + $0x28] sm:$0x1]  ;;  %v4402_v45 = vld [vmem:[#allocation3 + $0x2c] sm:$0x1]  ;;  %v4284_v10 = vor.u32 %v4282_v29, %v4281_v1  ;;  %v4285_v51 = vrot.slane %v4281_v1, 4 }
 0x3e2   : > { %v4372_v40 = vsel %vm9427_vm5, 0, %v4371_v19  ;;  %v4403_v5 = vsel %vm9355_vm2, 0, %v4402_v45  ;;  %v4340_v3 = vsel %vm9532_vm11, %v4276_v46, %v4339_v35  ;;  %v4343_v6 = vsel %vm9427_vm5, %v4277_v26, %v4342_v38  ;;  %v9030_v11 = vld [vmem:[#allocation3 + $0x10] ss:$8 sps:$4 sm:$0xff]   ;;  %v9033_v24 = vld [vmem:[%s11107_s8 + $0xb4] ss:$8 sps:$4 sm:$0xff]   ;;  %4988 = vmatpush1.bf16.msra.mxu0 %v9027_v52 }
 0x3e3   : > { %4373 = vst [vmem:[#allocation3 + $0x28] sm:$0x1] %v4372_v40  ;;  %4404 = vst [vmem:[#allocation3 + $0x2c] sm:$0x1] %v4403_v5  ;;  %v4346_v13 = vsel %vm9532_vm11, %v4284_v10, %v4345_v55  ;;  %v4349_v12 = vsel %vm9427_vm5, %v4285_v51, %v4348_v56  ;;  %v4726_v57 = vld [vmem:[#allocation3] sm:$0xf]  ;;  %4664 = vmatmul.mubr.bf16.gmra.mrb[36].mxu0 %v9030_v11  ;;  %4989 = vmatprep.subr.bf16.mxu0 %v9033_v24 }
 0x3e4   : > { %4341 = vst [vmem:[#allocation3 + $0x38] sm:$0xf] %v4340_v3  ;;  %4344 = vst [vmem:[#allocation3 + $0x3c] sm:$0x1] %v4343_v6  ;;  %v4728_v16 = vld [vmem:[#allocation3 + $0x8] sm:$0xf]  ;;  %4673 = vmatprep.mubr.bf16.mxu0 %v9250_v2 }
 0x3e5   : > { %v4374_v7 = vld [vmem:[#allocation3 + $0x30] sm:$0x1]  ;;  %v4405_v15 = vld [vmem:[#allocation3 + $0x34] sm:$0x1]  ;;  %4347 = vst [vmem:[#allocation3 + $0x40] sm:$0xf] %v4346_v13 }
 0x3e6   : > { %v4375_v14 = vsel %vm9427_vm5, 0, %v4374_v7  ;;  %4350 = vst [vmem:[#allocation3 + $0x44] sm:$0x1] %v4349_v12  ;;  %v4406_v8 = vsel %vm9355_vm2, 0, %v4405_v15  ;;  %v9031_v17 = vld [vmem:[%s11107_s8 + $0xb0] ss:$8 sps:$4 sm:$0xff]  }
 0x3e7   : > { %4376 = vst [vmem:[#allocation3 + $0x30] sm:$0x1] %v4375_v14  ;;  %4407 = vst [vmem:[#allocation3 + $0x34] sm:$0x1] %v4406_v8  ;;  %v9036_v20 = vld [vmem:[%s11107_s8 + $0xc4] ss:$8 sps:$4 sm:$0xff]   ;;  %4990 = vmatpush1.bf16.msra.mxu0 %v9031_v17 }
 0x3e8   : > { %v4743_v22 = vshrl.u32 %v4726_v57, 16  ;;  %v4746_v28 = vshll.u32 %v4726_v57, 16  ;;  %v9034_v42 = vld [vmem:[%s11107_s8 + $0xc0] ss:$8 sps:$4 sm:$0xff]   ;;  %v4757_v23 = vshrl.u32 %v4728_v16, 16  ;;  %v4760_v58 = vshll.u32 %v4728_v16, 16  ;;  %4991 = vmatprep.subr.bf16.mxu0 %v9036_v20 }
 0x3e9   : > { %v9040_v35 = vld [vmem:[%s11107_s8 + $0xd4] ss:$8 sps:$4 sm:$0xff]   ;;  %v4727_v37 = vld [vmem:[#allocation3 + $0x4] sm:$0x1]  ;;  %v4732_v46 = vld [vmem:[#allocation3 + $0x18] sm:$0xf] }
 0x3ea   : > { %v9037_v30 = vld [vmem:[#allocation3 + $0x20] ss:$8 sps:$4 sm:$0xff]   ;;  %v4745_v39 = vrot.slane %v4743_v22, 4  ;;  %v4748_v29 = vrot.slane %v4746_v28, 5  ;;  %v4759_v19 = vrot.slane %v4757_v23, 4  ;;  %v4762_v45 = vrot.slane %v4760_v58, 5 }
 0x3eb   : > { %v4377_v62 = vld [vmem:[#allocation3 + $0x38] sm:$0x1]  ;;  %v4408_v25 = vld [vmem:[#allocation3 + $0x3c] sm:$0x1]  ;;  %4674 = vmatmul.mubr.bf16.gmra.mrb[40].mxu0 %v9037_v30  ;;  %v4730_v1 = vld [vmem:[#allocation3 + $0x10] sm:$0xf] }
 0x3ec   : > { %v4378_v47 = vsel %vm9427_vm5, 0, %v4377_v62  ;;  %v4409_v32 = vsel %vm9355_vm2, 0, %v4408_v25  ;;  %v4380_v31 = vld [vmem:[#allocation3 + $0x40] sm:$0x1]  ;;  %4992 = vmatpush1.bf16.msra.mxu0 %v9034_v42  ;;  %v9038_v26 = vld [vmem:[%s11107_s8 + $0xd0] ss:$8 sps:$4 sm:$0xff]   ;;  %4683 = vmatprep.mubr.bf16.mxu0 %v9250_v2  ;;  %v4749_v40 = vor.u32 %v4748_v29, %v4745_v39  ;;  %v4763_v55 = vor.u32 %v4762_v45, %v4759_v19 }
 0x3ed   : > { %4379 = vst [vmem:[#allocation3 + $0x38] sm:$0x1] %v4378_v47  ;;  %4410 = vst [vmem:[#allocation3 + $0x3c] sm:$0x1] %v4409_v32  ;;  %v4411_v38 = vld [vmem:[#allocation3 + $0x44] sm:$0x1]  ;;  %4993 = vmatprep.subr.bf16.mxu0 %v9040_v35 }
 0x3ee   : > { %v4381_v49 = vsel %vm9427_vm5, 0, %v4380_v31  ;;  %v4412_v53 = vsel %vm9355_vm2, 0, %v4411_v38  ;;  %v4729_v33 = vld [vmem:[#allocation3 + $0xc] sm:$0x1]  ;;  %v4752_v5 = vshll.u32 %v4727_v37, 16  ;;  %v4785_v56 = vshrl.u32 %v4732_v46, 16 }
 0x3ef   : > { %4382 = vst [vmem:[#allocation3 + $0x40] sm:$0x1] %v4381_v49  ;;  %4413 = vst [vmem:[#allocation3 + $0x44] sm:$0x1] %v4412_v53  ;;  %v4788_v3 = vshll.u32 %v4732_v46, 16  ;;  %v4771_v10 = vshrl.u32 %v4730_v1, 16 }
 0x3f0   : > { %v9041_v6 = vld [vmem:[%s11107_s8 + $0xe0] ss:$8 sps:$4 sm:$0xff]   ;;  %v4774_v51 = vshll.u32 %v4730_v1, 16  ;;  %4994 = vmatpush1.bf16.msra.mxu0 %v9038_v26  ;;  %v4766_v52 = vshll.u32 %v4729_v33, 16  ;;  %v9047_v7 = vld [vmem:[%s11107_s8 + $0xf4] ss:$8 sps:$4 sm:$0xff]  }
 0x3f1   : > { %4995 = vmatprep.subr.bf16.mxu0 %v9043_v4  ;;  %v4750_v13 = vrot.slane %v4749_v40, 4  ;;  %v4754_v12 = vrot.slane %v4752_v5, 5  ;;  %v4764_v24 = vrot.slane %v4763_v55, 4  ;;  %v4787_v14 = vrot.slane %v4785_v56, 4  ;;  %v9045_v57 = vld [vmem:[%s11107_s8 + $0xf0] ss:$8 sps:$4 sm:$0xff]  }
 0x3f2   : > { %v4790_v15 = vrot.slane %v4788_v3, 5  ;;  %v4773_v8 = vrot.slane %v4771_v10, 4  ;;  %v4776_v16 = vrot.slane %v4774_v51, 5  ;;  %v4736_v17 = vld [vmem:[#allocation3 + $0x28] sm:$0xf]  ;;  %v4768_v20 = vrot.slane %v4766_v52, 5 }
 0x3f3   : > { %v4733_v22 = vld [vmem:[#allocation3 + $0x1c] sm:$0x1]  ;;  %v9050_v28 = vld [vmem:[%s11107_s8 + $0x104] ss:$8 sps:$4 sm:$0xff]   ;;  %v4755_v42 = vsel %vm9827_vm7, %v4750_v13, %v4754_v12  ;;  %v4734_v23 = vld [vmem:[#allocation3 + $0x20] sm:$0xf] }
 0x3f4   : > { %v9044_v11 = vld [vmem:[#allocation3 + $0x30] ss:$8 sps:$4 sm:$0xff]   ;;  %4996 = vmatpush1.bf16.msra.mxu0 %v9041_v6  ;;  %v9048_v58 = vld [vmem:[%s11107_s8 + $0x100] ss:$8 sps:$4 sm:$0xff]   ;;  %v4769_v62 = vsel %vm9827_vm7, %v4764_v24, %v4768_v20  ;;  %v4731_v25 = vld [vmem:[#allocation3 + $0x14] sm:$0x1]  ;;  %v4791_v30 = vor.u32 %v4790_v15, %v4787_v14  ;;  %v4777_v37 = vor.u32 %v4776_v16, %v4773_v8 }
 0x3f5   : > { %4684 = vmatmul.mubr.bf16.gmra.mrb[44].mxu0 %v9044_v11  ;;  %4997 = vmatprep.subr.bf16.mxu0 %v9047_v7  ;;  %v4813_v47 = vshrl.u32 %v4736_v17, 16  ;;  %v4816_v32 = vshll.u32 %v4736_v17, 16  ;;  %v9053_v35 = vld [vmem:[%s11107_s8 + $0x114] ss:$8 sps:$4 sm:$0xff]   ;;  %v4794_v31 = vshll.u32 %v4733_v22, 16  ;;  %v4799_v38 = vshrl.u32 %v4734_v23, 16 }
 0x3f6   : > { %5015 = vmatprep.mubr.bf16.mxu0 %v9250_v2  ;;  %v4802_v39 = vshll.u32 %v4734_v23, 16  ;;  %v7959_v29 = vcombine.low %v4755_v42, %v4769_v62  ;;  %v4780_v49 = vshll.u32 %v4731_v25, 16  ;;  %v4792_v53 = vrot.slane %v4791_v30, 4  ;;  %v9051_v46 = vld [vmem:[%s11107_s8 + $0x110] ss:$8 sps:$4 sm:$0xff]  }
 0x3f7   : > { %v4815_v19 = vrot.slane %v4813_v47, 4  ;;  %v4818_v45 = vrot.slane %v4816_v32, 5  ;;  %v4778_v26 = vrot.slane %v4777_v37, 4  ;;  %v4740_v1 = vld [vmem:[#allocation3 + $0x38] sm:$0xf]  ;;  %v4796_v33 = vrot.slane %v4794_v31, 5 }
 0x3f8   : > { %4998 = vmatpush1.bf16.msra.mxu0 %v9045_v57  ;;  %v9056_v4 = vld [vmem:[%s11107_s8 + $0x124] ss:$8 sps:$4 sm:$0xff]   ;;  %v4801_v40 = vrot.slane %v4799_v38, 4  ;;  %v4804_v5 = vrot.slane %v4802_v39, 5  ;;  %v4782_v55 = vrot.slane %v4780_v49, 5  ;;  %v4841_v51 = vshrl.u32 %v4740_v1, 16 }
 0x3f9   : > { %5284 = vmatprep.subr.bf16.mxu0 %v9050_v28  ;;  %v4737_v56 = vld [vmem:[#allocation3 + $0x2c] sm:$0x1]  ;;  %v4738_v3 = vld [vmem:[#allocation3 + $0x30] sm:$0xf]  ;;  %v4797_v6 = vsel %vm9827_vm7, %v4792_v53, %v4796_v33  ;;  %v4819_v10 = vor.u32 %v4818_v45, %v4815_v19  ;;  %v4844_v11 = vshll.u32 %v4740_v1, 16  ;;  %vm5120_vm2 = vcmask 1042432  }
 0x3fa   : > { %v4783_v52 = vsel %vm9827_vm7, %v4778_v26, %v4782_v55  ;;  %v4735_v7 = vld [vmem:[#allocation3 + $0x24] sm:$0x1]  ;;  %v9054_v13 = vld [vmem:[%s11107_s8 + $0x120] ss:$8 sps:$4 sm:$0xff]   ;;  %v4805_v12 = vor.u32 %v4804_v5, %v4801_v40  ;;  %v4822_v24 = vshll.u32 %v4737_v56, 16  ;;  %v4827_v14 = vshrl.u32 %v4738_v3, 16 }
 0x3fb   : > { %v4830_v15 = vshll.u32 %v4738_v3, 16  ;;  %v7960_v57 = vcombine.low %v4783_v52, %v4797_v6  ;;  %v9059_v8 = vld [vmem:[%s11107_s8 + $0x134] ss:$8 sps:$4 sm:$0xff]   ;;  %v4808_v16 = vshll.u32 %v4735_v7, 16  ;;  %v4820_v17 = vrot.slane %v4819_v10, 4 }
 0x3fc   : > { %v4843_v20 = vrot.slane %v4841_v51, 4  ;;  %v4846_v22 = vrot.slane %v4844_v11, 5  ;;  %v9057_v28 = vld [vmem:[%s11107_s8 + $0x130] ss:$8 sps:$4 sm:$0xff]   ;;  %v4806_v42 = vrot.slane %v4805_v12, 4  ;;  %v4824_v23 = vrot.slane %v4822_v24, 5 }
 0x3fd   : > { %5016 = vmatmul.mubr.bf16.vlgmr.msra.gmra.mrb[32].mxu0 %v7959_v29  ;;  %v4832_v62 = vrot.slane %v4830_v15, 5  ;;  %v9062_v25 = vld [vmem:[%s11107_s8 + $0x144] ss:$8 sps:$4 sm:$0xff]   ;;  %v4741_v30 = vld [vmem:[#allocation3 + $0x3c] sm:$0x1]  ;;  %v4810_v47 = vrot.slane %v4808_v16, 5 }
 0x3fe   : > { %5285 = vmatpush1.bf16.msra.mxu0 %v9048_v58  ;;  %5025 = vmatprep.mubr.bf16.mxu0 %v9250_v2  ;;  %v4829_v58 = vrot.slane %v4827_v14, 4  ;;  %v4825_v32 = vsel %vm9827_vm7, %v4820_v17, %v4824_v23  ;;  %v4739_v37 = vld [vmem:[#allocation3 + $0x34] sm:$0x1]  ;;  %v9060_v31 = vld [vmem:[%s11107_s8 + $0x140] ss:$8 sps:$4 sm:$0xff]   ;;  %v4850_v29 = vshll.u32 %v4741_v30, 16 }
 0x3ff   : > { %5286 = vmatprep.subr.bf16.mxu0 %v9053_v35  ;;  %v4847_v35 = vor.u32 %v4846_v22, %v4843_v20  ;;  %v4811_v38 = vsel %vm9827_vm7, %v4806_v42, %v4810_v47  ;;  %v9065_v53 = vld [vmem:[%s11107_s8 + $0x154] ss:$8 sps:$4 sm:$0xff]   ;;  %v4836_v19 = vshll.u32 %v4739_v37, 16  ;;  %v5088_v5 = vld [vmem:[#allocation3] sm:$0xe]  ;;  %vm5121_vm5 = vcmask 1046532  }
 0x400   : > { %v4833_v39 = vor.u32 %v4832_v62, %v4829_v58  ;;  %v7961_v49 = vcombine.low %v4811_v38, %v4825_v32  ;;  %v4852_v1 = vrot.slane %v4850_v29, 5  ;;  %v5089_v55 = vld [vmem:[#allocation3 + $0x4] sm:$0x1]  ;;  %v5091_v56 = vld [vmem:[#allocation3 + $0xc] sm:$0x1]  ;;  %v7979_v52 = vrot.slane %v5088_v5, 9  ;;  %vm10606_vm11 = vmor %vm5120_vm2, %vm5121_vm5 }
 0x401   : > { %v4848_v45 = vrot.slane %v4847_v35, 4  ;;  %v4838_v33 = vrot.slane %v4836_v19, 5  ;;  %v9066_v3 = vld [vmem:[%s11107_s8 + $0x160] ss:$8 sps:$4 sm:$0xff]   ;;  %v9071_v51 = vld [vmem:[%s11107_s8 + $0x174] ss:$8 sps:$4 sm:$0xff]  }
 0x402   : > { %5287 = vmatpush1.bf16.msra.mxu0 %v9051_v46  ;;  %v9063_v46 = vld [vmem:[%s11107_s8 + $0x150] ss:$8 sps:$4 sm:$0xff]   ;;  %v4834_v26 = vrot.slane %v4833_v39, 4  ;;  %v5090_v11 = vld [vmem:[#allocation3 + $0x8] sm:$0xe]  ;;  %v5125_v7 = vrot.slane %v5089_v55, 5 }
 0x403   : > { %5288 = vmatprep.subr.bf16.mxu0 %v9056_v4  ;;  %v9068_v4 = vld [vmem:[%s11107_s8 + $0x164] ss:$8 sps:$4 sm:$0xff]   ;;  %v4853_v40 = vsel %vm9827_vm7, %v4848_v45, %v4852_v1  ;;  %v9069_v24 = vld [vmem:[%s11107_s8 + $0x170] ss:$8 sps:$4 sm:$0xff]   ;;  %v7980_v14 = vrot.slane %v5090_v11, 9 }
 0x404   : > { %v4839_v6 = vsel %vm9827_vm7, %v4834_v26, %v4838_v33  ;;  %v9074_v15 = vld [vmem:[%s11107_s8 + $0x184] ss:$8 sps:$4 sm:$0xff]   ;;  %v5095_v16 = vld [vmem:[#allocation3 + $0x1c] sm:$0x1]  ;;  %v9072_v17 = vld [vmem:[%s11107_s8 + $0x180] ss:$8 sps:$4 sm:$0xff]  }
 0x405   : > { %5026 = vmatmul.mubr.bf16.gmra.mrb[36].mxu0 %v7960_v57  ;;  %v7962_v10 = vcombine.low %v4839_v6, %v4853_v40  ;;  %v5126_v57 = vsel %vm10606_vm11, %v7979_v52, %v5125_v7  ;;  %v9077_v22 = vld [vmem:[%s11107_s8 + $0x194] ss:$8 sps:$4 sm:$0xff]   ;;  %v5094_v42 = vld [vmem:[#allocation3 + $0x18] sm:$0xe]  ;;  %v5137_v23 = vrot.slane %v5095_v16, 5 }
 0x406   : > { %5289 = vmatpush1.bf16.msra.mxu0 %v9054_v13  ;;  %5035 = vmatprep.mubr.bf16.mxu0 %v9250_v2  ;;  %v5129_v13 = vrot.slane %v5091_v56, 5  ;;  %v5092_v58 = vld [vmem:[#allocation3 + $0x10] sm:$0xe]  ;;  %v7982_v30 = vrot.slane %v5094_v42, 9  ;;  %v9080_v47 = vld [vmem:[%s11107_s8 + $0x1a4] ss:$8 sps:$4 sm:$0xff]  }
 0x407   : > { %5290 = vmatprep.subr.bf16.mxu0 %v9059_v8  ;;  %v9075_v62 = vld [vmem:[%s11107_s8 + $0x190] ss:$8 sps:$4 sm:$0xff]   ;;  %v9078_v32 = vld [vmem:[%s11107_s8 + $0x1a0] ss:$8 sps:$4 sm:$0xff]   ;;  %v7981_v35 = vrot.slane %v5092_v58, 9 }
 0x408   : > { %v5130_v8 = vsel %vm10606_vm11, %v7980_v14, %v5129_v13  ;;  %v5138_v37 = vsel %vm10606_vm11, %v7982_v30, %v5137_v23  ;;  %v9083_v39 = vld [vmem:[%s11107_s8 + $0x1b4] ss:$8 sps:$4 sm:$0xff]   ;;  %v5097_v29 = vld [vmem:[#allocation3 + $0x24] sm:$0x1]  ;;  %v5096_v45 = vld [vmem:[#allocation3 + $0x20] sm:$0xe] }
 0x409   : > { %v8003_v20 = vcombine.low %v5126_v57, %v5130_v8  ;;  %v5141_v26 = vrot.slane %v5097_v29, 5  ;;  %v7983_v33 = vrot.slane %v5096_v45, 9  ;;  %v5103_v5 = vld [vmem:[#allocation3 + $0x3c] sm:$0x1]  ;;  %v9084_v55 = vld [vmem:[%s11107_s8 + $0x1c0] ss:$8 sps:$4 sm:$0xff]  }
 0x40a   : > { %5291 = vmatpush1.bf16.msra.mxu0 %v9057_v28  ;;  %v5093_v28 = vld [vmem:[#allocation3 + $0x14] sm:$0x1]  ;;  %v5153_v11 = vrot.slane %v5103_v5, 5  ;;  %v5100_v52 = vld [vmem:[#allocation3 + $0x30] sm:$0xe]  ;;  %v9239_v12 = vld [vmem:[%s11109_s10 + $0x38] sm:$0xff]  }
 0x40b   : > { %5292 = vmatprep.subr.bf16.mxu0 %v9062_v25  ;;  %v5133_v25 = vrot.slane %v5093_v28, 5  ;;  %v5142_v56 = vsel %vm10606_vm11, %v7983_v33, %v5141_v26  ;;  %v9089_v6 = vld [vmem:[%s11107_s8 + $0x1d4] ss:$8 sps:$4 sm:$0xff]   ;;  %v9087_v7 = vld [vmem:[%s11107_s8 + $0x1d0] ss:$8 sps:$4 sm:$0xff]  }
 0x40c   : > { %v9092_v14 = vld [vmem:[%s11107_s8 + $0x1e4] ss:$8 sps:$4 sm:$0xff]   ;;  %v9090_v8 = vld [vmem:[%s11107_s8 + $0x1e0] ss:$8 sps:$4 sm:$0xff]   ;;  %v9102_v58 = vld [vmem:[%s11107_s8 + $0x214] ss:$8 sps:$4 sm:$0xff]  }
 0x40d   : > { %5036 = vmatmul.mubr.bf16.gmra.mrb[40].mxu0 %v7961_v49  ;;  %v5134_v38 = vsel %vm10606_vm11, %v7981_v35, %v5133_v25  ;;  %v9098_v28 = vld [vmem:[%s11107_s8 + $0x204] ss:$8 sps:$4 sm:$0xff]   ;;  %v9096_v42 = vld [vmem:[%s11107_s8 + $0x200] ss:$8 sps:$4 sm:$0xff]   ;;  %v5641_v35 = vld [vmem:[#allocation3 + $0x10] sm:$0xf] }
 0x40e   : > { %5293 = vmatpush1.bf16.msra.mxu0 %v9060_v31  ;;  %5045 = vmatprep.mubr.bf16.mxu0 %v9250_v2  ;;  %v5099_v31 = vld [vmem:[#allocation3 + $0x2c] sm:$0x1]  ;;  %v8004_v49 = vcombine.low %v5134_v38, %v5138_v37  ;;  %v9099_v23 = vld [vmem:[#allocation3 + $0x8] ss:$8 sps:$4 sm:$0xff]   ;;  %v5673_v29 = vshll.u32 %v5641_v35, 16 }
 0x40f   : > { %5294 = vmatprep.subr.bf16.mxu0 %v9065_v53  ;;  %v5098_v53 = vld [vmem:[#allocation3 + $0x28] sm:$0xe]  ;;  %v5145_v19 = vrot.slane %v5099_v31, 5  ;;  %v9105_v25 = vld [vmem:[%s11107_s8 + $0x224] ss:$8 sps:$4 sm:$0xff]  }
 0x410   : > { %v7984_v1 = vrot.slane %v5098_v53, 9  ;;  %v9103_v30 = vld [vmem:[%s11107_s8 + $0x220] ss:$8 sps:$4 sm:$0xff]   ;;  %v9107_v37 = vld [vmem:[%s11107_s8 + $0x230] ss:$8 sps:$4 sm:$0xff]  }
 0x411   : > { %v9112_v31 = vld [vmem:[%s11107_s8 + $0x244] ss:$8 sps:$4 sm:$0xff]   ;;  %v5639_v38 = vld [vmem:[#allocation3 + $0x8] sm:$0xf]  ;;  %v9114_v33 = vld [vmem:[%s11107_s8 + $0x250] ss:$8 sps:$4 sm:$0xff]  }
 0x412   : > { %5295 = vmatpush1.bf16.msra.mxu0 %v9063_v46  ;;  %v9081_v46 = vld [vmem:[%s11107_s8 + $0x1b0] ss:$8 sps:$4 sm:$0xff]   ;;  %v5146_v40 = vsel %vm10606_vm11, %v7984_v1, %v5145_v19  ;;  %v5656_v53 = vshrl.u32 %v5639_v38, 16  ;;  %v5659_v19 = vshll.u32 %v5639_v38, 16  ;;  %v5675_v1 = vrot.slane %v5673_v29, 5 }
 0x413   : > { %5296 = vmatprep.subr.bf16.mxu0 %v9068_v4  ;;  %v9086_v4 = vld [vmem:[%s11107_s8 + $0x1c4] ss:$8 sps:$4 sm:$0xff]   ;;  %v9113_v45 = vld [vmem:[#allocation3 + $0x28] ss:$8 sps:$4 sm:$0xff]  }
 0x414   : > { %v5661_v5 = vrot.slane %v5659_v19, 5 }
 0x415   : > { %5046 = vmatmul.mubr.bf16.gmra.mrb[44].mxu0 %v7962_v10  ;;  %v5101_v10 = vld [vmem:[#allocation3 + $0x34] sm:$0x1] }
 0x416   : > { %5297 = vmatpush1.bf16.msra.mxu0 %v9066_v3  ;;  %5316 = vmatprep.mubr.bf16.mxu0 %v9250_v2  ;;  %v8005_v3 = vcombine.low %v5142_v56, %v5146_v40  ;;  %v5149_v13 = vrot.slane %v5101_v10, 5  ;;  %v5658_v40 = vrot.slane %v5656_v53, 4  ;;  %v9119_v56 = vld [vmem:[%s11107_s8 + $0x264] ss:$8 sps:$4 sm:$0xff]  }
 0x417   : > { %5298 = vmatprep.subr.bf16.mxu0 %v9071_v51  ;;  %v5102_v51 = vld [vmem:[#allocation3 + $0x38] sm:$0xe] }
 0x41a   : > { %5299 = vmatpush1.bf16.msra.mxu0 %v9069_v24  ;;  %v7986_v24 = vrot.slane %v5102_v51, 9 }
 0x41b   : > { %5534 = vmatprep.subr.bf16.mxu0 %v9074_v15  ;;  %v7985_v15 = vrot.slane %v5100_v52, 9 }
 0x41c   : > { %v5154_v57 = vsel %vm10606_vm11, %v7986_v24, %v5153_v11  ;;  %v5662_v24 = vor.u32 %v5661_v5, %v5658_v40 }
 0x41d   : > { %5317 = vmatmul.mubr.bf16.vlgmr.msra.gmra.mrb[32].mxu0 %v8003_v20  ;;  %v5150_v16 = vsel %vm10606_vm11, %v7985_v15, %v5149_v13  ;;  %v9095_v20 = vld [vmem:[%s11107_s8 + $0x1f4] ss:$8 sps:$4 sm:$0xff]   ;;  %v9117_v13 = vld [vmem:[%s11107_s8 + $0x260] ss:$8 sps:$4 sm:$0xff]  }
 0x41e   : > { %5535 = vmatpush1.bf16.msra.mxu0 %v9072_v17  ;;  %5326 = vmatprep.mubr.bf16.mxu0 %v9250_v2  ;;  %v8006_v17 = vcombine.low %v5150_v16, %v5154_v57  ;;  %v9120_v15 = vld [vmem:[#allocation3 + $0x38] ss:$8 sps:$4 sm:$0xff]   ;;  %v9123_v57 = vld [vmem:[%s11107_s8 + $0x274] ss:$8 sps:$4 sm:$0xff]  }
 0x41f   : > { %5536 = vmatprep.subr.bf16.mxu0 %v9077_v22  ;;  %v9093_v22 = vld [vmem:[%s11107_s8 + $0x1f0] ss:$8 sps:$4 sm:$0xff]  }
 0x422   : > { %5537 = vmatpush1.bf16.msra.mxu0 %v9075_v62  ;;  %v9100_v62 = vld [vmem:[%s11107_s8 + $0x210] ss:$8 sps:$4 sm:$0xff]  }
 0x423   : > { %5538 = vmatprep.subr.bf16.mxu0 %v9080_v47  ;;  %v9106_v47 = vld [vmem:[#allocation3 + $0x18] ss:$8 sps:$4 sm:$0xff]  }
 0x425   : > { %5327 = vmatmul.mubr.bf16.gmra.mrb[36].mxu0 %v8004_v49  ;;  %v9110_v49 = vld [vmem:[%s11107_s8 + $0x240] ss:$8 sps:$4 sm:$0xff]  }
 0x426   : > { %5539 = vmatpush1.bf16.msra.mxu0 %v9078_v32  ;;  %5336 = vmatprep.mubr.bf16.mxu0 %v9250_v2  ;;  %v9109_v32 = vld [vmem:[%s11107_s8 + $0x234] ss:$8 sps:$4 sm:$0xff]  }
 0x427   : > { %5540 = vmatprep.subr.bf16.mxu0 %v9083_v39  ;;  %v5670_v39 = vshrl.u32 %v5641_v35, 16 }
 0x429   : > { %v5672_v26 = vrot.slane %v5670_v39, 4 }
 0x42a   : > { %5541 = vmatpush1.bf16.msra.mxu0 %v9081_v46  ;;  %v9116_v46 = vld [vmem:[%s11107_s8 + $0x254] ss:$8 sps:$4 sm:$0xff]  }
 0x42b   : > { %5542 = vmatprep.subr.bf16.mxu0 %v9086_v4  ;;  %v5645_v4 = vld [vmem:[#allocation3 + $0x20] sm:$0xf]  ;;  %v5676_v10 = vor.u32 %v5675_v1, %v5672_v26  ;;  %v9129_v1 = vld [vmem:[%s11107_s8 + $0x294] ss:$8 sps:$4 sm:$0xff]  }
 0x42c   : > { %v5698_v51 = vshrl.u32 %v5645_v4, 16  ;;  %v5701_v11 = vshll.u32 %v5645_v4, 16 }
 0x42d   : > { %5337 = vmatmul.mubr.bf16.gmra.mrb[40].mxu0 %v8005_v3  ;;  %v5642_v3 = vld [vmem:[#allocation3 + $0x14] sm:$0x1]  ;;  %v5677_v16 = vrot.slane %v5676_v10, 4 }
 0x42e   : > { %5543 = vmatpush1.bf16.msra.mxu0 %v9084_v55  ;;  %5346 = vmatprep.mubr.bf16.mxu0 %v9250_v2  ;;  %v5643_v55 = vld [vmem:[#allocation3 + $0x18] sm:$0xf] }
 0x42f   : > { %5544 = vmatprep.subr.bf16.mxu0 %v9089_v6  ;;  %v5640_v6 = vld [vmem:[#allocation3 + $0xc] sm:$0x1]  ;;  %v5684_v52 = vshrl.u32 %v5643_v55, 16 }
 0x432   : > { %5545 = vmatpush1.bf16.msra.mxu0 %v9087_v7  ;;  %v5687_v7 = vshll.u32 %v5643_v55, 16  ;;  %v9127_v55 = vld [vmem:[%s11107_s8 + $0x290] ss:$8 sps:$4 sm:$0xff]  }
 0x433   : > { %5546 = vmatprep.subr.bf16.mxu0 %v9092_v14  ;;  %v5679_v14 = vshll.u32 %v5642_v3, 16  ;;  %v5653_v3 = vld [vmem:[#allocation3 + $0x40] sm:$0xf] }
 0x435   : > { %5347 = vmatmul.mubr.bf16.gmra.mrb[44].mxu0 %v8006_v17  ;;  %v5700_v17 = vrot.slane %v5698_v51, 4 }
 0x436   : > { %5547 = vmatpush1.bf16.msra.mxu0 %v9090_v8  ;;  %5566 = vmatprep.mubr.bf16.mxu0 %v9250_v2  ;;  %v5665_v8 = vshll.u32 %v5640_v6, 16  ;;  %v9132_v6 = vld [vmem:[%s11107_s8 + $0x2a4] ss:$8 sps:$4 sm:$0xff]  }
 0x437   : > { %5548 = vmatprep.subr.bf16.mxu0 %v9095_v20  ;;  %v5703_v20 = vrot.slane %v5701_v11, 5 }
 0x43a   : > { %5549 = vmatpush1.bf16.msra.mxu0 %v9093_v22  ;;  %v5686_v22 = vrot.slane %v5684_v52, 4 }
 0x43b   : > { %5896 = vmatprep.subr.bf16.mxu0 %v9098_v28  ;;  %v5689_v28 = vrot.slane %v5687_v7, 5  ;;  %v5650_v7 = vld [vmem:[#allocation3 + $0x34] sm:$0x1] }
 0x43d   : > { %5567 = vmatmul.mubr.bf16.vlgmr.msra.gmra.mrb[32].mxu0 %v9099_v23  ;;  %v9121_v23 = vld [vmem:[%s11107_s8 + $0x270] ss:$8 sps:$4 sm:$0xff]   ;;  %v5690_v29 = vor.u32 %v5689_v28, %v5686_v22  ;;  %v5735_v22 = vshll.u32 %v5650_v7, 16  ;;  %v9142_v7 = vld [vmem:[%s11107_s8 + $0x2e0] ss:$8 sps:$4 sm:$0xff]  }
 0x43e   : > { %5897 = vmatpush1.bf16.msra.mxu0 %v9096_v42  ;;  %5576 = vmatprep.mubr.bf16.mxu0 %v9250_v2  ;;  %v5649_v42 = vld [vmem:[#allocation3 + $0x30] sm:$0xf] }
 0x43f   : > { %5898 = vmatprep.subr.bf16.mxu0 %v9102_v58  ;;  %v9126_v58 = vld [vmem:[%s11107_s8 + $0x284] ss:$8 sps:$4 sm:$0xff]   ;;  %v5726_v38 = vshrl.u32 %v5649_v42, 16  ;;  %v5729_v39 = vshll.u32 %v5649_v42, 16 }
 0x441   : > { %v5728_v40 = vrot.slane %v5726_v38, 4  ;;  %v5731_v5 = vrot.slane %v5729_v39, 5  ;;  %v9138_v39 = vld [vmem:[%s11107_s8 + $0x2c4] ss:$8 sps:$4 sm:$0xff]  }
 0x442   : > { %5899 = vmatpush1.bf16.msra.mxu0 %v9100_v62  ;;  %v5663_v62 = vrot.slane %v5662_v24, 4 }
 0x443   : > { %5900 = vmatprep.subr.bf16.mxu0 %v9105_v25  ;;  %v5681_v25 = vrot.slane %v5679_v14, 5  ;;  %v5732_v14 = vor.u32 %v5731_v5, %v5728_v40  ;;  %v9141_v40 = vld [vmem:[%s11107_s8 + $0x2d4] ss:$8 sps:$4 sm:$0xff]  }
 0x445   : > { %5577 = vmatmul.mubr.bf16.gmra.mrb[36].mxu0 %v9106_v47  ;;  %v5646_v47 = vld [vmem:[#allocation3 + $0x24] sm:$0x1]  ;;  %v5682_v35 = vsel %vm9827_vm7, %v5677_v16, %v5681_v25  ;;  %v5648_v16 = vld [vmem:[#allocation3 + $0x2c] sm:$0x1]  ;;  %v5733_v25 = vrot.slane %v5732_v14, 4 }
 0x446   : > { %5901 = vmatpush1.bf16.msra.mxu0 %v9103_v30  ;;  %5586 = vmatprep.mubr.bf16.mxu0 %v9250_v2  ;;  %v5667_v30 = vrot.slane %v5665_v8, 5  ;;  %v5707_v19 = vshll.u32 %v5646_v47, 16  ;;  %v9147_v14 = vld [vmem:[%s11107_s8 + $0x2f4] ss:$8 sps:$4 sm:$0xff]  }
 0x447   : > { %5902 = vmatprep.subr.bf16.mxu0 %v9109_v32  ;;  %v5647_v32 = vld [vmem:[#allocation3 + $0x28] sm:$0xf] }
 0x448   : > { %v5668_v53 = vsel %vm9827_vm7, %v5663_v62, %v5667_v30  ;;  %v5709_v10 = vrot.slane %v5707_v19, 5  ;;  %v5721_v62 = vshll.u32 %v5648_v16, 16 }
 0x449   : > { %v8075_v26 = vcombine.low %v5668_v53, %v5682_v35 }
 0x44a   : > { %5903 = vmatpush1.bf16.msra.mxu0 %v9107_v37  ;;  %v5644_v37 = vld [vmem:[#allocation3 + $0x1c] sm:$0x1] }
 0x44b   : > { %5904 = vmatprep.subr.bf16.mxu0 %v9112_v31  ;;  %v5704_v31 = vor.u32 %v5703_v20, %v5700_v17  ;;  %v5693_v4 = vshll.u32 %v5644_v37, 16  ;;  %v9130_v17 = vld [vmem:[%s11107_s8 + $0x2a0] ss:$8 sps:$4 sm:$0xff]   ;;  %v5737_v37 = vrot.slane %v5735_v22, 5 }
 0x44c   : > { %v9226_v22 = vld [vmem:[%s11109_s10 + $0x48] sm:$0xff]  }
 0x44d   : > { %5587 = vmatmul.mubr.bf16.gmra.mrb[40].mxu0 %v9113_v45  ;;  %v5712_v45 = vshrl.u32 %v5647_v32, 16  ;;  %v5695_v52 = vrot.slane %v5693_v4, 5  ;;  %v5738_v53 = vsel %vm9827_vm7, %v5733_v25, %v5737_v37 }
 0x44e   : > { %5905 = vmatpush1.bf16.msra.mxu0 %v9110_v49  ;;  %5596 = vmatprep.mubr.bf16.mxu0 %v9250_v2  ;;  %v9124_v49 = vld [vmem:[%s11107_s8 + $0x280] ss:$8 sps:$4 sm:$0xff]  }
 0x44f   : > { %5906 = vmatprep.subr.bf16.mxu0 %v9116_v46  ;;  %v5715_v46 = vshll.u32 %v5647_v32, 16  ;;  %v5714_v51 = vrot.slane %v5712_v45, 4  ;;  %v9133_v32 = vld [vmem:[%s11107_s8 + $0x2b0] ss:$8 sps:$4 sm:$0xff]   ;;  %v5652_v45 = vld [vmem:[#allocation3 + $0x3c] sm:$0x1] }
 0x450   : > { %v5749_v5 = vshll.u32 %v5652_v45, 16  ;;  %v9230_v45 = vld [vmem:[%s11109_s10 + $0x58] sm:$0xff]  }
 0x451   : > { %v5717_v11 = vrot.slane %v5715_v46, 5  ;;  %v9136_v46 = vld [vmem:[%s11107_s8 + $0x2c0] ss:$8 sps:$4 sm:$0xff]  }
 0x452   : > { %5907 = vmatpush1.bf16.msra.mxu0 %v9114_v33  ;;  %v5705_v33 = vrot.slane %v5704_v31, 4 }
 0x453   : > { %5908 = vmatprep.subr.bf16.mxu0 %v9119_v56  ;;  %v5691_v56 = vrot.slane %v5690_v29, 4  ;;  %v5718_v20 = vor.u32 %v5717_v11, %v5714_v51  ;;  %v5654_v29 = vld [vmem:[#allocation3 + $0x44] sm:$0x1]  ;;  %v5751_v51 = vrot.slane %v5749_v5, 5  ;;  %v9231_v5 = vld [vmem:[%s11109_s10 + $0x18] sm:$0xff]  }
 0x454   : > { %v5710_v24 = vsel %vm9827_vm7, %v5705_v33, %v5709_v10  ;;  %v5763_v4 = vshll.u32 %v5654_v29, 16  ;;  %v9144_v10 = vld [vmem:[%s11107_s8 + $0x2e4] ss:$8 sps:$4 sm:$0xff]   ;;  %v6007_v29 = vld [vmem:[#allocation3 + $0x20] sm:$0xe] }
 0x455   : > { %5597 = vmatmul.mubr.bf16.gmra.mrb[44].mxu0 %v9120_v15  ;;  %v5754_v15 = vshrl.u32 %v5653_v3, 16  ;;  %v5696_v8 = vsel %vm9827_vm7, %v5691_v56, %v5695_v52  ;;  %v5719_v35 = vrot.slane %v5718_v20, 4  ;;  %v9139_v56 = vld [vmem:[%s11107_s8 + $0x2d0] ss:$8 sps:$4 sm:$0xff]   ;;  %v6004_v52 = vld [vmem:[#allocation3 + $0x14] sm:$0x1] }
 0x456   : > { %5909 = vmatpush1.bf16.msra.mxu0 %v9117_v13  ;;  %5928 = vmatprep.mubr.bf16.mxu0 %v9250_v2  ;;  %v5651_v13 = vld [vmem:[#allocation3 + $0x38] sm:$0xf]  ;;  %v6039_v16 = vrot.slane %v6004_v52, 5  ;;  %v9225_v20 = vld [vmem:[%s11109_s10] sm:$0xff]   ;;  %v6011_v52 = vld [vmem:[#allocation3 + $0x30] sm:$0xe] }
 0x457   : > { %5910 = vmatprep.subr.bf16.mxu0 %v9123_v57  ;;  %v5757_v57 = vshll.u32 %v5653_v3, 16  ;;  %v5740_v28 = vshrl.u32 %v5651_v13, 16  ;;  %v5743_v42 = vshll.u32 %v5651_v13, 16  ;;  %v5756_v30 = vrot.slane %v5754_v15, 4  ;;  %v6002_v15 = vld [vmem:[#allocation3 + $0xc] sm:$0x1] }
 0x459   : > { %v5759_v47 = vrot.slane %v5757_v57, 5  ;;  %v5742_v31 = vrot.slane %v5740_v28, 4  ;;  %v5745_v38 = vrot.slane %v5743_v42, 5  ;;  %v6003_v57 = vld [vmem:[#allocation3 + $0x10] sm:$0xe]  ;;  %v6035_v42 = vrot.slane %v6002_v15, 5 }
 0x45a   : > { %5911 = vmatpush1.bf16.msra.mxu0 %v9121_v23  ;;  %v8076_v23 = vcombine.low %v5696_v8, %v5710_v24  ;;  %v6001_v8 = vld [vmem:[#allocation3 + $0x8] sm:$0xe]  ;;  %v9145_v28 = vld [vmem:[%s11107_s8 + $0x2f0] ss:$8 sps:$4 sm:$0xff]  }
 0x45b   : > { %6194 = vmatprep.subr.bf16.mxu0 %v9126_v58  ;;  %v9135_v58 = vld [vmem:[%s11107_s8 + $0x2b4] ss:$8 sps:$4 sm:$0xff]   ;;  %v5760_v19 = vor.u32 %v5759_v47, %v5756_v30  ;;  %v9227_v30 = vld [vmem:[%s11109_s10 + $0x8] sm:$0xff]   ;;  %v6008_v47 = vld [vmem:[#allocation3 + $0x24] sm:$0x1] }
 0x45c   : > { %v9157_v15 = vld [vmem:[%s11107_s8 + $0x330] ss:$8 sps:$4 sm:$0xff]  }
 0x45d   : > { %5929 = vmatmul.mubr.bf16.vlgmr.msra.gmra.mrb[32].mxu0 %v8075_v26 }
 0x45e   : > { %6195 = vmatpush1.bf16.msra.mxu0 %v9124_v49  ;;  %5938 = vmatprep.mubr.bf16.mxu0 %v9250_v2  ;;  %v5723_v49 = vrot.slane %v5721_v62, 5  ;;  %v8095_v62 = vrot.slane %v6001_v8, 9  ;;  %v8100_v8 = vrot.slane %v6011_v52, 9 }
 0x45f   : > { %6196 = vmatprep.subr.bf16.mxu0 %v9129_v1  ;;  %v5746_v1 = vor.u32 %v5745_v38, %v5742_v31  ;;  %v9153_v38 = vld [vmem:[%s11107_s8 + $0x314] ss:$8 sps:$4 sm:$0xff]  }
 0x460   : > { %v5724_v26 = vsel %vm9827_vm7, %v5719_v35, %v5723_v49  ;;  %v9148_v35 = vld [vmem:[%s11107_s8 + $0x300] ss:$8 sps:$4 sm:$0xff]   ;;  %v6036_v37 = vsel %vm10606_vm11, %v8095_v62, %v6035_v42  ;;  %v6047_v49 = vrot.slane %v6008_v47, 5  ;;  %v9165_v62 = vld [vmem:[%s11107_s8 + $0x354] ss:$8 sps:$4 sm:$0xff]  }
 0x461   : > { %v8077_v33 = vcombine.low %v5724_v26, %v5738_v53  ;;  %v5747_v3 = vrot.slane %v5746_v1, 4  ;;  %v9229_v53 = vld [vmem:[%s11109_s10 + $0x10] sm:$0xff]   ;;  %v8098_v1 = vrot.slane %v6007_v29, 9  ;;  %v9160_v42 = vld [vmem:[%s11107_s8 + $0x340] ss:$8 sps:$4 sm:$0xff]  }
 0x462   : > { %6197 = vmatpush1.bf16.msra.mxu0 %v9127_v55  ;;  %v5761_v55 = vrot.slane %v5760_v19, 4  ;;  %v6005_v19 = vld [vmem:[#allocation3 + $0x18] sm:$0xe] }
 0x463   : > { %6198 = vmatprep.subr.bf16.mxu0 %v9132_v6  ;;  %v5765_v6 = vrot.slane %v5763_v4, 5  ;;  %v5752_v13 = vsel %vm9827_vm7, %v5747_v3, %v5751_v51  ;;  %v9156_v4 = vld [vmem:[%s11107_s8 + $0x324] ss:$8 sps:$4 sm:$0xff]   ;;  %v9154_v3 = vld [vmem:[%s11107_s8 + $0x320] ss:$8 sps:$4 sm:$0xff]  }
 0x464   : > { %v9159_v51 = vld [vmem:[%s11107_s8 + $0x334] ss:$8 sps:$4 sm:$0xff]  }
 0x465   : > { %5939 = vmatmul.mubr.bf16.gmra.mrb[36].mxu0 %v8076_v23  ;;  %v5766_v11 = vsel %vm9827_vm7, %v5761_v55, %v5765_v6  ;;  %v8096_v23 = vrot.slane %v6003_v57, 9  ;;  %v6012_v55 = vld [vmem:[#allocation3 + $0x34] sm:$0x1] }
 0x466   : > { %6199 = vmatpush1.bf16.msra.mxu0 %v9130_v17  ;;  %5948 = vmatprep.mubr.bf16.mxu0 %v9250_v2  ;;  %v8078_v24 = vcombine.low %v5752_v13, %v5766_v11  ;;  %v9224_v17 = vld [vmem:[%s11109_s10 + $0x40] sm:$0xff]   ;;  %v6010_v11 = vld [vmem:[#allocation3 + $0x2c] sm:$0x1] }
 0x467   : > { %6200 = vmatprep.subr.bf16.mxu0 %v9135_v58  ;;  %v9150_v58 = vld [vmem:[%s11107_s8 + $0x304] ss:$8 sps:$4 sm:$0xff]   ;;  %8359 = vmatprep.subr.bf16.mxu1 %v9224_v17  ;;  %v6040_v25 = vsel %vm10606_vm11, %v8096_v23, %v6039_v16  ;;  %v6051_v57 = vrot.slane %v6010_v11, 5  ;;  %v6550_v11 = vld [vmem:[#allocation3 + $0x10] sm:$0xf] }
 0x468   : > { %8360 = vmatpush3.bf16.msra.mxu1 %v9225_v20  ;;  %v8119_v31 = vcombine.low %v6036_v37, %v6040_v25  ;;  %v9233_v13 = vld [vmem:[%s11109_s10 + $0x20] sm:$0xff]   ;;  %v6014_v25 = vld [vmem:[#allocation3 + $0x3c] sm:$0x1] }
 0x469   : > { %8361 = vmatprep.subr.bf16.mxu1 %v9226_v22  ;;  %v9162_v16 = vld [vmem:[%s11107_s8 + $0x344] ss:$8 sps:$4 sm:$0xff]   ;;  %v6059_v37 = vrot.slane %v6014_v25, 5 }
 0x46a   : > { %6201 = vmatpush1.bf16.msra.mxu0 %v9133_v32  ;;  %v9228_v32 = vld [vmem:[%s11109_s10 + $0x50] sm:$0xff]   ;;  %v9235_v22 = vld [vmem:[%s11109_s10 + $0x28] sm:$0xff]  }
 0x46b   : > { %6202 = vmatprep.subr.bf16.mxu0 %v9138_v39  ;;  %v6006_v39 = vld [vmem:[#allocation3 + $0x1c] sm:$0x1] }
 0x46c   : > { %8362 = vmatpush3.bf16.msra.mxu1 %v9227_v30  ;;  %v6043_v26 = vrot.slane %v6006_v39, 5  ;;  %v6015_v30 = vld [vmem:[#allocation3 + $0x40] sm:$0xe] }
 0x46d   : > { %5949 = vmatmul.mubr.bf16.gmra.mrb[40].mxu0 %v8077_v33  ;;  %8363 = vmatprep.subr.bf16.mxu1 %v9228_v32  ;;  %v8097_v33 = vrot.slane %v6005_v19, 9  ;;  %v6013_v32 = vld [vmem:[#allocation3 + $0x38] sm:$0xe] }
 0x46e   : > { %6203 = vmatpush1.bf16.msra.mxu0 %v9136_v46  ;;  %5958 = vmatprep.mubr.bf16.mxu0 %v9250_v2  ;;  %v9151_v46 = vld [vmem:[%s11107_s8 + $0x310] ss:$8 sps:$4 sm:$0xff]   ;;  %v8101_v39 = vrot.slane %v6013_v32, 9  ;;  %v9193_v32 = vld [vmem:[%s11107_s8 + $0x3e0] ss:$8 sps:$4 sm:$0xff]  }
 0x46f   : > { %6204 = vmatprep.subr.bf16.mxu0 %v9141_v40  ;;  %v6048_v40 = vsel %vm10606_vm11, %v8098_v1, %v6047_v49  ;;  %v6044_v6 = vsel %vm10606_vm11, %v8097_v33, %v6043_v26  ;;  %v9166_v49 = vld [vmem:[%s11107_s8 + $0x360] ss:$8 sps:$4 sm:$0xff]   ;;  %v9174_v26 = vld [vmem:[%s11107_s8 + $0x384] ss:$8 sps:$4 sm:$0xff]   ;;  %v9178_v33 = vld [vmem:[%s11107_s8 + $0x394] ss:$8 sps:$4 sm:$0xff]  }
 0x470   : > { %8364 = vmatpush3.bf16.msra.mxu1 %v9229_v53  ;;  %v6060_v53 = vsel %vm10606_vm11, %v8101_v39, %v6059_v37  ;;  %v9172_v1 = vld [vmem:[%s11107_s8 + $0x380] ss:$8 sps:$4 sm:$0xff]  }
 0x471   : > { %8365 = vmatprep.subr.bf16.mxu1 %v9230_v45  ;;  %v9171_v45 = vld [vmem:[%s11107_s8 + $0x374] ss:$8 sps:$4 sm:$0xff]   ;;  %v9196_v39 = vld [vmem:[#allocation3 + $0x40] ss:$8 sps:$4 sm:$0xff]  }
 0x472   : > { %6205 = vmatpush1.bf16.msra.mxu0 %v9139_v56  ;;  %v9232_v56 = vld [vmem:[%s11109_s10 + $0x60] sm:$0xff]  }
 0x473   : > { %6206 = vmatprep.subr.bf16.mxu0 %v9144_v10  ;;  %v8120_v10 = vcombine.low %v6044_v6, %v6048_v40  ;;  %v9176_v40 = vld [vmem:[%s11107_s8 + $0x390] ss:$8 sps:$4 sm:$0xff]  }
 0x474   : > { %8366 = vmatpush3.bf16.msra.mxu1 %v9231_v5  ;;  %v9181_v5 = vld [vmem:[%s11107_s8 + $0x3a4] ss:$8 sps:$4 sm:$0xff]   ;;  %v6552_v6 = vld [vmem:[#allocation3 + $0x18] sm:$0xf] }
 0x475   : > { %5959 = vmatmul.mubr.bf16.gmra.mrb[44].mxu0 %v8078_v24  ;;  %v6009_v24 = vld [vmem:[#allocation3 + $0x28] sm:$0xe]  ;;  %8367 = vmatprep.subr.bf16.mxu1 %v9232_v56  ;;  %v6581_v52 = vshrl.u32 %v6552_v6, 16 }
 0x476   : > { %6207 = vmatpush1.bf16.msra.mxu0 %v9142_v7  ;;  %6226 = vmatprep.mubr.bf16.mxu0 %v9250_v2  ;;  %v6055_v7 = vrot.slane %v6012_v55, 5  ;;  %v8099_v17 = vrot.slane %v6009_v24, 9  ;;  %v9179_v55 = vld [vmem:[%s11107_s8 + $0x3a0] ss:$8 sps:$4 sm:$0xff]   ;;  %v6567_v24 = vshrl.u32 %v6550_v11, 16 }
 0x477   : > { %6208 = vmatprep.subr.bf16.mxu0 %v9147_v14  ;;  %v9234_v14 = vld [vmem:[%s11109_s10 + $0x68] sm:$0xff]  }
 0x478   : > { %v6056_v20 = vsel %vm10606_vm11, %v8100_v8, %v6055_v7  ;;  %8368 = vmatpush3.bf16.msra.mxu1 %v9233_v13  ;;  %v6052_v23 = vsel %vm10606_vm11, %v8099_v17, %v6051_v57  ;;  %v9182_v56 = vld [vmem:[#allocation3 + $0x20] ss:$8 sps:$4 sm:$0xff]   ;;  %v6584_v7 = vshll.u32 %v6552_v6, 16  ;;  %v9192_v57 = vld [vmem:[%s11107_s8 + $0x3d4] ss:$8 sps:$4 sm:$0xff]   ;;  %v6583_v8 = vrot.slane %v6581_v52, 4 }
 0x479   : > { %8369 = vmatprep.subr.bf16.mxu1 %v9234_v14  ;;  %v9186_v13 = vld [vmem:[%s11107_s8 + $0x3c0] ss:$8 sps:$4 sm:$0xff]   ;;  %v6570_v14 = vshll.u32 %v6550_v11, 16 }
 0x47a   : > { %6209 = vmatpush1.bf16.msra.mxu0 %v9145_v28  ;;  %v6016_v28 = vld [vmem:[#allocation3 + $0x44] sm:$0x1]  ;;  %v6556_v17 = vld [vmem:[#allocation3 + $0x28] sm:$0xf] }
 0x47b   : > { %6445 = vmatprep.subr.bf16.mxu0 %v9150_v58  ;;  %v8121_v58 = vcombine.low %v6052_v23, %v6056_v20  ;;  %v6063_v47 = vrot.slane %v6016_v28, 5  ;;  %v9190_v20 = vld [vmem:[%s11107_s8 + $0x3d0] ss:$8 sps:$4 sm:$0xff]   ;;  %v6572_v28 = vrot.slane %v6570_v14, 5  ;;  %v6553_v23 = vld [vmem:[#allocation3 + $0x1c] sm:$0x1] }
 0x47c   : > { %8370 = vmatpush3.bf16.msra.mxu1 %v9235_v22  ;;  %v6569_v22 = vrot.slane %v6567_v24, 4  ;;  %v6590_v37 = vshll.u32 %v6553_v23, 16  ;;  %v6562_v23 = vld [vmem:[#allocation3 + $0x40] sm:$0xf] }
 0x47d   : > { %6227 = vmatmul.mubr.bf16.vlgmr.msra.gmra.mrb[32].mxu0 %v8119_v31  ;;  %v8102_v31 = vrot.slane %v6015_v30, 9  ;;  %v6609_v30 = vshrl.u32 %v6556_v17, 16 }
 0x47e   : > { %6446 = vmatpush1.bf16.msra.mxu0 %v9148_v35  ;;  %6236 = vmatprep.mubr.bf16.mxu0 %v9250_v2  ;;  %v9163_v35 = vld [vmem:[%s11107_s8 + $0x350] ss:$8 sps:$4 sm:$0xff]  }
 0x47f   : > { %6447 = vmatprep.subr.bf16.mxu0 %v9153_v38  ;;  %v9168_v38 = vld [vmem:[%s11107_s8 + $0x364] ss:$8 sps:$4 sm:$0xff]   ;;  %v6064_v29 = vsel %vm10606_vm11, %v8102_v31, %v6063_v47  ;;  %v6612_v47 = vshll.u32 %v6556_v17, 16  ;;  %v9205_v17 = vld [vmem:[%s11107_s8 + $0x414] ss:$8 sps:$4 sm:$0xff]  }
 0x480   : > { %v8122_v19 = vcombine.low %v6060_v53, %v6064_v29  ;;  %v9199_v29 = vld [vmem:[%s11107_s8 + $0x3f4] ss:$8 sps:$4 sm:$0xff]  }
 0x482   : > { %6448 = vmatpush1.bf16.msra.mxu0 %v9151_v46  ;;  %v9169_v46 = vld [vmem:[%s11107_s8 + $0x370] ss:$8 sps:$4 sm:$0xff]  }
 0x483   : > { %6449 = vmatprep.subr.bf16.mxu0 %v9156_v4  ;;  %v9175_v4 = vld [vmem:[#allocation3 + $0x10] ss:$8 sps:$4 sm:$0xff]  }
 0x485   : > { %6237 = vmatmul.mubr.bf16.gmra.mrb[36].mxu0 %v8120_v10  ;;  %v9183_v10 = vld [vmem:[%s11107_s8 + $0x3b0] ss:$8 sps:$4 sm:$0xff]  }
 0x486   : > { %6450 = vmatpush1.bf16.msra.mxu0 %v9154_v3  ;;  %6246 = vmatprep.mubr.bf16.mxu0 %v9250_v2  ;;  %v9185_v3 = vld [vmem:[%s11107_s8 + $0x3b4] ss:$8 sps:$4 sm:$0xff]  }
 0x487   : > { %6451 = vmatprep.subr.bf16.mxu0 %v9159_v51  ;;  %v9188_v51 = vld [vmem:[%s11107_s8 + $0x3c4] ss:$8 sps:$4 sm:$0xff]  }
 0x48a   : > { %6452 = vmatpush1.bf16.msra.mxu0 %v9157_v15  ;;  %v9189_v15 = vld [vmem:[#allocation3 + $0x30] ss:$8 sps:$4 sm:$0xff]  }
 0x48b   : > { %6453 = vmatprep.subr.bf16.mxu0 %v9162_v16  ;;  %v6586_v16 = vrot.slane %v6584_v7, 5 }
 0x48d   : > { %6247 = vmatmul.mubr.bf16.gmra.mrb[40].mxu0 %v8121_v58  ;;  %v6554_v58 = vld [vmem:[#allocation3 + $0x20] sm:$0xf]  ;;  %v6587_v25 = vor.u32 %v6586_v16, %v6583_v8  ;;  %v6564_v8 = vld [vmem:[#allocation3 + $0x48] sm:$0xf] }
 0x48e   : > { %6454 = vmatpush1.bf16.msra.mxu0 %v9160_v42  ;;  %6256 = vmatprep.mubr.bf16.mxu0 %v9250_v2  ;;  %v9195_v42 = vld [vmem:[%s11107_s8 + $0x3e4] ss:$8 sps:$4 sm:$0xff]   ;;  %v6595_v31 = vshrl.u32 %v6554_v58, 16 }
 0x48f   : > { %6455 = vmatprep.subr.bf16.mxu0 %v9165_v62  ;;  %v6551_v62 = vld [vmem:[#allocation3 + $0x14] sm:$0x1]  ;;  %v6588_v53 = vrot.slane %v6587_v25, 4 }
 0x492   : > { %6456 = vmatpush1.bf16.msra.mxu0 %v9163_v35  ;;  %v6573_v35 = vor.u32 %v6572_v28, %v6569_v22 }
 0x493   : > { %6457 = vmatprep.subr.bf16.mxu0 %v9168_v38  ;;  %v6598_v38 = vshll.u32 %v6554_v58, 16  ;;  %v6665_v58 = vshrl.u32 %v6564_v8, 16 }
 0x495   : > { %6257 = vmatmul.mubr.bf16.gmra.mrb[44].mxu0 %v8122_v19  ;;  %v6611_v19 = vrot.slane %v6609_v30, 4 }
 0x496   : > { %6458 = vmatpush1.bf16.msra.mxu0 %v9166_v49  ;;  %6477 = vmatprep.mubr.bf16.mxu0 %v9250_v2  ;;  %v6576_v49 = vshll.u32 %v6551_v62, 16  ;;  %v9203_v62 = vld [vmem:[%s11107_s8 + $0x410] ss:$8 sps:$4 sm:$0xff]  }
 0x497   : > { %6459 = vmatprep.subr.bf16.mxu0 %v9171_v45  ;;  %v6614_v45 = vrot.slane %v6612_v47, 5 }
 0x49a   : > { %6460 = vmatpush1.bf16.msra.mxu0 %v9169_v46  ;;  %v6557_v46 = vld [vmem:[#allocation3 + $0x2c] sm:$0x1] }
 0x49b   : > { %6807 = vmatprep.subr.bf16.mxu0 %v9174_v26  ;;  %v6560_v26 = vld [vmem:[#allocation3 + $0x38] sm:$0xf]  ;;  %v6618_v7 = vshll.u32 %v6557_v46, 16 }
 0x49c   : > { %v6637_v11 = vshrl.u32 %v6560_v26, 16  ;;  %v6640_v52 = vshll.u32 %v6560_v26, 16 }
 0x49d   : > { %6478 = vmatmul.mubr.bf16.vlgmr.msra.gmra.mrb[32].mxu0 %v9175_v4  ;;  %v6574_v4 = vrot.slane %v6573_v35, 4  ;;  %v6620_v30 = vrot.slane %v6618_v7, 5  ;;  %v9208_v35 = vld [vmem:[%s11107_s8 + $0x424] ss:$8 sps:$4 sm:$0xff]  }
 0x49e   : > { %6808 = vmatpush1.bf16.msra.mxu0 %v9172_v1  ;;  %6487 = vmatprep.mubr.bf16.mxu0 %v9250_v2  ;;  %v9197_v1 = vld [vmem:[%s11107_s8 + $0x3f0] ss:$8 sps:$4 sm:$0xff]   ;;  %v6639_v28 = vrot.slane %v6637_v11, 4  ;;  %v9214_v7 = vld [vmem:[%s11107_s8 + $0x444] ss:$8 sps:$4 sm:$0xff]  }
 0x49f   : > { %6809 = vmatprep.subr.bf16.mxu0 %v9178_v33  ;;  %v6592_v33 = vrot.slane %v6590_v37, 5 }
 0x4a1   : > { %v6593_v6 = vsel %vm9827_vm7, %v6588_v53, %v6592_v33  ;;  %v6654_v53 = vshll.u32 %v6562_v23, 16  ;;  %v9211_v33 = vld [vmem:[%s11107_s8 + $0x434] ss:$8 sps:$4 sm:$0xff]  }
 0x4a2   : > { %6810 = vmatpush1.bf16.msra.mxu0 %v9176_v40  ;;  %v6597_v40 = vrot.slane %v6595_v31, 4  ;;  %v6561_v31 = vld [vmem:[#allocation3 + $0x3c] sm:$0x1] }
 0x4a3   : > { %6811 = vmatprep.subr.bf16.mxu0 %v9181_v5  ;;  %v6600_v5 = vrot.slane %v6598_v38, 5  ;;  %v6668_v38 = vshll.u32 %v6564_v8, 16 }
 0x4a5   : > { %6488 = vmatmul.mubr.bf16.gmra.mrb[36].mxu0 %v9182_v56  ;;  %v6578_v56 = vrot.slane %v6576_v49, 5  ;;  %v6601_v14 = vor.u32 %v6600_v5, %v6597_v40  ;;  %v6651_v49 = vshrl.u32 %v6562_v23, 16  ;;  %v6667_v40 = vrot.slane %v6665_v58, 4 }
 0x4a6   : > { %6812 = vmatpush1.bf16.msra.mxu0 %v9179_v55  ;;  %6497 = vmatprep.mubr.bf16.mxu0 %v9250_v2  ;;  %v9202_v55 = vld [vmem:[%s11107_s8 + $0x404] ss:$8 sps:$4 sm:$0xff]   ;;  %v6670_v5 = vrot.slane %v6668_v38, 5  ;;  %v9223_v38 = vld [vmem:[%s11107_s8 + $0x474] ss:$8 sps:$4 sm:$0xff]  }
 0x4a7   : > { %6813 = vmatprep.subr.bf16.mxu0 %v9185_v3  ;;  %v6558_v3 = vld [vmem:[#allocation3 + $0x30] sm:$0xf]  ;;  %v6579_v24 = vsel %vm9827_vm7, %v6574_v4, %v6578_v56  ;;  %v6602_v25 = vrot.slane %v6601_v14, 4 }
 0x4a8   : > { %v8191_v16 = vcombine.low %v6579_v24, %v6593_v6  ;;  %v6656_v6 = vrot.slane %v6654_v53, 5  ;;  %v6671_v24 = vor.u32 %v6670_v5, %v6667_v40  ;;  %v6912_v53 = vld [vmem:[#allocation3 + $0x10] sm:$0xe]  ;;  %v6917_v40 = vld [vmem:[#allocation3 + $0x24] sm:$0x1] }
 0x4a9   : > { %v6918_v5 = vld [vmem:[#allocation3 + $0x28] sm:$0xe] }
 0x4aa   : > { %6814 = vmatpush1.bf16.msra.mxu0 %v9183_v10  ;;  %v6555_v10 = vld [vmem:[#allocation3 + $0x24] sm:$0x1]  ;;  %v6672_v23 = vrot.slane %v6671_v24, 4  ;;  %v6922_v24 = vld [vmem:[#allocation3 + $0x38] sm:$0xe] }
 0x4ab   : > { %6815 = vmatprep.subr.bf16.mxu0 %v9188_v51  ;;  %v6615_v51 = vor.u32 %v6614_v45, %v6611_v19  ;;  %v6559_v19 = vld [vmem:[#allocation3 + $0x34] sm:$0x1]  ;;  %v9206_v45 = vld [vmem:[%s11107_s8 + $0x420] ss:$8 sps:$4 sm:$0xff]  }
 0x4ad   : > { %6498 = vmatmul.mubr.bf16.gmra.mrb[40].mxu0 %v9189_v15  ;;  %v6623_v15 = vshrl.u32 %v6558_v3, 16  ;;  %v6616_v22 = vrot.slane %v6615_v51, 4  ;;  %v9209_v51 = vld [vmem:[%s11107_s8 + $0x430] ss:$8 sps:$4 sm:$0xff]  }
 0x4ae   : > { %6816 = vmatpush1.bf16.msra.mxu0 %v9186_v13  ;;  %6507 = vmatprep.mubr.bf16.mxu0 %v9250_v2  ;;  %v9200_v13 = vld [vmem:[%s11107_s8 + $0x400] ss:$8 sps:$4 sm:$0xff]  }
 0x4af   : > { %6817 = vmatprep.subr.bf16.mxu0 %v9192_v57  ;;  %v6626_v57 = vshll.u32 %v6558_v3, 16  ;;  %v6625_v47 = vrot.slane %v6623_v15, 4  ;;  %v6653_v3 = vrot.slane %v6651_v49, 4 }
 0x4b2   : > { %6818 = vmatpush1.bf16.msra.mxu0 %v9190_v20  ;;  %v6604_v20 = vshll.u32 %v6555_v10, 16  ;;  %v6565_v10 = vld [vmem:[#allocation3 + $0x4c] sm:$0x1] }
 0x4b3   : > { %6819 = vmatprep.subr.bf16.mxu0 %v9195_v42  ;;  %v6642_v42 = vrot.slane %v6640_v52, 5  ;;  %v6674_v8 = vshll.u32 %v6565_v10, 16 }
 0x4b4   : > { %v6606_v37 = vrot.slane %v6604_v20, 5 }
 0x4b5   : > { %6508 = vmatmul.mubr.bf16.gmra.mrb[44].mxu0 %v9196_v39  ;;  %v6621_v39 = vsel %vm9827_vm7, %v6616_v22, %v6620_v30  ;;  %v6676_v58 = vrot.slane %v6674_v8, 5  ;;  %v9220_v30 = vld [vmem:[%s11107_s8 + $0x464] ss:$8 sps:$4 sm:$0xff]   ;;  %v8216_v8 = vrot.slane %v6922_v24, 9 }
 0x4b6   : > { %6820 = vmatpush1.bf16.msra.mxu0 %v9193_v32  ;;  %6839 = vmatprep.mubr.bf16.mxu0 %v9250_v2  ;;  %v6628_v32 = vrot.slane %v6626_v57, 5  ;;  %v6607_v46 = vsel %vm9827_vm7, %v6602_v25, %v6606_v37  ;;  %v6657_v57 = vor.u32 %v6656_v6, %v6653_v3  ;;  %v9218_v37 = vld [vmem:[%s11107_s8 + $0x460] ss:$8 sps:$4 sm:$0xff]   ;;  %v6954_v3 = vrot.slane %v6917_v40, 5 }
 0x4b7   : > { %6821 = vmatprep.subr.bf16.mxu0 %v9199_v29  ;;  %v6643_v29 = vor.u32 %v6642_v42, %v6639_v28  ;;  %v8192_v4 = vcombine.low %v6607_v46, %v6621_v39  ;;  %v9217_v28 = vld [vmem:[%s11107_s8 + $0x454] ss:$8 sps:$4 sm:$0xff]   ;;  %v8211_v46 = vrot.slane %v6912_v53, 9  ;;  %v8214_v6 = vrot.slane %v6918_v5, 9  ;;  %v4433_v53 = vld [vmem:[%s11108_s9] sm:$0x3] }
 0x4b8   : > { %v6629_v26 = vor.u32 %v6628_v32, %v6625_v47  ;;  %v6658_v42 = vrot.slane %v6657_v57, 4  ;;  %v6677_v32 = vsel %vm9827_vm7, %v6672_v23, %v6676_v58  ;;  %v6913_v39 = vld [vmem:[#allocation3 + $0x14] sm:$0x1]  ;;  %v6924_v58 = vld [vmem:[#allocation3 + $0x40] sm:$0xe] }
 0x4b9   : > { %v6644_v56 = vrot.slane %v6643_v29, 4  ;;  %v6914_v29 = vld [vmem:[#allocation3 + $0x18] sm:$0xe] }
 0x4ba   : > { %6822 = vmatpush1.bf16.msra.mxu0 %v9197_v1  ;;  %v6646_v1 = vshll.u32 %v6561_v31, 16  ;;  %v6630_v11 = vrot.slane %v6629_v26, 4 }
 0x4bb   : > { %7105 = vmatprep.subr.bf16.mxu0 %v9202_v55  ;;  %v6632_v55 = vshll.u32 %v6559_v19, 16  ;;  %v6946_v19 = vrot.slane %v6913_v39, 5  ;;  %v4435_v39 = vlaneseq }
 0x4bc   : > { %v6648_v52 = vrot.slane %v6646_v1, 5  ;;  %v6919_v1 = vld [vmem:[#allocation3 + $0x2c] sm:$0x1] }
 0x4bd   : > { %6840 = vmatmul.mubr.bf16.vlgmr.msra.gmra.mrb[32].mxu0 %v8191_v16  ;;  %v6634_v14 = vrot.slane %v6632_v55, 5  ;;  %v9212_v16 = vld [vmem:[%s11107_s8 + $0x440] ss:$8 sps:$4 sm:$0xff]   ;;  %v6958_v55 = vrot.slane %v6919_v1, 5 }
 0x4be   : > { %7106 = vmatpush1.bf16.msra.mxu0 %v9200_v13  ;;  %6849 = vmatprep.mubr.bf16.mxu0 %v9250_v2  ;;  %v6563_v13 = vld [vmem:[#allocation3 + $0x44] sm:$0x1]  ;;  %v6649_v15 = vsel %vm9827_vm7, %v6644_v56, %v6648_v52  ;;  %v6916_v56 = vld [vmem:[#allocation3 + $0x20] sm:$0xe] }
 0x4bf   : > { %7107 = vmatprep.subr.bf16.mxu0 %v9205_v17  ;;  %v6635_v17 = vsel %vm9827_vm7, %v6630_v11, %v6634_v14  ;;  %v6660_v20 = vshll.u32 %v6563_v13, 16  ;;  %v8213_v10 = vrot.slane %v6916_v56, 9  ;;  %v6923_v11 = vld [vmem:[#allocation3 + $0x3c] sm:$0x1]  ;;  %v6921_v13 = vld [vmem:[#allocation3 + $0x34] sm:$0x1] }
 0x4c0   : > { %v8193_v22 = vcombine.low %v6635_v17, %v6649_v15  ;;  %v6966_v14 = vrot.slane %v6923_v11, 5  ;;  %v6920_v15 = vld [vmem:[#allocation3 + $0x30] sm:$0xe]  ;;  %v6962_v57 = vrot.slane %v6921_v13, 5 }
 0x4c1   : > { %v6662_v25 = vrot.slane %v6660_v20, 5  ;;  %v6955_v52 = vsel %vm10606_vm11, %v8213_v10, %v6954_v3  ;;  %v6925_v20 = vld [vmem:[#allocation3 + $0x44] sm:$0x1] }
 0x4c2   : > { %7108 = vmatpush1.bf16.msra.mxu0 %v9203_v62  ;;  %v9215_v62 = vld [vmem:[%s11107_s8 + $0x450] ss:$8 sps:$4 sm:$0xff]   ;;  %v6967_v17 = vsel %vm10606_vm11, %v8216_v8, %v6966_v14 }
 0x4c3   : > { %7109 = vmatprep.subr.bf16.mxu0 %v9208_v35  ;;  %v6663_v47 = vsel %vm9827_vm7, %v6658_v42, %v6662_v25  ;;  %v6915_v35 = vld [vmem:[#allocation3 + $0x1c] sm:$0x1] }
 0x4c4   : > { %v8194_v31 = vcombine.low %v6663_v47, %v6677_v32  ;;  %v6950_v49 = vrot.slane %v6915_v35, 5  ;;  %v8217_v47 = vrot.slane %v6924_v58, 9 }
 0x4c5   : > { %6850 = vmatmul.mubr.bf16.gmra.mrb[36].mxu0 %v8192_v4  ;;  %v6947_v4 = vsel %vm10606_vm11, %v8211_v46, %v6946_v19 }
 0x4c6   : > { %7110 = vmatpush1.bf16.msra.mxu0 %v9206_v45  ;;  %6859 = vmatprep.mubr.bf16.mxu0 %v9250_v2  ;;  %v8212_v45 = vrot.slane %v6914_v29, 9  ;;  %v4436_v29 = vshrl.u32 %v4435_v39, 7 }
 0x4c7   : > { %7111 = vmatprep.subr.bf16.mxu0 %v9211_v33 }
 0x4c8   : > { %v6951_v26 = vsel %vm10606_vm11, %v8212_v45, %v6950_v49  ;;  %v4437_v49 = vsub.s32 0, %v4436_v29 }
 0x4c9   : > { %v8235_v33 = vcombine.low %v6947_v4, %v6951_v26 }
 0x4ca   : > { %7112 = vmatpush1.bf16.msra.mxu0 %v9209_v51  ;;  %v6959_v51 = vsel %vm10606_vm11, %v8214_v6, %v6958_v55  ;;  %v4438_v19 = vrot.slane %v4433_v53, %v4437_v49 }
 0x4cb   : > { %7113 = vmatprep.subr.bf16.mxu0 %v9214_v7  ;;  %v8236_v7 = vcombine.low %v6955_v52, %v6959_v51 }
 0x4cc   : > { %v4445_v46 = vmul.f32 %v4438_v19, %v10298_v36  ;;  %v4447_v4 = vmul.f32 %v4438_v19, %v10302_v9  ;;  %v4449_v52 = vmul.f32 %v4438_v19, %v10310_v18  ;;  %v4453_v18 = vmul.f32 %v4438_v19, %v10322_v61 }
 0x4cd   : > { %6860 = vmatmul.mubr.bf16.gmra.mrb[40].mxu0 %v8193_v22  ;;  %v6926_v22 = vld [vmem:[#allocation3 + $0x48] sm:$0xe]  ;;  %v4457_v61 = vmul.f32 %v4438_v19, %v10334_v59 }
 0x4ce   : > { %7114 = vmatpush1.bf16.msra.mxu0 %v9212_v16  ;;  %6869 = vmatprep.mubr.bf16.mxu0 %v9250_v2  ;;  %v8215_v16 = vrot.slane %v6920_v15, 9  ;;  %v8218_v25 = vrot.slane %v6926_v22, 9 }
 0x4cf   : > { %7115 = vmatprep.subr.bf16.mxu0 %v9217_v28  ;;  %v6927_v28 = vld [vmem:[#allocation3 + $0x4c] sm:$0x1] }
 0x4d0   : > { %v6963_v42 = vsel %vm10606_vm11, %v8215_v16, %v6962_v57 }
 0x4d1   : > { %v8237_v23 = vcombine.low %v6963_v42, %v6967_v17 }
 0x4d2   : > { %7116 = vmatpush1.bf16.msra.mxu0 %v9215_v62  ;;  %v6970_v62 = vrot.slane %v6925_v20, 5 }
 0x4d3   : > { %7117 = vmatprep.subr.bf16.mxu0 %v9220_v30  ;;  %v6974_v30 = vrot.slane %v6927_v28, 5 }
 0x4d4   : > { %v6971_v32 = vsel %vm10606_vm11, %v8217_v47, %v6970_v62 }
 0x4d5   : > { %6870 = vmatmul.mubr.bf16.gmra.mrb[44].mxu0 %v8194_v31  ;;  %v6975_v35 = vsel %vm10606_vm11, %v8218_v25, %v6974_v30  ;;  %v9236_v31 = vld [vmem:[%s11109_s10 + $0x70] sm:$0xff]  }
 0x4d6   : > { %7118 = vmatpush1.bf16.msra.mxu0 %v9218_v37  ;;  %7137 = vmatprep.mubr.bf16.mxu0 %v9250_v2  ;;  %v8238_v37 = vcombine.low %v6971_v32, %v6975_v35 }
 0x4d7   : > { %7119 = vmatprep.subr.bf16.mxu0 %v9223_v38  ;;  %v9237_v38 = vld [vmem:[%s11109_s10 + $0x30] sm:$0xff]   ;;  %8371 = vmatprep.subr.bf16.mxu1 %v9236_v31 }
 0x4d8   : > { %8372 = vmatpush3.bf16.msra.mxu1 %v9237_v38 }
 0x4da   : > { %7120 = vmatpush1.bf16.msra.mxu0 %v9221_v21  ;;  %v4441_v21 = vsub.s32 1, %v4436_v29 }
 0x4dc   : > { %v4442_v45 = vrot.slane %v4433_v53, %v4441_v21 }
 0x4dd   : > { %7138 = vmatmul.mubr.bf16.vlgmr.msra.gmra.mrb[32].mxu0 %v8235_v33 }
 0x4de   : > { %7147 = vmatprep.mubr.bf16.mxu0 %v9250_v2  ;;  %v4446_v26 = vmul.f32 %v4442_v45, %v10300_v60  ;;  %v4448_v5 = vmul.f32 %v4442_v45, %v10306_v43  ;;  %v4450_v36 = vmul.f32 %v4442_v45, %v10312_v27  ;;  %v4451_v60 = vmul.f32 %v4438_v19, %v10314_v44 }
 0x4df   : > { %v4452_v43 = vmul.f32 %v4442_v45, %v10318_v41  ;;  %v4454_v27 = vmul.f32 %v4442_v45, %v10324_v48  ;;  %v4455_v44 = vmul.f32 %v4438_v19, %v10326_v50  ;;  %v4456_v41 = vmul.f32 %v4442_v45, %v10330_v54 }
 0x4e0   : > { %v4458_v48 = vmul.f32 %v4442_v45, %v10336_v63  ;;  %v4459_v50 = vmul.f32 %v4438_v19, %v10338_v0  ;;  %v4460_v54 = vmul.f32 %v4442_v45, %v10342_v34  ;;  %v8255_v63 = vld [vmem:[%s11110_s11] ss:$0 sm:$0xff] }
 0x4e1   : > { %v8272_v34 = vld [vmem:[%s11111_s12] ss:$0 sm:$0xff] }
 0x4e5   : > { %7148 = vmatmul.mubr.bf16.gmra.mrb[36].mxu0 %v8236_v7 }
 0x4e6   : > { %7157 = vmatprep.mubr.bf16.mxu0 %v9250_v2 }
 0x4ed   : > { %7158 = vmatmul.mubr.bf16.gmra.mrb[40].mxu0 %v8237_v23 }
 0x4ee   : > { %7167 = vmatprep.mubr.bf16.mxu0 %v9250_v2  ;;  %v9238_v2 = vld [vmem:[%s11109_s10 + $0x78] sm:$0xff]  }
 0x4ef   : > { %8373 = vmatprep.subr.bf16.mxu1 %v9238_v2 }
 0x4f0   : > { %8374 = vmatpush3.bf16.msra.mxu1 %v9239_v12 }
 0x4f5   : > { %7168 = vmatmul.mubr.bf16.gmra.mrb[44].mxu0 %v8238_v37 }
 0x5b0   : > { %v7139_v1 = vpop.f32.mrb[32].mxu0 }
 0x5b1   : > { %v8439_v33 = vadd.f32 %v7139_v1, %v4445_v46  ;;  %v7141_v40 = vpop.f32.mrb[33].mxu0 }
 0x5b2   : > { %v8440_v55 = vadd.f32 %v7141_v40, %v4446_v26  ;;  %v7143_v56 = vpop.f32.mrb[34].mxu0 }
 0x5b3   : > { %v8441_v3 = vadd.f32 %v7143_v56, %v4447_v4  ;;  %v7145_v6 = vpop.f32.mrb[35].mxu0 }
 0x5b4   : > { %v8442_v10 = vadd.f32 %v7145_v6, %v4448_v5 }
 0x5b5   : > { %v7226_v51 = vpack.c.bf16 %v8441_v3, %v8439_v33 }
 0x5b6   : > { %v7227_v11 = vpack.c.bf16 %v8442_v10, %v8440_v55 }
 0x5b8   : > { %v7149_v7 = vpop.f32.mrb[36].mxu0  ;;  %7401 = vmatprep.mubr.bf16.mxu1 %v7227_v11 }
 0x5b9   : > { %v8443_v9 = vadd.f32 %v7149_v7, %v4449_v52  ;;  %v7151_v13 = vpop.f32.mrb[37].mxu0  ;;  %7402 = vmatmul.mubr.bf16.vlgmr.msra.gmra.mrb[32].mxu1 %v7226_v51 }
 0x5ba   : > { %v8444_v24 = vadd.f32 %v7151_v13, %v4450_v36  ;;  %v7153_v14 = vpop.f32.mrb[38].mxu0 }
 0x5bb   : > { %v8445_v15 = vadd.f32 %v7153_v14, %v4451_v60  ;;  %v7155_v57 = vpop.f32.mrb[39].mxu0 }
 0x5bc   : > { %v8446_v8 = vadd.f32 %v7155_v57, %v4452_v43 }
 0x5bd   : > { %v7228_v16 = vpack.c.bf16 %v8445_v15, %v8443_v9 }
 0x5be   : > { %v7229_v17 = vpack.c.bf16 %v8446_v8, %v8444_v24 }
 0x5c0   : > { %v7159_v20 = vpop.f32.mrb[40].mxu0  ;;  %7409 = vmatprep.mubr.bf16.mxu1 %v7229_v17 }
 0x5c1   : > { %v8447_v22 = vadd.f32 %v7159_v20, %v4453_v18  ;;  %v7161_v28 = vpop.f32.mrb[41].mxu0  ;;  %7410 = vmatmul.mubr.bf16.gmra.mrb[36].mxu1 %v7228_v16 }
 0x5c2   : > { %v8448_v42 = vadd.f32 %v7161_v28, %v4454_v27  ;;  %v7163_v23 = vpop.f32.mrb[42].mxu0 }
 0x5c3   : > { %v8449_v58 = vadd.f32 %v7163_v23, %v4455_v44  ;;  %v7165_v62 = vpop.f32.mrb[43].mxu0 }
 0x5c4   : > { %v8450_v25 = vadd.f32 %v7165_v62, %v4456_v41 }
 0x5c5   : > { %v7230_v30 = vpack.c.bf16 %v8449_v58, %v8447_v22 }
 0x5c6   : > { %v7231_v47 = vpack.c.bf16 %v8450_v25, %v8448_v42 }
 0x5c8   : > { %v7169_v32 = vpop.f32.mrb[44].mxu0  ;;  %7417 = vmatprep.mubr.bf16.mxu1 %v7231_v47 }
 0x5c9   : > { %v8451_v35 = vadd.f32 %v7169_v32, %v4457_v61  ;;  %v7171_v37 = vpop.f32.mrb[45].mxu0  ;;  %7418 = vmatmul.mubr.bf16.gmra.mrb[40].mxu1 %v7230_v30 }
 0x5ca   : > { %v8452_v31 = vadd.f32 %v7171_v37, %v4458_v48  ;;  %v7173_v38 = vpop.f32.mrb[46].mxu0 }
 0x5cb   : > { %v8453_v2 = vadd.f32 %v7173_v38, %v4459_v50  ;;  %v7175_v12 = vpop.f32.mrb[47].mxu0 }
 0x5cc   : > { %v8454_v39 = vadd.f32 %v7175_v12, %v4460_v54 }
 0x5cd   : > { %v7232_v29 = vpack.c.bf16 %v8453_v2, %v8451_v35 }
 0x5ce   : > { %v7233_v49 = vpack.c.bf16 %v8454_v39, %v8452_v31 }
 0x5d0   : > { %7425 = vmatprep.mubr.bf16.mxu1 %v7233_v49 }
 0x5d1   : > { %7426 = vmatmul.mubr.bf16.gmra.mrb[44].mxu1 %v7232_v29 }
 0x68c   : > { %v8375_v59 = vpop.f32.mrb[32].mxu1 }
 0x68d   : > { %v8376_v0 = vpop.f32.mrb[33].mxu1 }
 0x68e   : > { %v8377_v53 = vadd.f32 %v8376_v0, %v8375_v59  ;;  %v8378_v21 = vpop.f32.mrb[34].mxu1 }
 0x68f   : > { %v8379_v19 = vpop.f32.mrb[35].mxu1 }
 0x690   : > { %v7404_v45 = vadd.f32 %v8377_v53, %v8255_v63  ;;  %v8380_v46 = vadd.f32 %v8379_v19, %v8378_v21 }
 0x692   : > { %vm7435_vm7 = vcmp.gt.f32.partialorder %v7404_v45, 0.0  ;;  %v7449_v26 = vmul.f32 %v8272_v34, %v7404_v45  ;;  %v7407_v1 = vadd.f32 %v8380_v46, %v8255_v63 }
 0x694   : > { %v7457_v4 = vsel %vm7435_vm7, %v7404_v45, %v7449_v26  ;;  %vm7436_vm13 = vcmp.gt.f32.partialorder %v7407_v1, 0.0  ;;  %v7450_v33 = vmul.f32 %v8272_v34, %v7407_v1  ;;  %v8381_v40 = vpop.f32.mrb[36].mxu1 }
 0x695   : > { %7465 = vst [vmem:[%s11086_s20] sm:$0xff] %v7457_v4  ;;  %v8382_v5 = vpop.f32.mrb[37].mxu1 }
 0x696   : > { %v7458_v55 = vsel %vm7436_vm13, %v7407_v1, %v7450_v33  ;;  %v8383_v56 = vadd.f32 %v8382_v5, %v8381_v40  ;;  %v8384_v3 = vpop.f32.mrb[38].mxu1 }
 0x697   : > { %7466 = vst [vmem:[%s11086_s20 + $0x8] sm:$0xff] %v7458_v55  ;;  %v8385_v6 = vpop.f32.mrb[39].mxu1 }
 0x698   : > { %v7412_v10 = vadd.f32 %v8383_v56, %v8255_v63  ;;  %v8386_v51 = vadd.f32 %v8385_v6, %v8384_v3 }
 0x69a   : > { %vm7437_vm14 = vcmp.gt.f32.partialorder %v7412_v10, 0.0  ;;  %v7451_v11 = vmul.f32 %v8272_v34, %v7412_v10  ;;  %v7415_v52 = vadd.f32 %v8386_v51, %v8255_v63 }
 0x69c   : > { %v7459_v36 = vsel %vm7437_vm14, %v7412_v10, %v7451_v11  ;;  %vm7438_vm15 = vcmp.gt.f32.partialorder %v7415_v52, 0.0  ;;  %v7452_v7 = vmul.f32 %v8272_v34, %v7415_v52  ;;  %v8387_v60 = vpop.f32.mrb[40].mxu1 }
 0x69d   : > { %7467 = vst [vmem:[%s11086_s20 + $0x10] sm:$0xff] %v7459_v36  ;;  %v8388_v9 = vpop.f32.mrb[41].mxu1 }
 0x69e   : > { %v7460_v13 = vsel %vm7438_vm15, %v7415_v52, %v7452_v7  ;;  %v8389_v43 = vadd.f32 %v8388_v9, %v8387_v60  ;;  %v8390_v24 = vpop.f32.mrb[42].mxu1 }
 0x69f   : > { %7468 = vst [vmem:[%s11086_s20 + $0x18] sm:$0xff] %v7460_v13  ;;  %v8391_v14 = vpop.f32.mrb[43].mxu1 }
 0x6a0   : > { %v7420_v15 = vadd.f32 %v8389_v43, %v8255_v63  ;;  %v8392_v57 = vadd.f32 %v8391_v14, %v8390_v24 }
 0x6a2   : > { %vm7439_vm0 = vcmp.gt.f32.partialorder %v7420_v15, 0.0  ;;  %v7453_v8 = vmul.f32 %v8272_v34, %v7420_v15  ;;  %v7423_v16 = vadd.f32 %v8392_v57, %v8255_v63 }
 0x6a4   : > { %v7461_v17 = vsel %vm7439_vm0, %v7420_v15, %v7453_v8  ;;  %vm7440_vm1 = vcmp.gt.f32.partialorder %v7423_v16, 0.0  ;;  %v7454_v18 = vmul.f32 %v8272_v34, %v7423_v16  ;;  %v8393_v27 = vpop.f32.mrb[44].mxu1 }
 0x6a5   : > { %7469 = vst [vmem:[%s11086_s20 + $0x20] sm:$0xff] %v7461_v17  ;;  %v8394_v20 = vpop.f32.mrb[45].mxu1 }
 0x6a6   : > { %v7462_v44 = vsel %vm7440_vm1, %v7423_v16, %v7454_v18  ;;  %v8395_v22 = vadd.f32 %v8394_v20, %v8393_v27  ;;  %v8396_v28 = vpop.f32.mrb[46].mxu1 }
 0x6a7   : > { %7470 = vst [vmem:[%s11086_s20 + $0x28] sm:$0xff] %v7462_v44  ;;  %v8397_v41 = vpop.f32.mrb[47].mxu1 }
 0x6a8   : > { %v7428_v42 = vadd.f32 %v8395_v22, %v8255_v63  ;;  %v8398_v23 = vadd.f32 %v8397_v41, %v8396_v28 }
 0x6aa   : > { %vm7441_vm3 = vcmp.gt.f32.partialorder %v7428_v42, 0.0  ;;  %v7455_v58 = vmul.f32 %v8272_v34, %v7428_v42  ;;  %v7431_v62 = vadd.f32 %v8398_v23, %v8255_v63 }
 0x6ac   : > { %v7463_v25 = vsel %vm7441_vm3, %v7428_v42, %v7455_v58  ;;  %vm7442_vm4 = vcmp.gt.f32.partialorder %v7431_v62, 0.0  ;;  %v7456_v30 = vmul.f32 %v8272_v34, %v7431_v62 }
 0x6ad   : > { %7471 = vst [vmem:[%s11086_s20 + $0x30] sm:$0xff] %v7463_v25 }
 0x6ae   : > { %v7464_v47 = vsel %vm7442_vm4, %v7431_v62, %v7456_v30 }
 0x6af   : > { %7472 = vst [vmem:[%s11086_s20 + $0x38] sm:$0xff] %v7464_v47 }
 0x6b0 PF: > { %s23_s25 = sadd.s32 1, %s9248_s25  }
 0x6b1   : > { %p20_p4 = scmp.ge.s32.totalorder %s23_s25, 4  }
 0x6b3   :  { %22 = sbr.rel (!%p20_p4) target bundleno = 1 (0x1), region = 128 }

</bundles_post_ra>
